<compile_context>
chip_gen: v7x
topology: tpu7x:2x2x1
jax: 0.10.0
libtpu: 0.0.40
codegen_flags: <defaults>
</compile_context>

<pallas_src>
from functools import partial

import numpy as np
import jax
import jax.numpy as jnp
from jax.experimental import pallas as pl
from jax.experimental.pallas import tpu as pltpu

nc = 1
ngf = 32
nz = 100
BN_EPS = 1e-5

ROW_TILE = 8      # batch rows per spatial-row block are padded to multiples of 8
K1_PAD = 128      # layer-1 contraction dim (nz=100) padded to a lane tile
LANE_TILE = 128   # lane-dense output width

# (H, W, C) of each layer's output, derived from the PyTorch module.
L1 = (4, 4, ngf * 4)     # ConvT(nz,128,4,1,0)     -> (4, 4, 128)
L2 = (6, 8, ngf * 2)     # ConvT(128,64,(2,4),2,1) -> (6, 8, 64)
L3 = (10, 16, ngf)       # ConvT(64,32,(2,4),2,1)  -> (10,16, 32)
L4 = (20, 32, nc)        # ConvT(32,1,(2,2),2,0)   -> (20,32, 1)


# ----------------------------- fused kernel --------------------------------


def _generator_kernel(row_pad, n_valid,
                      z_ref, w1_ref, a2_hbm, a3_hbm, a4_hbm,
                      g1_ref, b1_ref, g2_ref, b2_ref, g3_ref, b3_ref,
                      out_ref,
                      x1_ref, x2_ref, x3_ref, a2_buf, a3_buf, a4_buf, dsem):
    f32 = jnp.float32
    bf16 = jnp.bfloat16

    # ---- Kick off the layer-2/3/4 weight DMAs immediately; they overlap with
    # layer-1 compute + BN1 and are waited on right before first use.
    cp2 = pltpu.make_async_copy(a2_hbm, a2_buf, dsem.at[0])
    cp3 = pltpu.make_async_copy(a3_hbm, a3_buf, dsem.at[1])
    cp4 = pltpu.make_async_copy(a4_hbm, a4_buf, dsem.at[2])
    cp2.start()
    cp3.start()
    cp4.start()

    # Mask selecting valid batch rows inside each padded row block.
    row_ids = jax.lax.broadcasted_iota(jnp.int32, (row_pad, 1), 0)
    rmask = (row_ids < n_valid).astype(f32)

    def channel_allreduce(x, c):
        """x: (R, W*C) with lanes=(w, c).  Returns x where every lane holds
        the sum over its channel group (per-channel sum, already broadcast
        across the W lane groups).  log2(W) rolls + adds (XLU + VPU)."""
        lanes = x.shape[-1]
        shift = c
        while shift < lanes:
            x = x + pltpu.roll(x, shift, axis=1)
            shift *= 2
        return x

    def bn_relu_inplace(act_ref, hwc, gamma_ref, beta_ref):
        """Training-mode BatchNorm (batch stats, biased var) + ReLU in place.

        rows = (h, batch-padded), lanes = (w, c).  Stats: VPU-accumulated
        per-row partial sums, one masked sublane reduce per statistic, then a
        rotate-allreduce across the W lane groups (no 0/1 fold matrices).
        Padded batch rows are forced back to zero in the epilogue store.
        """
        h_out, w_out, c_out = hwc
        lanes = act_ref.shape[1]
        acc_s = jnp.zeros((row_pad, lanes), f32)
        acc_q = jnp.zeros((row_pad, lanes), f32)
        for h in range(h_out):
            slab = act_ref[h * row_pad:(h + 1) * row_pad, :]
            acc_s = acc_s + slab
            acc_q = acc_q + slab * slab
        acc_s = channel_allreduce(acc_s * rmask, c_out)
        acc_q = channel_allreduce(acc_q * rmask, c_out)
        sum_l = jnp.sum(acc_s, axis=0, keepdims=True)      # (1, lanes)
        sq_l = jnp.sum(acc_q, axis=0, keepdims=True)       # (1, lanes)
        inv_count = 1.0 / float(n_valid * h_out * w_out)
        mean_l = sum_l * inv_count
        var_l = jnp.maximum(sq_l * inv_count - mean_l * mean_l, 0.0)
        scale_l = gamma_ref[...] * jax.lax.rsqrt(var_l + BN_EPS)
        shift_l = beta_ref[...] - mean_l * scale_l
        for h in range(h_out):
            r0 = h * row_pad
            slab = act_ref[r0:r0 + row_pad, :]
            act_ref[r0:r0 + row_pad, :] = (
                jnp.maximum(slab * scale_l + shift_l, 0.0) * rmask)

    def convt_stride2(src_ref, a_buf, dst_ref, h_in, lanes_out):
        """kh=2, sh=2, ph=1 transposed conv along H; width Toeplitz folded into
        the per-kernel-row matrices.  Both row parities fused into ONE matmul:
        RHS = [A_krow1 | A_krow0]; for input row-block m the left half is even
        output row 2m, the right half is odd output row 2m-1."""
        lhs = src_ref[...].astype(bf16)                       # (h_in*rp, K)
        y = jnp.dot(lhs, a_buf[...], preferred_element_type=f32)
        for m in range(h_in):
            s0 = m * row_pad
            if m <= h_in - 2:                                 # even row 2m
                dst_ref[(2 * m) * row_pad:(2 * m + 1) * row_pad, :] = \
                    y[s0:s0 + row_pad, :lanes_out]
            if m >= 1:                                        # odd row 2m-1
                dst_ref[(2 * m - 1) * row_pad:(2 * m) * row_pad, :] = \
                    y[s0:s0 + row_pad, lanes_out:]

    # ---- Layer 1: 1x1 spatial input -> ONE dense matmul for all 4 rows.
    l1_lanes = L1[1] * L1[2]
    y1 = jnp.dot(z_ref[...].astype(bf16), w1_ref[...],
                 preferred_element_type=f32)                  # (rp, 4*512)
    for h in range(L1[0]):
        x1_ref[h * row_pad:(h + 1) * row_pad, :] = \
            y1[:, h * l1_lanes:(h + 1) * l1_lanes]
    bn_relu_inplace(x1_ref, L1, g1_ref, b1_ref)

    # ---- Layer 2.
    cp2.wait()
    convt_stride2(x1_ref, a2_buf, x2_ref, L1[0], L2[1] * L2[2])
    bn_relu_inplace(x2_ref, L2, g2_ref, b2_ref)

    # ---- Layer 3.
    cp3.wait()
    convt_stride2(x2_ref, a3_buf, x3_ref, L2[0], L3[1] * L3[2])
    bn_relu_inplace(x3_ref, L3, g3_ref, b3_ref)

    # ---- Layer 4: kh=kw=2, s=2, p=0 -> ONE matmul with both row phases packed
    # into a lane-dense 128-wide output, then sigmoid (EUP reciprocal).
    cp4.wait()
    y4 = jnp.dot(x3_ref[...].astype(bf16), a4_buf[...],
                 preferred_element_type=f32)                  # (10*rp, 128)
    sig = pl.reciprocal(1.0 + jnp.exp(-y4), approx=True)
    out_ref[...] = jnp.clip(sig, 0.0, 1.0)


def _vmem_spec():
    return pl.BlockSpec(memory_space=pltpu.MemorySpace.VMEM)


def _hbm_spec():
    return pl.BlockSpec(memory_space=pl.ANY)


def _run_fused_generator(kp, z_pad, row_pad, n_valid):
    out_shape = jax.ShapeDtypeStruct((L3[0] * row_pad, LANE_TILE), jnp.float32)
    scratch = [
        pltpu.VMEM((L1[0] * row_pad, L1[1] * L1[2]), jnp.float32),  # x1
        pltpu.VMEM((L2[0] * row_pad, L2[1] * L2[2]), jnp.float32),  # x2
        pltpu.VMEM((L3[0] * row_pad, L3[1] * L3[2]), jnp.float32),  # x3
        pltpu.VMEM(kp["a2"].shape, jnp.bfloat16),                   # a2 buf
        pltpu.VMEM(kp["a3"].shape, jnp.bfloat16),                   # a3 buf
        pltpu.VMEM(kp["a4"].shape, jnp.bfloat16),                   # a4 buf
        pltpu.SemaphoreType.DMA((3,)),
    ]
    return pl.pallas_call(
        partial(_generator_kernel, row_pad, n_valid),
        out_shape=out_shape,
        in_specs=([_vmem_spec(), _vmem_spec()]      # z, w1 (needed immediately)
                  + [_hbm_spec()] * 3               # a2, a3, a4 (manual DMA)
                  + [_vmem_spec()] * 6),            # gamma/beta (tiny)
        out_specs=_vmem_spec(),
        scratch_shapes=scratch,
    )(z_pad, kp["w1"], kp["a2"], kp["a3"], kp["a4"],
      kp["gamma1"], kp["beta1"], kp["gamma2"], kp["beta2"],
      kp["gamma3"], kp["beta3"])


@jax.jit
def generator_forward(kparams, z):
    """z: (N, nz, 1, 1) -> (N, nc, 20, 32)."""
    n = z.shape[0]
    row_pad = ROW_TILE * ((n + ROW_TILE - 1) // ROW_TILE)
    row_pad = max(row_pad, ROW_TILE)
    z2d = z.reshape(n, nz).astype(jnp.float32)
    z_pad = jnp.zeros((row_pad, K1_PAD), jnp.float32).at[:n, :nz].set(z2d)
    o = _run_fused_generator(kparams, z_pad, row_pad, n)    # (10*rp, 128)
    o = o[:, :2 * L4[1]]                                    # (10*rp, 64)
    o = o.reshape(L3[0], row_pad, 2, L4[1])[:, :n]          # (10, N, 2, 32)
    o = o.transpose(1, 0, 2, 3).reshape(n, L4[0], L4[1])    # (N, 20, 32)
    return o.reshape(n, nc, L4[0], L4[1])                   # NCHW (nc == 1)


# --------------------- parameter init & one-time packing -------------------


def init_params(key):
    """DCGAN-style init; weight shapes match nn.ConvTranspose2d (Cin,Cout,kh,kw)."""
    ks = jax.random.split(key, 4)
    return {
        "w1": 0.02 * jax.random.normal(ks[0], (nz, ngf * 4, 4, 4), jnp.float32),
        "g1": jnp.ones((ngf * 4,), jnp.float32),
        "b1": jnp.zeros((ngf * 4,), jnp.float32),
        "w2": 0.02 * jax.random.normal(ks[1], (ngf * 4, ngf * 2, 2, 4), jnp.float32),
        "g2": jnp.ones((ngf * 2,), jnp.float32),
        "b2": jnp.zeros((ngf * 2,), jnp.float32),
        "w3": 0.02 * jax.random.normal(ks[2], (ngf * 2, ngf, 2, 4), jnp.float32),
        "g3": jnp.ones((ngf,), jnp.float32),
        "b3": jnp.zeros((ngf,), jnp.float32),
        "w4": 0.02 * jax.random.normal(ks[3], (ngf, nc, 2, 2), jnp.float32),
    }


def _row_matrices(w, sw, pw, win):
    """ConvTranspose2d weight (Cin,Cout,kh,kw) -> kh matrices A[a] of shape
    (Win*Cin, Wout*Cout) such that, in the lanes=(w,c) layout, the output row
    reading input row ih with kernel row a is simply  in_row @ A[a]."""
    w = np.asarray(w, np.float32)
    cin, cout, kh, kw = w.shape
    wout = (win - 1) * sw - 2 * pw + kw
    mats = np.zeros((kh, win * cin, wout * cout), np.float32)
    for a in range(kh):
        for iw in range(win):
            for ow in range(wout):
                b = ow + pw - sw * iw
                if 0 <= b < kw:
                    mats[a, iw * cin:(iw + 1) * cin,
                         ow * cout:(ow + 1) * cout] = w[:, :, a, b]
    return mats


def prepare_kernel_params(params):
    """One-time repack of the PyTorch-layout weights into the matmul operands
    the fused kernel consumes (hoisted out of the jitted forward)."""
    # Layer 1: all 4 output rows fused into one (K1_PAD, 4*W*C) matrix.
    w1 = np.asarray(params["w1"], np.float32)           # (nz, 128, 4, 4)
    h1, wd1, c1 = L1
    w1k = np.zeros((K1_PAD, h1 * wd1 * c1), np.float32)
    # w1k[ci, h*W*C + w*C + co] = w1[ci, co, h, w]
    w1k[:nz, :] = np.transpose(w1, (0, 2, 3, 1)).reshape(nz, h1 * wd1 * c1)

    a2 = _row_matrices(params["w2"], sw=2, pw=1, win=L1[1])   # (2, 512, 512)
    a3 = _row_matrices(params["w3"], sw=2, pw=1, win=L2[1])   # (2, 512, 512)
    a4 = _row_matrices(params["w4"], sw=2, pw=0, win=L3[1])   # (2, 512, 32)
    # ph=1 layers: kernel row 1 -> even output rows, kernel row 0 -> odd.
    a2cat = np.concatenate([a2[1], a2[0]], axis=1)            # (512, 1024)
    a3cat = np.concatenate([a3[1], a3[0]], axis=1)            # (512, 1024)
    # Layer 4 (ph=0): kernel row 0 -> even, 1 -> odd; pad to 128 lanes.
    a4cat = np.zeros((L3[1] * L3[2], LANE_TILE), np.float32)  # (512, 128)
    a4cat[:, :L4[1]] = a4[0]
    a4cat[:, L4[1]:2 * L4[1]] = a4[1]

    def bcast_lanes(v, w_groups):                             # (1, W*C)
        return jnp.asarray(np.tile(np.asarray(v, np.float32), w_groups)
                           .reshape(1, -1))

    return {
        "w1": jnp.asarray(w1k, jnp.bfloat16),
        "a2": jnp.asarray(a2cat, jnp.bfloat16),
        "a3": jnp.asarray(a3cat, jnp.bfloat16),
        "a4": jnp.asarray(a4cat, jnp.bfloat16),
        "gamma1": bcast_lanes(params["g1"], L1[1]),
        "beta1": bcast_lanes(params["b1"], L1[1]),
        "gamma2": bcast_lanes(params["g2"], L2[1]),
        "beta2": bcast_lanes(params["b2"], L2[1]),
        "gamma3": bcast_lanes(params["g3"], L3[1]),
        "beta3": bcast_lanes(params["b3"], L3[1]),
    }


# --------------------------- NumPy reference --------------------------------


def _reference_forward(params, z):
    """Plain NumPy reference of the PyTorch module (training-mode BN)."""

    def convt(x, w, stride, padding):
        n, _, h, wd = x.shape
        _, cout, kh, kw = w.shape
        sh, sw = stride
        ph, pw = padding
        full = np.zeros((n, cout, (h - 1) * sh + kh, (wd - 1) * sw + kw),
                        np.float32)
        for ih in range(h):
            for iw in range(wd):
                full[:, :, ih * sh:ih * sh + kh, iw * sw:iw * sw + kw] += \
                    np.einsum("nc,cokl->nokl", x[:, :, ih, iw], w)
        return full[:, :, ph:full.shape[2] - ph, pw:full.shape[3] - pw]

    def bn_relu(x, gamma, beta):
        mean = x.mean(axis=(0, 2, 3), keepdims=True)
        var = x.var(axis=(0, 2, 3), keepdims=True)            # biased
        xh = (x - mean) / np.sqrt(var + BN_EPS)
        xh = xh * gamma.reshape(1, -1, 1, 1) + beta.reshape(1, -1, 1, 1)
        return np.maximum(xh, 0.0)

    p = {k: np.asarray(v, np.float32) for k, v in params.items()}
    x = np.asarray(z, np.float32)
    x = bn_relu(convt(x, p["w1"], (1, 1), (0, 0)), p["g1"], p["b1"])
    x = bn_relu(convt(x, p["w2"], (2, 2), (1, 1)), p["g2"], p["b2"])
    x = bn_relu(convt(x, p["w3"], (2, 2), (1, 1)), p["g3"], p["b3"])
    x = convt(x, p["w4"], (2, 2), (0, 0))
    return 1.0 / (1.0 + np.exp(-x))


# --------------------------------- main -------------------------------------


if __name__ == "__main__":
    key = jax.random.PRNGKey(0)
    pkey, zkey = jax.random.split(key)
    params = init_params(pkey)
    kparams = prepare_kernel_params(params)

    batch = 2
    z = jax.random.normal(zkey, (batch, nz, 1, 1), jnp.float32)

    out = generator_forward(kparams, z)
    out = jax.block_until_ready(out)

    assert out.shape == (batch, nc, L4[0], L4[1]), out.shape
    out_np = np.asarray(out)
    assert np.all(np.isfinite(out_np))
    assert np.all((out_np >= 0.0) & (out_np <= 1.0))       # sigmoid range

    # Loose numerical check against a NumPy reference of the PyTorch module
    # (bf16 MXU operands + EUP approx reciprocal give ~1e-3 level deviations).
    ref = _reference_forward(params, z)
    assert ref.shape == out_np.shape
    assert float(np.max(np.abs(out_np - ref))) < 5e-2

    print("KERNEL_OK")
</pallas_src>

<mosaic_0001>
module attributes {stable_mosaic.version = 11 : i64} {
  func.func @_generator_kernel(%arg0: memref<8x128xf32, #tpu.memory_space<vmem>>, %arg1: memref<128x2048xbf16, #tpu.memory_space<vmem>>, %arg2: memref<512x1024xbf16, #tpu.memory_space<any>>, %arg3: memref<512x1024xbf16, #tpu.memory_space<any>>, %arg4: memref<512x128xbf16, #tpu.memory_space<any>>, %arg5: memref<1x512xf32, #tpu.memory_space<vmem>>, %arg6: memref<1x512xf32, #tpu.memory_space<vmem>>, %arg7: memref<1x512xf32, #tpu.memory_space<vmem>>, %arg8: memref<1x512xf32, #tpu.memory_space<vmem>>, %arg9: memref<1x512xf32, #tpu.memory_space<vmem>>, %arg10: memref<1x512xf32, #tpu.memory_space<vmem>>, %arg11: memref<80x128xf32, #tpu.memory_space<vmem>>, %arg12: memref<32x512xf32, #tpu.memory_space<vmem>>, %arg13: memref<48x512xf32, #tpu.memory_space<vmem>>, %arg14: memref<80x512xf32, #tpu.memory_space<vmem>>, %arg15: memref<512x1024xbf16, #tpu.memory_space<vmem>>, %arg16: memref<512x1024xbf16, #tpu.memory_space<vmem>>, %arg17: memref<512x128xbf16, #tpu.memory_space<vmem>>, %arg18: memref<3x!tpu.dma_semaphore, #tpu.memory_space<semaphore_mem>>) attributes {dimension_semantics = [], scalar_prefetch = 0 : i64, scratch_operands = 7 : i64, tpu.core_type = #tpu.core_type<tc>} {
    %c0_i32 = arith.constant 0 : i32
    %0 = tpu.memref_slice %arg18[%c0_i32] : memref<3x!tpu.dma_semaphore, #tpu.memory_space<semaphore_mem>> -> memref<1x!tpu.dma_semaphore, #tpu.memory_space<semaphore_mem>>
    %1 = tpu.memref_squeeze %0 : memref<1x!tpu.dma_semaphore, #tpu.memory_space<semaphore_mem>> -> memref<!tpu.dma_semaphore, #tpu.memory_space<semaphore_mem>>
    tpu.enqueue_dma source(%arg2 : memref<512x1024xbf16, #tpu.memory_space<any>>) target(%arg15 : memref<512x1024xbf16, #tpu.memory_space<vmem>>) target_semaphore(%1 : memref<!tpu.dma_semaphore, #tpu.memory_space<semaphore_mem>>)
    %c1_i32 = arith.constant 1 : i32
    %2 = tpu.memref_slice %arg18[%c1_i32] : memref<3x!tpu.dma_semaphore, #tpu.memory_space<semaphore_mem>> -> memref<1x!tpu.dma_semaphore, #tpu.memory_space<semaphore_mem>>
    %3 = tpu.memref_squeeze %2 : memref<1x!tpu.dma_semaphore, #tpu.memory_space<semaphore_mem>> -> memref<!tpu.dma_semaphore, #tpu.memory_space<semaphore_mem>>
    tpu.enqueue_dma source(%arg3 : memref<512x1024xbf16, #tpu.memory_space<any>>) target(%arg16 : memref<512x1024xbf16, #tpu.memory_space<vmem>>) target_semaphore(%3 : memref<!tpu.dma_semaphore, #tpu.memory_space<semaphore_mem>>)
    %c2_i32 = arith.constant 2 : i32
    %4 = tpu.memref_slice %arg18[%c2_i32] : memref<3x!tpu.dma_semaphore, #tpu.memory_space<semaphore_mem>> -> memref<1x!tpu.dma_semaphore, #tpu.memory_space<semaphore_mem>>
    %5 = tpu.memref_squeeze %4 : memref<1x!tpu.dma_semaphore, #tpu.memory_space<semaphore_mem>> -> memref<!tpu.dma_semaphore, #tpu.memory_space<semaphore_mem>>
    tpu.enqueue_dma source(%arg4 : memref<512x128xbf16, #tpu.memory_space<any>>) target(%arg17 : memref<512x128xbf16, #tpu.memory_space<vmem>>) target_semaphore(%5 : memref<!tpu.dma_semaphore, #tpu.memory_space<semaphore_mem>>)
    %6 = tpu.iota {dimensions = array<i32: 0>} : vector<8x1xi32>
    %c2_i32_0 = arith.constant 2 : i32
    %7 = vector.broadcast %c2_i32_0 : i32 to vector<8x1xi32>
    %8 = arith.cmpi slt, %6, %7 : vector<8x1xi32>
    %9 = arith.extui %8 : vector<8x1xi1> to vector<8x1xi32>
    %10 = arith.sitofp %9 : vector<8x1xi32> to vector<8x1xf32>
    %c0 = arith.constant 0 : index
    %c0_1 = arith.constant 0 : index
    %11 = vector.load %arg0[%c0, %c0_1] : memref<8x128xf32, #tpu.memory_space<vmem>>, vector<8x128xf32>
    %12 = arith.truncf %11 : vector<8x128xf32> to vector<8x128xbf16>
    %c0_2 = arith.constant 0 : index
    %c0_3 = arith.constant 0 : index
    %13 = vector.load %arg1[%c0_2, %c0_3] : memref<128x2048xbf16, #tpu.memory_space<vmem>>, vector<128x2048xbf16>
    %cst = arith.constant dense<0.000000e+00> : vector<8x2048xf32>
    %14 = tpu.matmul %12, %13, %cst {dimension_numbers = #tpu.dot_dimension_numbers<[1], [0], [0], [1], [0, 0, 1, 1], [], []>} : vector<8x128xbf16>, vector<128x2048xbf16>, vector<8x2048xf32> -> vector<8x2048xf32>
    %15 = vector.extract_strided_slice %14 {offsets = [0, 0], sizes = [8, 512], strides = [1, 1]} : vector<8x2048xf32> to vector<8x512xf32>
    %c0_4 = arith.constant 0 : index
    %c0_5 = arith.constant 0 : index
    %16 = vector.load %arg12[%c0_4, %c0_5] : memref<32x512xf32, #tpu.memory_space<vmem>>, vector<8x512xf32>
    tpu.vector_store %arg12[%c0_4, %c0_5], %15 {strides = array<i32>} : memref<32x512xf32, #tpu.memory_space<vmem>>, vector<8x512xf32>,
    %17 = vector.extract_strided_slice %14 {offsets = [0, 512], sizes = [8, 512], strides = [1, 1]} : vector<8x2048xf32> to vector<8x512xf32>
    %c8 = arith.constant 8 : index
    %c0_6 = arith.constant 0 : index
    %18 = vector.load %arg12[%c8, %c0_6] : memref<32x512xf32, #tpu.memory_space<vmem>>, vector<8x512xf32>
    tpu.vector_store %arg12[%c8, %c0_6], %17 {strides = array<i32>} : memref<32x512xf32, #tpu.memory_space<vmem>>, vector<8x512xf32>,
    %19 = vector.extract_strided_slice %14 {offsets = [0, 1024], sizes = [8, 512], strides = [1, 1]} : vector<8x2048xf32> to vector<8x512xf32>
    %c16 = arith.constant 16 : index
    %c0_7 = arith.constant 0 : index
    %20 = vector.load %arg12[%c16, %c0_7] : memref<32x512xf32, #tpu.memory_space<vmem>>, vector<8x512xf32>
    tpu.vector_store %arg12[%c16, %c0_7], %19 {strides = array<i32>} : memref<32x512xf32, #tpu.memory_space<vmem>>, vector<8x512xf32>,
    %21 = vector.extract_strided_slice %14 {offsets = [0, 1536], sizes = [8, 512], strides = [1, 1]} : vector<8x2048xf32> to vector<8x512xf32>
    %c24 = arith.constant 24 : index
    %c0_8 = arith.constant 0 : index
    %22 = vector.load %arg12[%c24, %c0_8] : memref<32x512xf32, #tpu.memory_space<vmem>>, vector<8x512xf32>
    tpu.vector_store %arg12[%c24, %c0_8], %21 {strides = array<i32>} : memref<32x512xf32, #tpu.memory_space<vmem>>, vector<8x512xf32>,
    %cst_9 = arith.constant 0.000000e+00 : f32
    %23 = vector.broadcast %cst_9 : f32 to vector<8x512xf32>
    %cst_10 = arith.constant 0.000000e+00 : f32
    %24 = vector.broadcast %cst_10 : f32 to vector<8x512xf32>
    %c0_11 = arith.constant 0 : index
    %c0_12 = arith.constant 0 : index
    %25 = vector.load %arg12[%c0_11, %c0_12] : memref<32x512xf32, #tpu.memory_space<vmem>>, vector<8x512xf32>
    %26 = arith.addf %23, %25 : vector<8x512xf32>
    %27 = arith.mulf %25, %25 : vector<8x512xf32>
    %28 = arith.addf %24, %27 : vector<8x512xf32>
    %c8_13 = arith.constant 8 : index
    %c0_14 = arith.constant 0 : index
    %29 = vector.load %arg12[%c8_13, %c0_14] : memref<32x512xf32, #tpu.memory_space<vmem>>, vector<8x512xf32>
    %30 = arith.addf %26, %29 : vector<8x512xf32>
    %31 = arith.mulf %29, %29 : vector<8x512xf32>
    %32 = arith.addf %28, %31 : vector<8x512xf32>
    %c16_15 = arith.constant 16 : index
    %c0_16 = arith.constant 0 : index
    %33 = vector.load %arg12[%c16_15, %c0_16] : memref<32x512xf32, #tpu.memory_space<vmem>>, vector<8x512xf32>
    %34 = arith.addf %30, %33 : vector<8x512xf32>
    %35 = arith.mulf %33, %33 : vector<8x512xf32>
    %36 = arith.addf %32, %35 : vector<8x512xf32>
    %c24_17 = arith.constant 24 : index
    %c0_18 = arith.constant 0 : index
    %37 = vector.load %arg12[%c24_17, %c0_18] : memref<32x512xf32, #tpu.memory_space<vmem>>, vector<8x512xf32>
    %38 = arith.addf %34, %37 : vector<8x512xf32>
    %39 = arith.mulf %37, %37 : vector<8x512xf32>
    %40 = arith.addf %36, %39 : vector<8x512xf32>
    %41 = vector.broadcast %10 : vector<8x1xf32> to vector<8x512xf32>
    %42 = arith.mulf %38, %41 : vector<8x512xf32>
    %c128_i32 = arith.constant 128 : i32
    %43 = tpu.dynamic_rotate %42 by %c128_i32 dim 1 : vector<8x512xf32>, i32 -> vector<8x512xf32>
    %44 = arith.addf %42, %43 : vector<8x512xf32>
    %c256_i32 = arith.constant 256 : i32
    %45 = tpu.dynamic_rotate %44 by %c256_i32 dim 1 : vector<8x512xf32>, i32 -> vector<8x512xf32>
    %46 = arith.addf %44, %45 : vector<8x512xf32>
    %47 = vector.broadcast %10 : vector<8x1xf32> to vector<8x512xf32>
    %48 = arith.mulf %40, %47 : vector<8x512xf32>
    %c128_i32_19 = arith.constant 128 : i32
    %49 = tpu.dynamic_rotate %48 by %c128_i32_19 dim 1 : vector<8x512xf32>, i32 -> vector<8x512xf32>
    %50 = arith.addf %48, %49 : vector<8x512xf32>
    %c256_i32_20 = arith.constant 256 : i32
    %51 = tpu.dynamic_rotate %50 by %c256_i32_20 dim 1 : vector<8x512xf32>, i32 -> vector<8x512xf32>
    %52 = arith.addf %50, %51 : vector<8x512xf32>
    %cst_21 = arith.constant dense<0.000000e+00> : vector<512xf32>
    %53 = vector.multi_reduction <add>, %46, %cst_21 [0] : vector<8x512xf32> to vector<512xf32>
    %54 = vector.shape_cast %53 : vector<512xf32> to vector<1x512xf32>
    %cst_22 = arith.constant dense<0.000000e+00> : vector<512xf32>
    %55 = vector.multi_reduction <add>, %52, %cst_22 [0] : vector<8x512xf32> to vector<512xf32>
    %56 = vector.shape_cast %55 : vector<512xf32> to vector<1x512xf32>
    %cst_23 = arith.constant 3.125000e-02 : f32
    %57 = vector.broadcast %cst_23 : f32 to vector<1x512xf32>
    %58 = arith.mulf %54, %57 : vector<1x512xf32>
    %cst_24 = arith.constant 3.125000e-02 : f32
    %59 = vector.broadcast %cst_24 : f32 to vector<1x512xf32>
    %60 = arith.mulf %56, %59 : vector<1x512xf32>
    %61 = arith.mulf %58, %58 : vector<1x512xf32>
    %62 = arith.subf %60, %61 : vector<1x512xf32>
    %cst_25 = arith.constant 0.000000e+00 : f32
    %63 = vector.broadcast %cst_25 : f32 to vector<1x512xf32>
    %64 = arith.maximumf %62, %63 : vector<1x512xf32>
    %c0_26 = arith.constant 0 : index
    %c0_27 = arith.constant 0 : index
    %65 = vector.load %arg5[%c0_26, %c0_27] : memref<1x512xf32, #tpu.memory_space<vmem>>, vector<1x512xf32>
    %cst_28 = arith.constant 9.99999974E-6 : f32
    %66 = vector.broadcast %cst_28 : f32 to vector<1x512xf32>
    %67 = arith.addf %64, %66 : vector<1x512xf32>
    %68 = math.rsqrt %67 : vector<1x512xf32>
    %69 = arith.mulf %65, %68 : vector<1x512xf32>
    %c0_29 = arith.constant 0 : index
    %c0_30 = arith.constant 0 : index
    %70 = vector.load %arg6[%c0_29, %c0_30] : memref<1x512xf32, #tpu.memory_space<vmem>>, vector<1x512xf32>
    %71 = arith.mulf %58, %69 : vector<1x512xf32>
    %72 = arith.subf %70, %71 : vector<1x512xf32>
    %c0_31 = arith.constant 0 : index
    %c0_32 = arith.constant 0 : index
    %73 = vector.load %arg12[%c0_31, %c0_32] : memref<32x512xf32, #tpu.memory_space<vmem>>, vector<8x512xf32>
    %74 = vector.broadcast %69 : vector<1x512xf32> to vector<8x512xf32>
    %75 = arith.mulf %73, %74 : vector<8x512xf32>
    %76 = vector.broadcast %72 : vector<1x512xf32> to vector<8x512xf32>
    %77 = arith.addf %75, %76 : vector<8x512xf32>
    %cst_33 = arith.constant 0.000000e+00 : f32
    %78 = vector.broadcast %cst_33 : f32 to vector<8x512xf32>
    %79 = arith.maximumf %77, %78 : vector<8x512xf32>
    %80 = vector.broadcast %10 : vector<8x1xf32> to vector<8x512xf32>
    %81 = arith.mulf %79, %80 : vector<8x512xf32>
    %c0_34 = arith.constant 0 : index
    %c0_35 = arith.constant 0 : index
    %82 = vector.load %arg12[%c0_34, %c0_35] : memref<32x512xf32, #tpu.memory_space<vmem>>, vector<8x512xf32>
    tpu.vector_store %arg12[%c0_34, %c0_35], %81 {strides = array<i32>} : memref<32x512xf32, #tpu.memory_space<vmem>>, vector<8x512xf32>,
    %c8_36 = arith.constant 8 : index
    %c0_37 = arith.constant 0 : index
    %83 = vector.load %arg12[%c8_36, %c0_37] : memref<32x512xf32, #tpu.memory_space<vmem>>, vector<8x512xf32>
    %84 = vector.broadcast %69 : vector<1x512xf32> to vector<8x512xf32>
    %85 = arith.mulf %83, %84 : vector<8x512xf32>
    %86 = vector.broadcast %72 : vector<1x512xf32> to vector<8x512xf32>
    %87 = arith.addf %85, %86 : vector<8x512xf32>
    %cst_38 = arith.constant 0.000000e+00 : f32
    %88 = vector.broadcast %cst_38 : f32 to vector<8x512xf32>
    %89 = arith.maximumf %87, %88 : vector<8x512xf32>
    %90 = vector.broadcast %10 : vector<8x1xf32> to vector<8x512xf32>
    %91 = arith.mulf %89, %90 : vector<8x512xf32>
    %c8_39 = arith.constant 8 : index
    %c0_40 = arith.constant 0 : index
    %92 = vector.load %arg12[%c8_39, %c0_40] : memref<32x512xf32, #tpu.memory_space<vmem>>, vector<8x512xf32>
    tpu.vector_store %arg12[%c8_39, %c0_40], %91 {strides = array<i32>} : memref<32x512xf32, #tpu.memory_space<vmem>>, vector<8x512xf32>,
    %c16_41 = arith.constant 16 : index
    %c0_42 = arith.constant 0 : index
    %93 = vector.load %arg12[%c16_41, %c0_42] : memref<32x512xf32, #tpu.memory_space<vmem>>, vector<8x512xf32>
    %94 = vector.broadcast %69 : vector<1x512xf32> to vector<8x512xf32>
    %95 = arith.mulf %93, %94 : vector<8x512xf32>
    %96 = vector.broadcast %72 : vector<1x512xf32> to vector<8x512xf32>
    %97 = arith.addf %95, %96 : vector<8x512xf32>
    %cst_43 = arith.constant 0.000000e+00 : f32
    %98 = vector.broadcast %cst_43 : f32 to vector<8x512xf32>
    %99 = arith.maximumf %97, %98 : vector<8x512xf32>
    %100 = vector.broadcast %10 : vector<8x1xf32> to vector<8x512xf32>
    %101 = arith.mulf %99, %100 : vector<8x512xf32>
    %c16_44 = arith.constant 16 : index
    %c0_45 = arith.constant 0 : index
    %102 = vector.load %arg12[%c16_44, %c0_45] : memref<32x512xf32, #tpu.memory_space<vmem>>, vector<8x512xf32>
    tpu.vector_store %arg12[%c16_44, %c0_45], %101 {strides = array<i32>} : memref<32x512xf32, #tpu.memory_space<vmem>>, vector<8x512xf32>,
    %c24_46 = arith.constant 24 : index
    %c0_47 = arith.constant 0 : index
    %103 = vector.load %arg12[%c24_46, %c0_47] : memref<32x512xf32, #tpu.memory_space<vmem>>, vector<8x512xf32>
    %104 = vector.broadcast %69 : vector<1x512xf32> to vector<8x512xf32>
    %105 = arith.mulf %103, %104 : vector<8x512xf32>
    %106 = vector.broadcast %72 : vector<1x512xf32> to vector<8x512xf32>
    %107 = arith.addf %105, %106 : vector<8x512xf32>
    %cst_48 = arith.constant 0.000000e+00 : f32
    %108 = vector.broadcast %cst_48 : f32 to vector<8x512xf32>
    %109 = arith.maximumf %107, %108 : vector<8x512xf32>
    %110 = vector.broadcast %10 : vector<8x1xf32> to vector<8x512xf32>
    %111 = arith.mulf %109, %110 : vector<8x512xf32>
    %c24_49 = arith.constant 24 : index
    %c0_50 = arith.constant 0 : index
    %112 = vector.load %arg12[%c24_49, %c0_50] : memref<32x512xf32, #tpu.memory_space<vmem>>, vector<8x512xf32>
    tpu.vector_store %arg12[%c24_49, %c0_50], %111 {strides = array<i32>} : memref<32x512xf32, #tpu.memory_space<vmem>>, vector<8x512xf32>,
    %c0_i32_51 = arith.constant 0 : i32
    %113 = tpu.memref_slice %arg18[%c0_i32_51] : memref<3x!tpu.dma_semaphore, #tpu.memory_space<semaphore_mem>> -> memref<1x!tpu.dma_semaphore, #tpu.memory_space<semaphore_mem>>
    %114 = tpu.memref_squeeze %113 : memref<1x!tpu.dma_semaphore, #tpu.memory_space<semaphore_mem>> -> memref<!tpu.dma_semaphore, #tpu.memory_space<semaphore_mem>>
    tpu.wait_dma2 semaphore(%114 : memref<!tpu.dma_semaphore, #tpu.memory_space<semaphore_mem>>) src(%arg2 : memref<512x1024xbf16, #tpu.memory_space<any>>) dst(%arg15 : memref<512x1024xbf16, #tpu.memory_space<vmem>>)
    %c0_52 = arith.constant 0 : index
    %c0_53 = arith.constant 0 : index
    %115 = vector.load %arg12[%c0_52, %c0_53] : memref<32x512xf32, #tpu.memory_space<vmem>>, vector<32x512xf32>
    %116 = arith.truncf %115 : vector<32x512xf32> to vector<32x512xbf16>
    %c0_54 = arith.constant 0 : index
    %c0_55 = arith.constant 0 : index
    %117 = vector.load %arg15[%c0_54, %c0_55] : memref<512x1024xbf16, #tpu.memory_space<vmem>>, vector<512x1024xbf16>
    %cst_56 = arith.constant dense<0.000000e+00> : vector<32x1024xf32>
    %118 = tpu.matmul %116, %117, %cst_56 {dimension_numbers = #tpu.dot_dimension_numbers<[1], [0], [0], [1], [0, 0, 1, 1], [], []>} : vector<32x512xbf16>, vector<512x1024xbf16>, vector<32x1024xf32> -> vector<32x1024xf32>
    %119 = vector.extract_strided_slice %118 {offsets = [0, 0], sizes = [8, 512], strides = [1, 1]} : vector<32x1024xf32> to vector<8x512xf32>
    %c0_57 = arith.constant 0 : index
    %c0_58 = arith.constant 0 : index
    %120 = vector.load %arg13[%c0_57, %c0_58] : memref<48x512xf32, #tpu.memory_space<vmem>>, vector<8x512xf32>
    tpu.vector_store %arg13[%c0_57, %c0_58], %119 {strides = array<i32>} : memref<48x512xf32, #tpu.memory_space<vmem>>, vector<8x512xf32>,
    %121 = vector.extract_strided_slice %118 {offsets = [8, 0], sizes = [8, 512], strides = [1, 1]} : vector<32x1024xf32> to vector<8x512xf32>
    %c16_59 = arith.constant 16 : index
    %c0_60 = arith.constant 0 : index
    %122 = vector.load %arg13[%c16_59, %c0_60] : memref<48x512xf32, #tpu.memory_space<vmem>>, vector<8x512xf32>
    tpu.vector_store %arg13[%c16_59, %c0_60], %121 {strides = array<i32>} : memref<48x512xf32, #tpu.memory_space<vmem>>, vector<8x512xf32>,
    %123 = vector.extract_strided_slice %118 {offsets = [8, 512], sizes = [8, 512], strides = [1, 1]} : vector<32x1024xf32> to vector<8x512xf32>
    %c8_61 = arith.constant 8 : index
    %c0_62 = arith.constant 0 : index
    %124 = vector.load %arg13[%c8_61, %c0_62] : memref<48x512xf32, #tpu.memory_space<vmem>>, vector<8x512xf32>
    tpu.vector_store %arg13[%c8_61, %c0_62], %123 {strides = array<i32>} : memref<48x512xf32, #tpu.memory_space<vmem>>, vector<8x512xf32>,
    %125 = vector.extract_strided_slice %118 {offsets = [16, 0], sizes = [8, 512], strides = [1, 1]} : vector<32x1024xf32> to vector<8x512xf32>
    %c32 = arith.constant 32 : index
    %c0_63 = arith.constant 0 : index
    %126 = vector.load %arg13[%c32, %c0_63] : memref<48x512xf32, #tpu.memory_space<vmem>>, vector<8x512xf32>
    tpu.vector_store %arg13[%c32, %c0_63], %125 {strides = array<i32>} : memref<48x512xf32, #tpu.memory_space<vmem>>, vector<8x512xf32>,
    %127 = vector.extract_strided_slice %118 {offsets = [16, 512], sizes = [8, 512], strides = [1, 1]} : vector<32x1024xf32> to vector<8x512xf32>
    %c24_64 = arith.constant 24 : index
    %c0_65 = arith.constant 0 : index
    %128 = vector.load %arg13[%c24_64, %c0_65] : memref<48x512xf32, #tpu.memory_space<vmem>>, vector<8x512xf32>
    tpu.vector_store %arg13[%c24_64, %c0_65], %127 {strides = array<i32>} : memref<48x512xf32, #tpu.memory_space<vmem>>, vector<8x512xf32>,
    %129 = vector.extract_strided_slice %118 {offsets = [24, 512], sizes = [8, 512], strides = [1, 1]} : vector<32x1024xf32> to vector<8x512xf32>
    %c40 = arith.constant 40 : index
    %c0_66 = arith.constant 0 : index
    %130 = vector.load %arg13[%c40, %c0_66] : memref<48x512xf32, #tpu.memory_space<vmem>>, vector<8x512xf32>
    tpu.vector_store %arg13[%c40, %c0_66], %129 {strides = array<i32>} : memref<48x512xf32, #tpu.memory_space<vmem>>, vector<8x512xf32>,
    %cst_67 = arith.constant 0.000000e+00 : f32
    %131 = vector.broadcast %cst_67 : f32 to vector<8x512xf32>
    %cst_68 = arith.constant 0.000000e+00 : f32
    %132 = vector.broadcast %cst_68 : f32 to vector<8x512xf32>
    %c0_69 = arith.constant 0 : index
    %c0_70 = arith.constant 0 : index
    %133 = vector.load %arg13[%c0_69, %c0_70] : memref<48x512xf32, #tpu.memory_space<vmem>>, vector<8x512xf32>
    %134 = arith.addf %131, %133 : vector<8x512xf32>
    %135 = arith.mulf %133, %133 : vector<8x512xf32>
    %136 = arith.addf %132, %135 : vector<8x512xf32>
    %c8_71 = arith.constant 8 : index
    %c0_72 = arith.constant 0 : index
    %137 = vector.load %arg13[%c8_71, %c0_72] : memref<48x512xf32, #tpu.memory_space<vmem>>, vector<8x512xf32>
    %138 = arith.addf %134, %137 : vector<8x512xf32>
    %139 = arith.mulf %137, %137 : vector<8x512xf32>
    %140 = arith.addf %136, %139 : vector<8x512xf32>
    %c16_73 = arith.constant 16 : index
    %c0_74 = arith.constant 0 : index
    %141 = vector.load %arg13[%c16_73, %c0_74] : memref<48x512xf32, #tpu.memory_space<vmem>>, vector<8x512xf32>
    %142 = arith.addf %138, %141 : vector<8x512xf32>
    %143 = arith.mulf %141, %141 : vector<8x512xf32>
    %144 = arith.addf %140, %143 : vector<8x512xf32>
    %c24_75 = arith.constant 24 : index
    %c0_76 = arith.constant 0 : index
    %145 = vector.load %arg13[%c24_75, %c0_76] : memref<48x512xf32, #tpu.memory_space<vmem>>, vector<8x512xf32>
    %146 = arith.addf %142, %145 : vector<8x512xf32>
    %147 = arith.mulf %145, %145 : vector<8x512xf32>
    %148 = arith.addf %144, %147 : vector<8x512xf32>
    %c32_77 = arith.constant 32 : index
    %c0_78 = arith.constant 0 : index
    %149 = vector.load %arg13[%c32_77, %c0_78] : memref<48x512xf32, #tpu.memory_space<vmem>>, vector<8x512xf32>
    %150 = arith.addf %146, %149 : vector<8x512xf32>
    %151 = arith.mulf %149, %149 : vector<8x512xf32>
    %152 = arith.addf %148, %151 : vector<8x512xf32>
    %c40_79 = arith.constant 40 : index
    %c0_80 = arith.constant 0 : index
    %153 = vector.load %arg13[%c40_79, %c0_80] : memref<48x512xf32, #tpu.memory_space<vmem>>, vector<8x512xf32>
    %154 = arith.addf %150, %153 : vector<8x512xf32>
    %155 = arith.mulf %153, %153 : vector<8x512xf32>
    %156 = arith.addf %152, %155 : vector<8x512xf32>
    %157 = vector.broadcast %10 : vector<8x1xf32> to vector<8x512xf32>
    %158 = arith.mulf %154, %157 : vector<8x512xf32>
    %c64_i32 = arith.constant 64 : i32
    %159 = tpu.dynamic_rotate %158 by %c64_i32 dim 1 : vector<8x512xf32>, i32 -> vector<8x512xf32>
    %160 = arith.addf %158, %159 : vector<8x512xf32>
    %c128_i32_81 = arith.constant 128 : i32
    %161 = tpu.dynamic_rotate %160 by %c128_i32_81 dim 1 : vector<8x512xf32>, i32 -> vector<8x512xf32>
    %162 = arith.addf %160, %161 : vector<8x512xf32>
    %c256_i32_82 = arith.constant 256 : i32
    %163 = tpu.dynamic_rotate %162 by %c256_i32_82 dim 1 : vector<8x512xf32>, i32 -> vector<8x512xf32>
    %164 = arith.addf %162, %163 : vector<8x512xf32>
    %165 = vector.broadcast %10 : vector<8x1xf32> to vector<8x512xf32>
    %166 = arith.mulf %156, %165 : vector<8x512xf32>
    %c64_i32_83 = arith.constant 64 : i32
    %167 = tpu.dynamic_rotate %166 by %c64_i32_83 dim 1 : vector<8x512xf32>, i32 -> vector<8x512xf32>
    %168 = arith.addf %166, %167 : vector<8x512xf32>
    %c128_i32_84 = arith.constant 128 : i32
    %169 = tpu.dynamic_rotate %168 by %c128_i32_84 dim 1 : vector<8x512xf32>, i32 -> vector<8x512xf32>
    %170 = arith.addf %168, %169 : vector<8x512xf32>
    %c256_i32_85 = arith.constant 256 : i32
    %171 = tpu.dynamic_rotate %170 by %c256_i32_85 dim 1 : vector<8x512xf32>, i32 -> vector<8x512xf32>
    %172 = arith.addf %170, %171 : vector<8x512xf32>
    %cst_86 = arith.constant dense<0.000000e+00> : vector<512xf32>
    %173 = vector.multi_reduction <add>, %164, %cst_86 [0] : vector<8x512xf32> to vector<512xf32>
    %174 = vector.shape_cast %173 : vector<512xf32> to vector<1x512xf32>
    %cst_87 = arith.constant dense<0.000000e+00> : vector<512xf32>
    %175 = vector.multi_reduction <add>, %172, %cst_87 [0] : vector<8x512xf32> to vector<512xf32>
    %176 = vector.shape_cast %175 : vector<512xf32> to vector<1x512xf32>
    %cst_88 = arith.constant 0.010416667 : f32
    %177 = vector.broadcast %cst_88 : f32 to vector<1x512xf32>
    %178 = arith.mulf %174, %177 : vector<1x512xf32>
    %cst_89 = arith.constant 0.010416667 : f32
    %179 = vector.broadcast %cst_89 : f32 to vector<1x512xf32>
    %180 = arith.mulf %176, %179 : vector<1x512xf32>
    %181 = arith.mulf %178, %178 : vector<1x512xf32>
    %182 = arith.subf %180, %181 : vector<1x512xf32>
    %cst_90 = arith.constant 0.000000e+00 : f32
    %183 = vector.broadcast %cst_90 : f32 to vector<1x512xf32>
    %184 = arith.maximumf %182, %183 : vector<1x512xf32>
    %c0_91 = arith.constant 0 : index
    %c0_92 = arith.constant 0 : index
    %185 = vector.load %arg7[%c0_91, %c0_92] : memref<1x512xf32, #tpu.memory_space<vmem>>, vector<1x512xf32>
    %cst_93 = arith.constant 9.99999974E-6 : f32
    %186 = vector.broadcast %cst_93 : f32 to vector<1x512xf32>
    %187 = arith.addf %184, %186 : vector<1x512xf32>
    %188 = math.rsqrt %187 : vector<1x512xf32>
    %189 = arith.mulf %185, %188 : vector<1x512xf32>
    %c0_94 = arith.constant 0 : index
    %c0_95 = arith.constant 0 : index
    %190 = vector.load %arg8[%c0_94, %c0_95] : memref<1x512xf32, #tpu.memory_space<vmem>>, vector<1x512xf32>
    %191 = arith.mulf %178, %189 : vector<1x512xf32>
    %192 = arith.subf %190, %191 : vector<1x512xf32>
    %c0_96 = arith.constant 0 : index
    %c0_97 = arith.constant 0 : index
    %193 = vector.load %arg13[%c0_96, %c0_97] : memref<48x512xf32, #tpu.memory_space<vmem>>, vector<8x512xf32>
    %194 = vector.broadcast %189 : vector<1x512xf32> to vector<8x512xf32>
    %195 = arith.mulf %193, %194 : vector<8x512xf32>
    %196 = vector.broadcast %192 : vector<1x512xf32> to vector<8x512xf32>
    %197 = arith.addf %195, %196 : vector<8x512xf32>
    %cst_98 = arith.constant 0.000000e+00 : f32
    %198 = vector.broadcast %cst_98 : f32 to vector<8x512xf32>
    %199 = arith.maximumf %197, %198 : vector<8x512xf32>
    %200 = vector.broadcast %10 : vector<8x1xf32> to vector<8x512xf32>
    %201 = arith.mulf %199, %200 : vector<8x512xf32>
    %c0_99 = arith.constant 0 : index
    %c0_100 = arith.constant 0 : index
    %202 = vector.load %arg13[%c0_99, %c0_100] : memref<48x512xf32, #tpu.memory_space<vmem>>, vector<8x512xf32>
    tpu.vector_store %arg13[%c0_99, %c0_100], %201 {strides = array<i32>} : memref<48x512xf32, #tpu.memory_space<vmem>>, vector<8x512xf32>,
    %c8_101 = arith.constant 8 : index
    %c0_102 = arith.constant 0 : index
    %203 = vector.load %arg13[%c8_101, %c0_102] : memref<48x512xf32, #tpu.memory_space<vmem>>, vector<8x512xf32>
    %204 = vector.broadcast %189 : vector<1x512xf32> to vector<8x512xf32>
    %205 = arith.mulf %203, %204 : vector<8x512xf32>
    %206 = vector.broadcast %192 : vector<1x512xf32> to vector<8x512xf32>
    %207 = arith.addf %205, %206 : vector<8x512xf32>
    %cst_103 = arith.constant 0.000000e+00 : f32
    %208 = vector.broadcast %cst_103 : f32 to vector<8x512xf32>
    %209 = arith.maximumf %207, %208 : vector<8x512xf32>
    %210 = vector.broadcast %10 : vector<8x1xf32> to vector<8x512xf32>
    %211 = arith.mulf %209, %210 : vector<8x512xf32>
    %c8_104 = arith.constant 8 : index
    %c0_105 = arith.constant 0 : index
    %212 = vector.load %arg13[%c8_104, %c0_105] : memref<48x512xf32, #tpu.memory_space<vmem>>, vector<8x512xf32>
    tpu.vector_store %arg13[%c8_104, %c0_105], %211 {strides = array<i32>} : memref<48x512xf32, #tpu.memory_space<vmem>>, vector<8x512xf32>,
    %c16_106 = arith.constant 16 : index
    %c0_107 = arith.constant 0 : index
    %213 = vector.load %arg13[%c16_106, %c0_107] : memref<48x512xf32, #tpu.memory_space<vmem>>, vector<8x512xf32>
    %214 = vector.broadcast %189 : vector<1x512xf32> to vector<8x512xf32>
    %215 = arith.mulf %213, %214 : vector<8x512xf32>
    %216 = vector.broadcast %192 : vector<1x512xf32> to vector<8x512xf32>
    %217 = arith.addf %215, %216 : vector<8x512xf32>
    %cst_108 = arith.constant 0.000000e+00 : f32
    %218 = vector.broadcast %cst_108 : f32 to vector<8x512xf32>
    %219 = arith.maximumf %217, %218 : vector<8x512xf32>
    %220 = vector.broadcast %10 : vector<8x1xf32> to vector<8x512xf32>
    %221 = arith.mulf %219, %220 : vector<8x512xf32>
    %c16_109 = arith.constant 16 : index
    %c0_110 = arith.constant 0 : index
    %222 = vector.load %arg13[%c16_109, %c0_110] : memref<48x512xf32, #tpu.memory_space<vmem>>, vector<8x512xf32>
    tpu.vector_store %arg13[%c16_109, %c0_110], %221 {strides = array<i32>} : memref<48x512xf32, #tpu.memory_space<vmem>>, vector<8x512xf32>,
    %c24_111 = arith.constant 24 : index
    %c0_112 = arith.constant 0 : index
    %223 = vector.load %arg13[%c24_111, %c0_112] : memref<48x512xf32, #tpu.memory_space<vmem>>, vector<8x512xf32>
    %224 = vector.broadcast %189 : vector<1x512xf32> to vector<8x512xf32>
    %225 = arith.mulf %223, %224 : vector<8x512xf32>
    %226 = vector.broadcast %192 : vector<1x512xf32> to vector<8x512xf32>
    %227 = arith.addf %225, %226 : vector<8x512xf32>
    %cst_113 = arith.constant 0.000000e+00 : f32
    %228 = vector.broadcast %cst_113 : f32 to vector<8x512xf32>
    %229 = arith.maximumf %227, %228 : vector<8x512xf32>
    %230 = vector.broadcast %10 : vector<8x1xf32> to vector<8x512xf32>
    %231 = arith.mulf %229, %230 : vector<8x512xf32>
    %c24_114 = arith.constant 24 : index
    %c0_115 = arith.constant 0 : index
    %232 = vector.load %arg13[%c24_114, %c0_115] : memref<48x512xf32, #tpu.memory_space<vmem>>, vector<8x512xf32>
    tpu.vector_store %arg13[%c24_114, %c0_115], %231 {strides = array<i32>} : memref<48x512xf32, #tpu.memory_space<vmem>>, vector<8x512xf32>,
    %c32_116 = arith.constant 32 : index
    %c0_117 = arith.constant 0 : index
    %233 = vector.load %arg13[%c32_116, %c0_117] : memref<48x512xf32, #tpu.memory_space<vmem>>, vector<8x512xf32>
    %234 = vector.broadcast %189 : vector<1x512xf32> to vector<8x512xf32>
    %235 = arith.mulf %233, %234 : vector<8x512xf32>
    %236 = vector.broadcast %192 : vector<1x512xf32> to vector<8x512xf32>
    %237 = arith.addf %235, %236 : vector<8x512xf32>
    %cst_118 = arith.constant 0.000000e+00 : f32
    %238 = vector.broadcast %cst_118 : f32 to vector<8x512xf32>
    %239 = arith.maximumf %237, %238 : vector<8x512xf32>
    %240 = vector.broadcast %10 : vector<8x1xf32> to vector<8x512xf32>
    %241 = arith.mulf %239, %240 : vector<8x512xf32>
    %c32_119 = arith.constant 32 : index
    %c0_120 = arith.constant 0 : index
    %242 = vector.load %arg13[%c32_119, %c0_120] : memref<48x512xf32, #tpu.memory_space<vmem>>, vector<8x512xf32>
    tpu.vector_store %arg13[%c32_119, %c0_120], %241 {strides = array<i32>} : memref<48x512xf32, #tpu.memory_space<vmem>>, vector<8x512xf32>,
    %c40_121 = arith.constant 40 : index
    %c0_122 = arith.constant 0 : index
    %243 = vector.load %arg13[%c40_121, %c0_122] : memref<48x512xf32, #tpu.memory_space<vmem>>, vector<8x512xf32>
    %244 = vector.broadcast %189 : vector<1x512xf32> to vector<8x512xf32>
    %245 = arith.mulf %243, %244 : vector<8x512xf32>
    %246 = vector.broadcast %192 : vector<1x512xf32> to vector<8x512xf32>
    %247 = arith.addf %245, %246 : vector<8x512xf32>
    %cst_123 = arith.constant 0.000000e+00 : f32
    %248 = vector.broadcast %cst_123 : f32 to vector<8x512xf32>
    %249 = arith.maximumf %247, %248 : vector<8x512xf32>
    %250 = vector.broadcast %10 : vector<8x1xf32> to vector<8x512xf32>
    %251 = arith.mulf %249, %250 : vector<8x512xf32>
    %c40_124 = arith.constant 40 : index
    %c0_125 = arith.constant 0 : index
    %252 = vector.load %arg13[%c40_124, %c0_125] : memref<48x512xf32, #tpu.memory_space<vmem>>, vector<8x512xf32>
    tpu.vector_store %arg13[%c40_124, %c0_125], %251 {strides = array<i32>} : memref<48x512xf32, #tpu.memory_space<vmem>>, vector<8x512xf32>,
    %c1_i32_126 = arith.constant 1 : i32
    %253 = tpu.memref_slice %arg18[%c1_i32_126] : memref<3x!tpu.dma_semaphore, #tpu.memory_space<semaphore_mem>> -> memref<1x!tpu.dma_semaphore, #tpu.memory_space<semaphore_mem>>
    %254 = tpu.memref_squeeze %253 : memref<1x!tpu.dma_semaphore, #tpu.memory_space<semaphore_mem>> -> memref<!tpu.dma_semaphore, #tpu.memory_space<semaphore_mem>>
    tpu.wait_dma2 semaphore(%254 : memref<!tpu.dma_semaphore, #tpu.memory_space<semaphore_mem>>) src(%arg3 : memref<512x1024xbf16, #tpu.memory_space<any>>) dst(%arg16 : memref<512x1024xbf16, #tpu.memory_space<vmem>>)
    %c0_127 = arith.constant 0 : index
    %c0_128 = arith.constant 0 : index
    %255 = vector.load %arg13[%c0_127, %c0_128] : memref<48x512xf32, #tpu.memory_space<vmem>>, vector<48x512xf32>
    %256 = arith.truncf %255 : vector<48x512xf32> to vector<48x512xbf16>
    %c0_129 = arith.constant 0 : index
    %c0_130 = arith.constant 0 : index
    %257 = vector.load %arg16[%c0_129, %c0_130] : memref<512x1024xbf16, #tpu.memory_space<vmem>>, vector<512x1024xbf16>
    %cst_131 = arith.constant dense<0.000000e+00> : vector<48x1024xf32>
    %258 = tpu.matmul %256, %257, %cst_131 {dimension_numbers = #tpu.dot_dimension_numbers<[1], [0], [0], [1], [0, 0, 1, 1], [], []>} : vector<48x512xbf16>, vector<512x1024xbf16>, vector<48x1024xf32> -> vector<48x1024xf32>
    %259 = vector.extract_strided_slice %258 {offsets = [0, 0], sizes = [8, 512], strides = [1, 1]} : vector<48x1024xf32> to vector<8x512xf32>
    %c0_132 = arith.constant 0 : index
    %c0_133 = arith.constant 0 : index
    %260 = vector.load %arg14[%c0_132, %c0_133] : memref<80x512xf32, #tpu.memory_space<vmem>>, vector<8x512xf32>
    tpu.vector_store %arg14[%c0_132, %c0_133], %259 {strides = array<i32>} : memref<80x512xf32, #tpu.memory_space<vmem>>, vector<8x512xf32>,
    %261 = vector.extract_strided_slice %258 {offsets = [8, 0], sizes = [8, 512], strides = [1, 1]} : vector<48x1024xf32> to vector<8x512xf32>
    %c16_134 = arith.constant 16 : index
    %c0_135 = arith.constant 0 : index
    %262 = vector.load %arg14[%c16_134, %c0_135] : memref<80x512xf32, #tpu.memory_space<vmem>>, vector<8x512xf32>
    tpu.vector_store %arg14[%c16_134, %c0_135], %261 {strides = array<i32>} : memref<80x512xf32, #tpu.memory_space<vmem>>, vector<8x512xf32>,
    %263 = vector.extract_strided_slice %258 {offsets = [8, 512], sizes = [8, 512], strides = [1, 1]} : vector<48x1024xf32> to vector<8x512xf32>
    %c8_136 = arith.constant 8 : index
    %c0_137 = arith.constant 0 : index
    %264 = vector.load %arg14[%c8_136, %c0_137] : memref<80x512xf32, #tpu.memory_space<vmem>>, vector<8x512xf32>
    tpu.vector_store %arg14[%c8_136, %c0_137], %263 {strides = array<i32>} : memref<80x512xf32, #tpu.memory_space<vmem>>, vector<8x512xf32>,
    %265 = vector.extract_strided_slice %258 {offsets = [16, 0], sizes = [8, 512], strides = [1, 1]} : vector<48x1024xf32> to vector<8x512xf32>
    %c32_138 = arith.constant 32 : index
    %c0_139 = arith.constant 0 : index
    %266 = vector.load %arg14[%c32_138, %c0_139] : memref<80x512xf32, #tpu.memory_space<vmem>>, vector<8x512xf32>
    tpu.vector_store %arg14[%c32_138, %c0_139], %265 {strides = array<i32>} : memref<80x512xf32, #tpu.memory_space<vmem>>, vector<8x512xf32>,
    %267 = vector.extract_strided_slice %258 {offsets = [16, 512], sizes = [8, 512], strides = [1, 1]} : vector<48x1024xf32> to vector<8x512xf32>
    %c24_140 = arith.constant 24 : index
    %c0_141 = arith.constant 0 : index
    %268 = vector.load %arg14[%c24_140, %c0_141] : memref<80x512xf32, #tpu.memory_space<vmem>>, vector<8x512xf32>
    tpu.vector_store %arg14[%c24_140, %c0_141], %267 {strides = array<i32>} : memref<80x512xf32, #tpu.memory_space<vmem>>, vector<8x512xf32>,
    %269 = vector.extract_strided_slice %258 {offsets = [24, 0], sizes = [8, 512], strides = [1, 1]} : vector<48x1024xf32> to vector<8x512xf32>
    %c48 = arith.constant 48 : index
    %c0_142 = arith.constant 0 : index
    %270 = vector.load %arg14[%c48, %c0_142] : memref<80x512xf32, #tpu.memory_space<vmem>>, vector<8x512xf32>
    tpu.vector_store %arg14[%c48, %c0_142], %269 {strides = array<i32>} : memref<80x512xf32, #tpu.memory_space<vmem>>, vector<8x512xf32>,
    %271 = vector.extract_strided_slice %258 {offsets = [24, 512], sizes = [8, 512], strides = [1, 1]} : vector<48x1024xf32> to vector<8x512xf32>
    %c40_143 = arith.constant 40 : index
    %c0_144 = arith.constant 0 : index
    %272 = vector.load %arg14[%c40_143, %c0_144] : memref<80x512xf32, #tpu.memory_space<vmem>>, vector<8x512xf32>
    tpu.vector_store %arg14[%c40_143, %c0_144], %271 {strides = array<i32>} : memref<80x512xf32, #tpu.memory_space<vmem>>, vector<8x512xf32>,
    %273 = vector.extract_strided_slice %258 {offsets = [32, 0], sizes = [8, 512], strides = [1, 1]} : vector<48x1024xf32> to vector<8x512xf32>
    %c64 = arith.constant 64 : index
    %c0_145 = arith.constant 0 : index
    %274 = vector.load %arg14[%c64, %c0_145] : memref<80x512xf32, #tpu.memory_space<vmem>>, vector<8x512xf32>
    tpu.vector_store %arg14[%c64, %c0_145], %273 {strides = array<i32>} : memref<80x512xf32, #tpu.memory_space<vmem>>, vector<8x512xf32>,
    %275 = vector.extract_strided_slice %258 {offsets = [32, 512], sizes = [8, 512], strides = [1, 1]} : vector<48x1024xf32> to vector<8x512xf32>
    %c56 = arith.constant 56 : index
    %c0_146 = arith.constant 0 : index
    %276 = vector.load %arg14[%c56, %c0_146] : memref<80x512xf32, #tpu.memory_space<vmem>>, vector<8x512xf32>
    tpu.vector_store %arg14[%c56, %c0_146], %275 {strides = array<i32>} : memref<80x512xf32, #tpu.memory_space<vmem>>, vector<8x512xf32>,
    %277 = vector.extract_strided_slice %258 {offsets = [40, 512], sizes = [8, 512], strides = [1, 1]} : vector<48x1024xf32> to vector<8x512xf32>
    %c72 = arith.constant 72 : index
    %c0_147 = arith.constant 0 : index
    %278 = vector.load %arg14[%c72, %c0_147] : memref<80x512xf32, #tpu.memory_space<vmem>>, vector<8x512xf32>
    tpu.vector_store %arg14[%c72, %c0_147], %277 {strides = array<i32>} : memref<80x512xf32, #tpu.memory_space<vmem>>, vector<8x512xf32>,
    %cst_148 = arith.constant 0.000000e+00 : f32
    %279 = vector.broadcast %cst_148 : f32 to vector<8x512xf32>
    %cst_149 = arith.constant 0.000000e+00 : f32
    %280 = vector.broadcast %cst_149 : f32 to vector<8x512xf32>
    %c0_150 = arith.constant 0 : index
    %c0_151 = arith.constant 0 : index
    %281 = vector.load %arg14[%c0_150, %c0_151] : memref<80x512xf32, #tpu.memory_space<vmem>>, vector<8x512xf32>
    %282 = arith.addf %279, %281 : vector<8x512xf32>
    %283 = arith.mulf %281, %281 : vector<8x512xf32>
    %284 = arith.addf %280, %283 : vector<8x512xf32>
    %c8_152 = arith.constant 8 : index
    %c0_153 = arith.constant 0 : index
    %285 = vector.load %arg14[%c8_152, %c0_153] : memref<80x512xf32, #tpu.memory_space<vmem>>, vector<8x512xf32>
    %286 = arith.addf %282, %285 : vector<8x512xf32>
    %287 = arith.mulf %285, %285 : vector<8x512xf32>
    %288 = arith.addf %284, %287 : vector<8x512xf32>
    %c16_154 = arith.constant 16 : index
    %c0_155 = arith.constant 0 : index
    %289 = vector.load %arg14[%c16_154, %c0_155] : memref<80x512xf32, #tpu.memory_space<vmem>>, vector<8x512xf32>
    %290 = arith.addf %286, %289 : vector<8x512xf32>
    %291 = arith.mulf %289, %289 : vector<8x512xf32>
    %292 = arith.addf %288, %291 : vector<8x512xf32>
    %c24_156 = arith.constant 24 : index
    %c0_157 = arith.constant 0 : index
    %293 = vector.load %arg14[%c24_156, %c0_157] : memref<80x512xf32, #tpu.memory_space<vmem>>, vector<8x512xf32>
    %294 = arith.addf %290, %293 : vector<8x512xf32>
    %295 = arith.mulf %293, %293 : vector<8x512xf32>
    %296 = arith.addf %292, %295 : vector<8x512xf32>
    %c32_158 = arith.constant 32 : index
    %c0_159 = arith.constant 0 : index
    %297 = vector.load %arg14[%c32_158, %c0_159] : memref<80x512xf32, #tpu.memory_space<vmem>>, vector<8x512xf32>
    %298 = arith.addf %294, %297 : vector<8x512xf32>
    %299 = arith.mulf %297, %297 : vector<8x512xf32>
    %300 = arith.addf %296, %299 : vector<8x512xf32>
    %c40_160 = arith.constant 40 : index
    %c0_161 = arith.constant 0 : index
    %301 = vector.load %arg14[%c40_160, %c0_161] : memref<80x512xf32, #tpu.memory_space<vmem>>, vector<8x512xf32>
    %302 = arith.addf %298, %301 : vector<8x512xf32>
    %303 = arith.mulf %301, %301 : vector<8x512xf32>
    %304 = arith.addf %300, %303 : vector<8x512xf32>
    %c48_162 = arith.constant 48 : index
    %c0_163 = arith.constant 0 : index
    %305 = vector.load %arg14[%c48_162, %c0_163] : memref<80x512xf32, #tpu.memory_space<vmem>>, vector<8x512xf32>
    %306 = arith.addf %302, %305 : vector<8x512xf32>
    %307 = arith.mulf %305, %305 : vector<8x512xf32>
    %308 = arith.addf %304, %307 : vector<8x512xf32>
    %c56_164 = arith.constant 56 : index
    %c0_165 = arith.constant 0 : index
    %309 = vector.load %arg14[%c56_164, %c0_165] : memref<80x512xf32, #tpu.memory_space<vmem>>, vector<8x512xf32>
    %310 = arith.addf %306, %309 : vector<8x512xf32>
    %311 = arith.mulf %309, %309 : vector<8x512xf32>
    %312 = arith.addf %308, %311 : vector<8x512xf32>
    %c64_166 = arith.constant 64 : index
    %c0_167 = arith.constant 0 : index
    %313 = vector.load %arg14[%c64_166, %c0_167] : memref<80x512xf32, #tpu.memory_space<vmem>>, vector<8x512xf32>
    %314 = arith.addf %310, %313 : vector<8x512xf32>
    %315 = arith.mulf %313, %313 : vector<8x512xf32>
    %316 = arith.addf %312, %315 : vector<8x512xf32>
    %c72_168 = arith.constant 72 : index
    %c0_169 = arith.constant 0 : index
    %317 = vector.load %arg14[%c72_168, %c0_169] : memref<80x512xf32, #tpu.memory_space<vmem>>, vector<8x512xf32>
    %318 = arith.addf %314, %317 : vector<8x512xf32>
    %319 = arith.mulf %317, %317 : vector<8x512xf32>
    %320 = arith.addf %316, %319 : vector<8x512xf32>
    %321 = vector.broadcast %10 : vector<8x1xf32> to vector<8x512xf32>
    %322 = arith.mulf %318, %321 : vector<8x512xf32>
    %c32_i32 = arith.constant 32 : i32
    %323 = tpu.dynamic_rotate %322 by %c32_i32 dim 1 : vector<8x512xf32>, i32 -> vector<8x512xf32>
    %324 = arith.addf %322, %323 : vector<8x512xf32>
    %c64_i32_170 = arith.constant 64 : i32
    %325 = tpu.dynamic_rotate %324 by %c64_i32_170 dim 1 : vector<8x512xf32>, i32 -> vector<8x512xf32>
    %326 = arith.addf %324, %325 : vector<8x512xf32>
    %c128_i32_171 = arith.constant 128 : i32
    %327 = tpu.dynamic_rotate %326 by %c128_i32_171 dim 1 : vector<8x512xf32>, i32 -> vector<8x512xf32>
    %328 = arith.addf %326, %327 : vector<8x512xf32>
    %c256_i32_172 = arith.constant 256 : i32
    %329 = tpu.dynamic_rotate %328 by %c256_i32_172 dim 1 : vector<8x512xf32>, i32 -> vector<8x512xf32>
    %330 = arith.addf %328, %329 : vector<8x512xf32>
    %331 = vector.broadcast %10 : vector<8x1xf32> to vector<8x512xf32>
    %332 = arith.mulf %320, %331 : vector<8x512xf32>
    %c32_i32_173 = arith.constant 32 : i32
    %333 = tpu.dynamic_rotate %332 by %c32_i32_173 dim 1 : vector<8x512xf32>, i32 -> vector<8x512xf32>
    %334 = arith.addf %332, %333 : vector<8x512xf32>
    %c64_i32_174 = arith.constant 64 : i32
    %335 = tpu.dynamic_rotate %334 by %c64_i32_174 dim 1 : vector<8x512xf32>, i32 -> vector<8x512xf32>
    %336 = arith.addf %334, %335 : vector<8x512xf32>
    %c128_i32_175 = arith.constant 128 : i32
    %337 = tpu.dynamic_rotate %336 by %c128_i32_175 dim 1 : vector<8x512xf32>, i32 -> vector<8x512xf32>
    %338 = arith.addf %336, %337 : vector<8x512xf32>
    %c256_i32_176 = arith.constant 256 : i32
    %339 = tpu.dynamic_rotate %338 by %c256_i32_176 dim 1 : vector<8x512xf32>, i32 -> vector<8x512xf32>
    %340 = arith.addf %338, %339 : vector<8x512xf32>
    %cst_177 = arith.constant dense<0.000000e+00> : vector<512xf32>
    %341 = vector.multi_reduction <add>, %330, %cst_177 [0] : vector<8x512xf32> to vector<512xf32>
    %342 = vector.shape_cast %341 : vector<512xf32> to vector<1x512xf32>
    %cst_178 = arith.constant dense<0.000000e+00> : vector<512xf32>
    %343 = vector.multi_reduction <add>, %340, %cst_178 [0] : vector<8x512xf32> to vector<512xf32>
    %344 = vector.shape_cast %343 : vector<512xf32> to vector<1x512xf32>
    %cst_179 = arith.constant 3.125000e-03 : f32
    %345 = vector.broadcast %cst_179 : f32 to vector<1x512xf32>
    %346 = arith.mulf %342, %345 : vector<1x512xf32>
    %cst_180 = arith.constant 3.125000e-03 : f32
    %347 = vector.broadcast %cst_180 : f32 to vector<1x512xf32>
    %348 = arith.mulf %344, %347 : vector<1x512xf32>
    %349 = arith.mulf %346, %346 : vector<1x512xf32>
    %350 = arith.subf %348, %349 : vector<1x512xf32>
    %cst_181 = arith.constant 0.000000e+00 : f32
    %351 = vector.broadcast %cst_181 : f32 to vector<1x512xf32>
    %352 = arith.maximumf %350, %351 : vector<1x512xf32>
    %c0_182 = arith.constant 0 : index
    %c0_183 = arith.constant 0 : index
    %353 = vector.load %arg9[%c0_182, %c0_183] : memref<1x512xf32, #tpu.memory_space<vmem>>, vector<1x512xf32>
    %cst_184 = arith.constant 9.99999974E-6 : f32
    %354 = vector.broadcast %cst_184 : f32 to vector<1x512xf32>
    %355 = arith.addf %352, %354 : vector<1x512xf32>
    %356 = math.rsqrt %355 : vector<1x512xf32>
    %357 = arith.mulf %353, %356 : vector<1x512xf32>
    %c0_185 = arith.constant 0 : index
    %c0_186 = arith.constant 0 : index
    %358 = vector.load %arg10[%c0_185, %c0_186] : memref<1x512xf32, #tpu.memory_space<vmem>>, vector<1x512xf32>
    %359 = arith.mulf %346, %357 : vector<1x512xf32>
    %360 = arith.subf %358, %359 : vector<1x512xf32>
    %c0_187 = arith.constant 0 : index
    %c0_188 = arith.constant 0 : index
    %361 = vector.load %arg14[%c0_187, %c0_188] : memref<80x512xf32, #tpu.memory_space<vmem>>, vector<8x512xf32>
    %362 = vector.broadcast %357 : vector<1x512xf32> to vector<8x512xf32>
    %363 = arith.mulf %361, %362 : vector<8x512xf32>
    %364 = vector.broadcast %360 : vector<1x512xf32> to vector<8x512xf32>
    %365 = arith.addf %363, %364 : vector<8x512xf32>
    %cst_189 = arith.constant 0.000000e+00 : f32
    %366 = vector.broadcast %cst_189 : f32 to vector<8x512xf32>
    %367 = arith.maximumf %365, %366 : vector<8x512xf32>
    %368 = vector.broadcast %10 : vector<8x1xf32> to vector<8x512xf32>
    %369 = arith.mulf %367, %368 : vector<8x512xf32>
    %c0_190 = arith.constant 0 : index
    %c0_191 = arith.constant 0 : index
    %370 = vector.load %arg14[%c0_190, %c0_191] : memref<80x512xf32, #tpu.memory_space<vmem>>, vector<8x512xf32>
    tpu.vector_store %arg14[%c0_190, %c0_191], %369 {strides = array<i32>} : memref<80x512xf32, #tpu.memory_space<vmem>>, vector<8x512xf32>,
    %c8_192 = arith.constant 8 : index
    %c0_193 = arith.constant 0 : index
    %371 = vector.load %arg14[%c8_192, %c0_193] : memref<80x512xf32, #tpu.memory_space<vmem>>, vector<8x512xf32>
    %372 = vector.broadcast %357 : vector<1x512xf32> to vector<8x512xf32>
    %373 = arith.mulf %371, %372 : vector<8x512xf32>
    %374 = vector.broadcast %360 : vector<1x512xf32> to vector<8x512xf32>
    %375 = arith.addf %373, %374 : vector<8x512xf32>
    %cst_194 = arith.constant 0.000000e+00 : f32
    %376 = vector.broadcast %cst_194 : f32 to vector<8x512xf32>
    %377 = arith.maximumf %375, %376 : vector<8x512xf32>
    %378 = vector.broadcast %10 : vector<8x1xf32> to vector<8x512xf32>
    %379 = arith.mulf %377, %378 : vector<8x512xf32>
    %c8_195 = arith.constant 8 : index
    %c0_196 = arith.constant 0 : index
    %380 = vector.load %arg14[%c8_195, %c0_196] : memref<80x512xf32, #tpu.memory_space<vmem>>, vector<8x512xf32>
    tpu.vector_store %arg14[%c8_195, %c0_196], %379 {strides = array<i32>} : memref<80x512xf32, #tpu.memory_space<vmem>>, vector<8x512xf32>,
    %c16_197 = arith.constant 16 : index
    %c0_198 = arith.constant 0 : index
    %381 = vector.load %arg14[%c16_197, %c0_198] : memref<80x512xf32, #tpu.memory_space<vmem>>, vector<8x512xf32>
    %382 = vector.broadcast %357 : vector<1x512xf32> to vector<8x512xf32>
    %383 = arith.mulf %381, %382 : vector<8x512xf32>
    %384 = vector.broadcast %360 : vector<1x512xf32> to vector<8x512xf32>
    %385 = arith.addf %383, %384 : vector<8x512xf32>
    %cst_199 = arith.constant 0.000000e+00 : f32
    %386 = vector.broadcast %cst_199 : f32 to vector<8x512xf32>
    %387 = arith.maximumf %385, %386 : vector<8x512xf32>
    %388 = vector.broadcast %10 : vector<8x1xf32> to vector<8x512xf32>
    %389 = arith.mulf %387, %388 : vector<8x512xf32>
    %c16_200 = arith.constant 16 : index
    %c0_201 = arith.constant 0 : index
    %390 = vector.load %arg14[%c16_200, %c0_201] : memref<80x512xf32, #tpu.memory_space<vmem>>, vector<8x512xf32>
    tpu.vector_store %arg14[%c16_200, %c0_201], %389 {strides = array<i32>} : memref<80x512xf32, #tpu.memory_space<vmem>>, vector<8x512xf32>,
    %c24_202 = arith.constant 24 : index
    %c0_203 = arith.constant 0 : index
    %391 = vector.load %arg14[%c24_202, %c0_203] : memref<80x512xf32, #tpu.memory_space<vmem>>, vector<8x512xf32>
    %392 = vector.broadcast %357 : vector<1x512xf32> to vector<8x512xf32>
    %393 = arith.mulf %391, %392 : vector<8x512xf32>
    %394 = vector.broadcast %360 : vector<1x512xf32> to vector<8x512xf32>
    %395 = arith.addf %393, %394 : vector<8x512xf32>
    %cst_204 = arith.constant 0.000000e+00 : f32
    %396 = vector.broadcast %cst_204 : f32 to vector<8x512xf32>
    %397 = arith.maximumf %395, %396 : vector<8x512xf32>
    %398 = vector.broadcast %10 : vector<8x1xf32> to vector<8x512xf32>
    %399 = arith.mulf %397, %398 : vector<8x512xf32>
    %c24_205 = arith.constant 24 : index
    %c0_206 = arith.constant 0 : index
    %400 = vector.load %arg14[%c24_205, %c0_206] : memref<80x512xf32, #tpu.memory_space<vmem>>, vector<8x512xf32>
    tpu.vector_store %arg14[%c24_205, %c0_206], %399 {strides = array<i32>} : memref<80x512xf32, #tpu.memory_space<vmem>>, vector<8x512xf32>,
    %c32_207 = arith.constant 32 : index
    %c0_208 = arith.constant 0 : index
    %401 = vector.load %arg14[%c32_207, %c0_208] : memref<80x512xf32, #tpu.memory_space<vmem>>, vector<8x512xf32>
    %402 = vector.broadcast %357 : vector<1x512xf32> to vector<8x512xf32>
    %403 = arith.mulf %401, %402 : vector<8x512xf32>
    %404 = vector.broadcast %360 : vector<1x512xf32> to vector<8x512xf32>
    %405 = arith.addf %403, %404 : vector<8x512xf32>
    %cst_209 = arith.constant 0.000000e+00 : f32
    %406 = vector.broadcast %cst_209 : f32 to vector<8x512xf32>
    %407 = arith.maximumf %405, %406 : vector<8x512xf32>
    %408 = vector.broadcast %10 : vector<8x1xf32> to vector<8x512xf32>
    %409 = arith.mulf %407, %408 : vector<8x512xf32>
    %c32_210 = arith.constant 32 : index
    %c0_211 = arith.constant 0 : index
    %410 = vector.load %arg14[%c32_210, %c0_211] : memref<80x512xf32, #tpu.memory_space<vmem>>, vector<8x512xf32>
    tpu.vector_store %arg14[%c32_210, %c0_211], %409 {strides = array<i32>} : memref<80x512xf32, #tpu.memory_space<vmem>>, vector<8x512xf32>,
    %c40_212 = arith.constant 40 : index
    %c0_213 = arith.constant 0 : index
    %411 = vector.load %arg14[%c40_212, %c0_213] : memref<80x512xf32, #tpu.memory_space<vmem>>, vector<8x512xf32>
    %412 = vector.broadcast %357 : vector<1x512xf32> to vector<8x512xf32>
    %413 = arith.mulf %411, %412 : vector<8x512xf32>
    %414 = vector.broadcast %360 : vector<1x512xf32> to vector<8x512xf32>
    %415 = arith.addf %413, %414 : vector<8x512xf32>
    %cst_214 = arith.constant 0.000000e+00 : f32
    %416 = vector.broadcast %cst_214 : f32 to vector<8x512xf32>
    %417 = arith.maximumf %415, %416 : vector<8x512xf32>
    %418 = vector.broadcast %10 : vector<8x1xf32> to vector<8x512xf32>
    %419 = arith.mulf %417, %418 : vector<8x512xf32>
    %c40_215 = arith.constant 40 : index
    %c0_216 = arith.constant 0 : index
    %420 = vector.load %arg14[%c40_215, %c0_216] : memref<80x512xf32, #tpu.memory_space<vmem>>, vector<8x512xf32>
    tpu.vector_store %arg14[%c40_215, %c0_216], %419 {strides = array<i32>} : memref<80x512xf32, #tpu.memory_space<vmem>>, vector<8x512xf32>,
    %c48_217 = arith.constant 48 : index
    %c0_218 = arith.constant 0 : index
    %421 = vector.load %arg14[%c48_217, %c0_218] : memref<80x512xf32, #tpu.memory_space<vmem>>, vector<8x512xf32>
    %422 = vector.broadcast %357 : vector<1x512xf32> to vector<8x512xf32>
    %423 = arith.mulf %421, %422 : vector<8x512xf32>
    %424 = vector.broadcast %360 : vector<1x512xf32> to vector<8x512xf32>
    %425 = arith.addf %423, %424 : vector<8x512xf32>
    %cst_219 = arith.constant 0.000000e+00 : f32
    %426 = vector.broadcast %cst_219 : f32 to vector<8x512xf32>
    %427 = arith.maximumf %425, %426 : vector<8x512xf32>
    %428 = vector.broadcast %10 : vector<8x1xf32> to vector<8x512xf32>
    %429 = arith.mulf %427, %428 : vector<8x512xf32>
    %c48_220 = arith.constant 48 : index
    %c0_221 = arith.constant 0 : index
    %430 = vector.load %arg14[%c48_220, %c0_221] : memref<80x512xf32, #tpu.memory_space<vmem>>, vector<8x512xf32>
    tpu.vector_store %arg14[%c48_220, %c0_221], %429 {strides = array<i32>} : memref<80x512xf32, #tpu.memory_space<vmem>>, vector<8x512xf32>,
    %c56_222 = arith.constant 56 : index
    %c0_223 = arith.constant 0 : index
    %431 = vector.load %arg14[%c56_222, %c0_223] : memref<80x512xf32, #tpu.memory_space<vmem>>, vector<8x512xf32>
    %432 = vector.broadcast %357 : vector<1x512xf32> to vector<8x512xf32>
    %433 = arith.mulf %431, %432 : vector<8x512xf32>
    %434 = vector.broadcast %360 : vector<1x512xf32> to vector<8x512xf32>
    %435 = arith.addf %433, %434 : vector<8x512xf32>
    %cst_224 = arith.constant 0.000000e+00 : f32
    %436 = vector.broadcast %cst_224 : f32 to vector<8x512xf32>
    %437 = arith.maximumf %435, %436 : vector<8x512xf32>
    %438 = vector.broadcast %10 : vector<8x1xf32> to vector<8x512xf32>
    %439 = arith.mulf %437, %438 : vector<8x512xf32>
    %c56_225 = arith.constant 56 : index
    %c0_226 = arith.constant 0 : index
    %440 = vector.load %arg14[%c56_225, %c0_226] : memref<80x512xf32, #tpu.memory_space<vmem>>, vector<8x512xf32>
    tpu.vector_store %arg14[%c56_225, %c0_226], %439 {strides = array<i32>} : memref<80x512xf32, #tpu.memory_space<vmem>>, vector<8x512xf32>,
    %c64_227 = arith.constant 64 : index
    %c0_228 = arith.constant 0 : index
    %441 = vector.load %arg14[%c64_227, %c0_228] : memref<80x512xf32, #tpu.memory_space<vmem>>, vector<8x512xf32>
    %442 = vector.broadcast %357 : vector<1x512xf32> to vector<8x512xf32>
    %443 = arith.mulf %441, %442 : vector<8x512xf32>
    %444 = vector.broadcast %360 : vector<1x512xf32> to vector<8x512xf32>
    %445 = arith.addf %443, %444 : vector<8x512xf32>
    %cst_229 = arith.constant 0.000000e+00 : f32
    %446 = vector.broadcast %cst_229 : f32 to vector<8x512xf32>
    %447 = arith.maximumf %445, %446 : vector<8x512xf32>
    %448 = vector.broadcast %10 : vector<8x1xf32> to vector<8x512xf32>
    %449 = arith.mulf %447, %448 : vector<8x512xf32>
    %c64_230 = arith.constant 64 : index
    %c0_231 = arith.constant 0 : index
    %450 = vector.load %arg14[%c64_230, %c0_231] : memref<80x512xf32, #tpu.memory_space<vmem>>, vector<8x512xf32>
    tpu.vector_store %arg14[%c64_230, %c0_231], %449 {strides = array<i32>} : memref<80x512xf32, #tpu.memory_space<vmem>>, vector<8x512xf32>,
    %c72_232 = arith.constant 72 : index
    %c0_233 = arith.constant 0 : index
    %451 = vector.load %arg14[%c72_232, %c0_233] : memref<80x512xf32, #tpu.memory_space<vmem>>, vector<8x512xf32>
    %452 = vector.broadcast %357 : vector<1x512xf32> to vector<8x512xf32>
    %453 = arith.mulf %451, %452 : vector<8x512xf32>
    %454 = vector.broadcast %360 : vector<1x512xf32> to vector<8x512xf32>
    %455 = arith.addf %453, %454 : vector<8x512xf32>
    %cst_234 = arith.constant 0.000000e+00 : f32
    %456 = vector.broadcast %cst_234 : f32 to vector<8x512xf32>
    %457 = arith.maximumf %455, %456 : vector<8x512xf32>
    %458 = vector.broadcast %10 : vector<8x1xf32> to vector<8x512xf32>
    %459 = arith.mulf %457, %458 : vector<8x512xf32>
    %c72_235 = arith.constant 72 : index
    %c0_236 = arith.constant 0 : index
    %460 = vector.load %arg14[%c72_235, %c0_236] : memref<80x512xf32, #tpu.memory_space<vmem>>, vector<8x512xf32>
    tpu.vector_store %arg14[%c72_235, %c0_236], %459 {strides = array<i32>} : memref<80x512xf32, #tpu.memory_space<vmem>>, vector<8x512xf32>,
    %c2_i32_237 = arith.constant 2 : i32
    %461 = tpu.memref_slice %arg18[%c2_i32_237] : memref<3x!tpu.dma_semaphore, #tpu.memory_space<semaphore_mem>> -> memref<1x!tpu.dma_semaphore, #tpu.memory_space<semaphore_mem>>
    %462 = tpu.memref_squeeze %461 : memref<1x!tpu.dma_semaphore, #tpu.memory_space<semaphore_mem>> -> memref<!tpu.dma_semaphore, #tpu.memory_space<semaphore_mem>>
    tpu.wait_dma2 semaphore(%462 : memref<!tpu.dma_semaphore, #tpu.memory_space<semaphore_mem>>) src(%arg4 : memref<512x128xbf16, #tpu.memory_space<any>>) dst(%arg17 : memref<512x128xbf16, #tpu.memory_space<vmem>>)
    %c0_238 = arith.constant 0 : index
    %c0_239 = arith.constant 0 : index
    %463 = vector.load %arg14[%c0_238, %c0_239] : memref<80x512xf32, #tpu.memory_space<vmem>>, vector<80x512xf32>
    %464 = arith.truncf %463 : vector<80x512xf32> to vector<80x512xbf16>
    %c0_240 = arith.constant 0 : index
    %c0_241 = arith.constant 0 : index
    %465 = vector.load %arg17[%c0_240, %c0_241] : memref<512x128xbf16, #tpu.memory_space<vmem>>, vector<512x128xbf16>
    %cst_242 = arith.constant dense<0.000000e+00> : vector<80x128xf32>
    %466 = tpu.matmul %464, %465, %cst_242 {dimension_numbers = #tpu.dot_dimension_numbers<[1], [0], [0], [1], [0, 0, 1, 1], [], []>} : vector<80x512xbf16>, vector<512x128xbf16>, vector<80x128xf32> -> vector<80x128xf32>
    %cst_243 = arith.constant 0.000000e+00 : f32
    %467 = vector.broadcast %cst_243 : f32 to vector<80x128xf32>
    %468 = arith.subf %467, %466 : vector<80x128xf32>
    %469 = math.exp %468 : vector<80x128xf32>
    %cst_244 = arith.constant 1.000000e+00 : f32
    %470 = vector.broadcast %cst_244 : f32 to vector<80x128xf32>
    %471 = arith.addf %470, %469 : vector<80x128xf32>
    %472 = tpu.reciprocal %471 {approx = true} : vector<80x128xf32> -> vector<80x128xf32>
    %cst_245 = arith.constant 0.000000e+00 : f32
    %cst_246 = arith.constant 1.000000e+00 : f32
    %473 = vector.broadcast %cst_245 : f32 to vector<80x128xf32>
    %474 = arith.maximumf %473, %472 : vector<80x128xf32>
    %475 = vector.broadcast %cst_246 : f32 to vector<80x128xf32>
    %476 = arith.minimumf %475, %474 : vector<80x128xf32>
    %c0_247 = arith.constant 0 : index
    %c0_248 = arith.constant 0 : index
    %477 = vector.load %arg11[%c0_247, %c0_248] : memref<80x128xf32, #tpu.memory_space<vmem>>, vector<80x128xf32>
    tpu.vector_store %arg11[%c0_247, %c0_248], %476 {strides = array<i32>} : memref<80x128xf32, #tpu.memory_space<vmem>>, vector<80x128xf32>,
    return
  }
}

</mosaic_0001>

<bundles_post_ra>
// kernel: generator_forward.1
= control target key start
LH: loop header
LB: loop body
LE: loop exit
PB: predicated region body
PF: predicated region fallthrough
CT: control target
= control target key end

     0   :  { %16 = vsyncpa [#allocation10], 0  ;;  %s4919_s17 = smov [#allocation9]   ;;  %s6346_s0 = inlined_call_operand.vmem [shape: f32[8,128], index: 0, kind: input, shape index: {}]   ;;  %s6347_s1 = inlined_call_operand.hbm [shape: bf16[128,2048], index: 1, kind: input, shape index: {}]   ;;  %s6348_s2 = inlined_call_operand.hbm [shape: bf16[512,1024], index: 2, kind: input, shape index: {}]   ;;  %s6349_s3 = inlined_call_operand.hbm [shape: bf16[512,1024], index: 3, kind: input, shape index: {}]   ;;  %s6350_s4 = inlined_call_operand.hbm [shape: bf16[512,128], index: 4, kind: input, shape index: {}]   ;;  %s6351_s5 = inlined_call_operand.vmem [shape: f32[1,512], index: 5, kind: input, shape index: {}]   ;;  %s6352_s6 = inlined_call_operand.vmem [shape: f32[1,512], index: 6, kind: input, shape index: {}]   ;;  %s6353_s7 = inlined_call_operand.vmem [shape: f32[1,512], index: 7, kind: input, shape index: {}]   ;;  %s6354_s8 = inlined_call_operand.vmem [shape: f32[1,512], index: 8, kind: input, shape index: {}]   ;;  %s6355_s9 = inlined_call_operand.vmem [shape: f32[1,512], index: 9, kind: input, shape index: {}]   ;;  %s6356_s10 = inlined_call_operand.vmem [shape: f32[1,512], index: 10, kind: input, shape index: {}]   ;;  %s6357_s11 = inlined_call_operand.vmem [shape: f32[80,128], index: 11, kind: output, shape index: {}]  }
   0x1   :  { %s24_s18 = sshll.u32 %s4919_s17, 4  ;;  %s4867_s21 = scalar_lea.hbm %s6347_s1, 16384  ;;  %s25_s18 = int_to_ptr.vmem [resolvable:$true] %s24_s18 }
   0x2   :  { %p4868_p0 = scmp.ne.s32.totalorder %s6347_s1, %s4867_s21  ;;  %p4871_p1 = scmp.lt.u32.totalorder %s4867_s21, %s6347_s1 }
   0x4   :  { %p4873_p2 = pnand %p4871_p1, %p4868_p0 }
   0x6   :  { %4876 = shalt.err (!%p4873_p2)
}
   0x7   :  { %s4877_s26 = scalar_lea.vmem %s25_s18, 16384  ;;  %p4882_p4 = scmp.lt.s32.totalorder %s25_s18, %s25_s18 }
   0x8   :  { %p4878_p3 = scmp.ne.s32.totalorder %s25_s18, %s4877_s26  ;;  %p4883_p5 = scmp.lt.s32.totalorder %s4877_s26, %s4877_s26 }
   0xa   :  { %p4884_p6 = por %p4883_p5, %p4882_p4 }
   0xc   :  { %p4885_p7 = pnand %p4884_p6, %p4878_p3 }
   0xe   :  { %4888 = shalt.err (!%p4885_p7)
}
   0xf   :  { %s4920_s27 = smov 1024   ;;  %s4921_s28 = smov 64  }
  0x10   :  { %30 = dma.hbm_to_vmem [thread:$0]  %s6347_s1, 16384, %s25_s18, [#allocation10], %s4920_s27, %s4920_s27, %s4921_s28  }
  0x11   :  { %4911 = dma.done.wait [#allocation10], 16384  }
  0x12   :  { %4912 = vsyncadd [#allocation10], 4294950912  ;;  %s51_s12 = sld [smem:[#allocation0]]   ;;  %63 = sst [smem:[#allocation12]] %s4920_s27  ;;  %v4922_v0 = vmov 0  }
  0x13   :  { %936 = vmatprep.mubr.bf16.mxu0 %v4922_v0  ;;  %977 = vmatprep.mubr.bf16.mxu1 %v4922_v0  ;;  %65 = sst [smem:[#allocation12 + $0x1]] %s4920_s27  ;;  %s4923_s13 = smov [#allocation5]  }
  0x14   :  { %s59_s14 = sshll.u32 %s4923_s13, 4  ;;  %69 = sst [smem:[#allocation12 + $0x3]] %s4921_s28  ;;  %s60_s14 = int_to_ptr.vmem [resolvable:$true] %s59_s14 }
  0x15   :  { %77 = sst [smem:[#allocation12 + $0x7]] %s4921_s28  ;;  %s4924_s1 = smov 8  }
  0x16   :  { %67 = sst [smem:[#allocation12 + $0x2]] %s4924_s1  ;;  %s4925_s15 = smov 128  }
  0x17   :  { %71 = sst [smem:[#allocation12 + $0x4]] %s4925_s15  ;;  %s4926_s17 = smov 2  }
  0x18   :  { %s4488_s16 = sshll.u32 %s51_s12, 26  ;;  %73 = sst [smem:[#allocation12 + $0x5]] %s4926_s17 }
  0x19   :  { %s4489_s18 = sadd.s32 134217728, %s4488_s16  ;;  %s4927_s19 = smov 512  }
  0x1a   :  { %75 = sst [smem:[#allocation12 + $0x6]] %s4927_s19  ;;  %s4928_s20 = smov 4  }
  0x1b   :  { %79 = sst [smem:[#allocation12 + $0x8]] %s4928_s20  ;;  %s4929_s21 = smov [#allocation8]  }
  0x1c   :  { %s4930_s22 = smov [#allocation11]   ;;  %s4931_s25 = smov [#allocation6]  }
  0x1d   :  { %81 = dma.general %s6348_s2, 32768, %s60_s14, %s4929_s21, %s4930_s22, [#allocation12], %s4489_s18, 0  }
  0x1e   :  { %98 = sst [smem:[#allocation14]] %s4920_s27  ;;  %s94_s26 = sshll.u32 %s4931_s25, 4  ;;  %s95_s26 = int_to_ptr.vmem [resolvable:$true] %s94_s26 }
  0x1f   :  { %100 = sst [smem:[#allocation14 + $0x1]] %s4920_s27  ;;  %s4932_s29 = smov [#allocation8 + $0x1]  }
  0x20   :  { %102 = sst [smem:[#allocation14 + $0x2]] %s4924_s1  ;;  %s4933_s30 = smov [#allocation13]  }
  0x21   :  { %104 = sst [smem:[#allocation14 + $0x3]] %s4921_s28 }
  0x22   :  { %106 = sst [smem:[#allocation14 + $0x4]] %s4925_s15  ;;  %s4889_s15 = scalar_lea.hbm %s6350_s4, 4096 }
  0x23   :  { %108 = sst [smem:[#allocation14 + $0x5]] %s4926_s17  ;;  %p4890_p8 = scmp.ne.s32.totalorder %s6350_s4, %s4889_s15 }
  0x24   :  { %110 = sst [smem:[#allocation14 + $0x6]] %s4927_s19  ;;  %p4893_p9 = scmp.lt.u32.totalorder %s4889_s15, %s6350_s4 }
  0x25   :  { %112 = sst [smem:[#allocation14 + $0x7]] %s4921_s28 }
  0x26   :  { %114 = sst [smem:[#allocation14 + $0x8]] %s4928_s20  ;;  %p4895_p10 = pnand %p4893_p9, %p4890_p8 }
  0x27   :  { %116 = dma.general %s6349_s3, 32768, %s95_s26, %s4932_s29, %s4933_s30, [#allocation14], %s4489_s18, 0  }
  0x28   :  { %v136_v1 = vld [vmem:[#allocation9] sm:$0xff]  ;;  %v137_v3 = vld [vmem:[#allocation9 + $0x8] sm:$0xff]  ;;  %v138_v63 = vld [vmem:[#allocation9 + $0x10] sm:$0xff] }
  0x29   :  { %v144_v2 = vld [vmem:[#allocation9 + $0x40] sm:$0xff]  ;;  %v145_v5 = vld [vmem:[#allocation9 + $0x48] sm:$0xff] }
  0x2a   :  { %v4494_v4 = vcombine.high %v136_v1, %v144_v2  ;;  %v4493_v6 = vcombine.low %v136_v1, %v144_v2  ;;  %v152_v7 = vld [vmem:[#allocation9 + $0x80] sm:$0xff]  ;;  %v4496_v9 = vcombine.high %v137_v3, %v145_v5  ;;  %v4495_v10 = vcombine.low %v137_v3, %v145_v5  ;;  %v153_v12 = vld [vmem:[#allocation9 + $0x88] sm:$0xff]  ;;  %v146_v1 = vld [vmem:[#allocation9 + $0x50] sm:$0xff] }
  0x2b   :  { %v160_v8 = vld [vmem:[#allocation9 + $0xc0] sm:$0xff]  ;;  %v161_v13 = vld [vmem:[#allocation9 + $0xc8] sm:$0xff]  ;;  %v139_v2 = vld [vmem:[#allocation9 + $0x18] sm:$0xff] }
  0x2c   :  { %v4510_v11 = vcombine.high %v152_v7, %v160_v8  ;;  %v168_v14 = vld [vmem:[#allocation9 + $0x100] sm:$0xff]  ;;  %904 = vmatprep.subr.bf16.mxu0 %v4494_v4  ;;  %v4512_v15 = vcombine.high %v153_v12, %v161_v13  ;;  %v169_v17 = vld [vmem:[#allocation9 + $0x108] sm:$0xff]  ;;  %945 = vmatprep.subr.bf16.mxu1 %v4496_v9  ;;  %v4509_v19 = vcombine.low %v152_v7, %v160_v8  ;;  %v147_v3 = vld [vmem:[#allocation9 + $0x58] sm:$0xff] }
  0x2d   :  { %v176_v16 = vld [vmem:[#allocation9 + $0x140] sm:$0xff]  ;;  %v177_v18 = vld [vmem:[#allocation9 + $0x148] sm:$0xff]  ;;  %905 = vmatpush1.bf16.msra.mxu0 %v4493_v6  ;;  %946 = vmatpush1.bf16.msra.mxu1 %v4495_v10  ;;  %v4511_v20 = vcombine.low %v153_v12, %v161_v13  ;;  %v4498_v7 = vcombine.high %v138_v63, %v146_v1  ;;  %v4500_v8 = vcombine.high %v139_v2, %v147_v3  ;;  %v154_v9 = vld [vmem:[#allocation9 + $0x90] sm:$0xff] }
  0x2e   :  { %906 = vmatprep.subr.bf16.mxu0 %v4510_v11  ;;  %v4526_v21 = vcombine.high %v168_v14, %v176_v16  ;;  %947 = vmatprep.subr.bf16.mxu1 %v4512_v15  ;;  %v4528_v22 = vcombine.high %v169_v17, %v177_v18  ;;  %v184_v23 = vld [vmem:[#allocation9 + $0x180] sm:$0xff]  ;;  %v185_v25 = vld [vmem:[#allocation9 + $0x188] sm:$0xff]  ;;  %v4525_v27 = vcombine.low %v168_v14, %v176_v16  ;;  %v162_v10 = vld [vmem:[#allocation9 + $0xd0] sm:$0xff] }
  0x2f   :  { %v192_v24 = vld [vmem:[#allocation9 + $0x1c0] sm:$0xff]  ;;  %v193_v26 = vld [vmem:[#allocation9 + $0x1c8] sm:$0xff]  ;;  %v4527_v28 = vcombine.low %v169_v17, %v177_v18  ;;  %v155_v12 = vld [vmem:[#allocation9 + $0x98] sm:$0xff]  ;;  %v4497_v14 = vcombine.low %v138_v63, %v146_v1  ;;  %v4499_v15 = vcombine.low %v139_v2, %v147_v3  ;;  %v4514_v16 = vcombine.high %v154_v9, %v162_v10 }
  0x30   :  { %v4542_v29 = vcombine.high %v184_v23, %v192_v24  ;;  %v4544_v30 = vcombine.high %v185_v25, %v193_v26  ;;  %v200_v31 = vld [vmem:[#allocation9 + $0x200] sm:$0xff]  ;;  %v201_v33 = vld [vmem:[#allocation9 + $0x208] sm:$0xff]  ;;  %v4541_v35 = vcombine.low %v184_v23, %v192_v24  ;;  %v4543_v36 = vcombine.low %v185_v25, %v193_v26  ;;  %v163_v13 = vld [vmem:[#allocation9 + $0xd8] sm:$0xff] }
  0x31   :  { %907 = vmatpush1.bf16.msra.mxu0 %v4509_v19  ;;  %948 = vmatpush1.bf16.msra.mxu1 %v4511_v20  ;;  %v208_v32 = vld [vmem:[#allocation9 + $0x240] sm:$0xff]  ;;  %v209_v34 = vld [vmem:[#allocation9 + $0x248] sm:$0xff]  ;;  %v4516_v17 = vcombine.high %v155_v12, %v163_v13  ;;  %v170_v18 = vld [vmem:[#allocation9 + $0x110] sm:$0xff]  ;;  %v4515_v23 = vcombine.low %v155_v12, %v163_v13 }
  0x32   :  { %908 = vmatprep.subr.bf16.mxu0 %v4526_v21  ;;  %949 = vmatprep.subr.bf16.mxu1 %v4528_v22  ;;  %v4558_v37 = vcombine.high %v200_v31, %v208_v32  ;;  %v4560_v38 = vcombine.high %v201_v33, %v209_v34  ;;  %v216_v39 = vld [vmem:[#allocation9 + $0x280] sm:$0xff]  ;;  %v217_v41 = vld [vmem:[#allocation9 + $0x288] sm:$0xff]  ;;  %v4557_v43 = vcombine.low %v200_v31, %v208_v32  ;;  %v178_v19 = vld [vmem:[#allocation9 + $0x150] sm:$0xff] }
  0x33   :  { %v224_v40 = vld [vmem:[#allocation9 + $0x2c0] sm:$0xff]  ;;  %v225_v42 = vld [vmem:[#allocation9 + $0x2c8] sm:$0xff]  ;;  %v4559_v44 = vcombine.low %v201_v33, %v209_v34  ;;  %v171_v20 = vld [vmem:[#allocation9 + $0x118] sm:$0xff]  ;;  %v4513_v22 = vcombine.low %v154_v9, %v162_v10  ;;  %v4530_v24 = vcombine.high %v170_v18, %v178_v19 }
  0x34   :  { %v4574_v45 = vcombine.high %v216_v39, %v224_v40  ;;  %v4576_v46 = vcombine.high %v217_v41, %v225_v42  ;;  %v232_v47 = vld [vmem:[#allocation9 + $0x300] sm:$0xff]  ;;  %v233_v49 = vld [vmem:[#allocation9 + $0x308] sm:$0xff]  ;;  %v4573_v51 = vcombine.low %v216_v39, %v224_v40  ;;  %v4575_v52 = vcombine.low %v217_v41, %v225_v42  ;;  %v179_v21 = vld [vmem:[#allocation9 + $0x158] sm:$0xff] }
  0x35   :  { %909 = vmatpush1.bf16.msra.mxu0 %v4525_v27  ;;  %950 = vmatpush1.bf16.msra.mxu1 %v4527_v28  ;;  %v240_v48 = vld [vmem:[#allocation9 + $0x340] sm:$0xff]  ;;  %v241_v50 = vld [vmem:[#allocation9 + $0x348] sm:$0xff]  ;;  %v4532_v25 = vcombine.high %v171_v20, %v179_v21  ;;  %v186_v26 = vld [vmem:[#allocation9 + $0x190] sm:$0xff]  ;;  %v4531_v31 = vcombine.low %v171_v20, %v179_v21 }
  0x36   :  { %910 = vmatprep.subr.bf16.mxu0 %v4542_v29  ;;  %951 = vmatprep.subr.bf16.mxu1 %v4544_v30  ;;  %v4590_v53 = vcombine.high %v232_v47, %v240_v48  ;;  %v4592_v54 = vcombine.high %v233_v49, %v241_v50  ;;  %v248_v55 = vld [vmem:[#allocation9 + $0x380] sm:$0xff]  ;;  %v249_v57 = vld [vmem:[#allocation9 + $0x388] sm:$0xff]  ;;  %v4589_v59 = vcombine.low %v232_v47, %v240_v48  ;;  %v194_v27 = vld [vmem:[#allocation9 + $0x1d0] sm:$0xff] }
  0x37   :  { %v256_v56 = vld [vmem:[#allocation9 + $0x3c0] sm:$0xff]  ;;  %v257_v58 = vld [vmem:[#allocation9 + $0x3c8] sm:$0xff]  ;;  %v4591_v60 = vcombine.low %v233_v49, %v241_v50  ;;  %v187_v28 = vld [vmem:[#allocation9 + $0x198] sm:$0xff]  ;;  %v4529_v30 = vcombine.low %v170_v18, %v178_v19  ;;  %v4546_v32 = vcombine.high %v186_v26, %v194_v27 }
  0x38   :  { %v4606_v61 = vcombine.high %v248_v55, %v256_v56  ;;  %v4608_v62 = vcombine.high %v249_v57, %v257_v58  ;;  %v4605_v4 = vcombine.low %v248_v55, %v256_v56  ;;  %v134_v5 = vld [vmem:[%s6346_s0] sm:$0xff]  ;;  %v4607_v6 = vcombine.low %v249_v57, %v257_v58  ;;  %v195_v29 = vld [vmem:[#allocation9 + $0x1d8] sm:$0xff]  ;;  %v202_v34 = vld [vmem:[#allocation9 + $0x210] sm:$0xff]  ;;  %s4934_s0 = smov [#allocation7]  }
  0x39   :  { %911 = vmatpush1.bf16.msra.mxu0 %v4541_v35  ;;  %952 = vmatpush1.bf16.msra.mxu1 %v4543_v36  ;;  %v5032_v11 = vpack.c.bf16 %v134_v5, %v134_v5  ;;  %v4548_v33 = vcombine.high %v187_v28, %v195_v29  ;;  %v210_v35 = vld [vmem:[#allocation9 + $0x250] sm:$0xff]  ;;  %v203_v36 = vld [vmem:[#allocation9 + $0x218] sm:$0xff]  ;;  %v4547_v39 = vcombine.low %v187_v28, %v195_v29  ;;  %v140_v3 = vld [vmem:[#allocation9 + $0x20] sm:$0xff]  ;;  %s125_s13 = sshll.u32 %s4934_s0, 4  ;;  %s126_s13 = int_to_ptr.vmem [resolvable:$true] %s125_s13 }
  0x3a   :  { %912 = vmatprep.subr.bf16.mxu0 %v4558_v37  ;;  %953 = vmatprep.subr.bf16.mxu1 %v4560_v38  ;;  %v211_v37 = vld [vmem:[#allocation9 + $0x258] sm:$0xff]  ;;  %v4545_v38 = vcombine.low %v186_v26, %v194_v27  ;;  %v4562_v40 = vcombine.high %v202_v34, %v210_v35  ;;  %v218_v42 = vld [vmem:[#allocation9 + $0x290] sm:$0xff]  ;;  %v141_v5 = vld [vmem:[#allocation9 + $0x28] sm:$0xff] }
  0x3b   :  { %v4564_v41 = vcombine.high %v203_v36, %v211_v37  ;;  %v4563_v47 = vcombine.low %v203_v36, %v211_v37  ;;  %v234_v50 = vld [vmem:[#allocation9 + $0x310] sm:$0xff]  ;;  %v156_v12 = vld [vmem:[#allocation9 + $0xa0] sm:$0xff] }
  0x3c   :  { %v250_v58 = vld [vmem:[#allocation9 + $0x390] sm:$0xff]  ;;  %v164_v13 = vld [vmem:[#allocation9 + $0xe0] sm:$0xff] }
  0x3d   :  { %913 = vmatpush1.bf16.msra.mxu0 %v4557_v43  ;;  %954 = vmatpush1.bf16.msra.mxu1 %v4559_v44  ;;  %v226_v43 = vld [vmem:[#allocation9 + $0x2d0] sm:$0xff]  ;;  %v219_v44 = vld [vmem:[#allocation9 + $0x298] sm:$0xff]  ;;  %v4518_v18 = vcombine.high %v156_v12, %v164_v13  ;;  %v172_v20 = vld [vmem:[#allocation9 + $0x120] sm:$0xff] }
  0x3e   :  { %914 = vmatprep.subr.bf16.mxu0 %v4574_v45  ;;  %955 = vmatprep.subr.bf16.mxu1 %v4576_v46  ;;  %v227_v45 = vld [vmem:[#allocation9 + $0x2d8] sm:$0xff]  ;;  %v4561_v46 = vcombine.low %v202_v34, %v210_v35  ;;  %v4578_v48 = vcombine.high %v218_v42, %v226_v43  ;;  %v180_v21 = vld [vmem:[#allocation9 + $0x160] sm:$0xff] }
  0x3f   :  { %v4580_v49 = vcombine.high %v219_v44, %v227_v45  ;;  %v4579_v55 = vcombine.low %v219_v44, %v227_v45  ;;  %v4534_v26 = vcombine.high %v172_v20, %v180_v21  ;;  %v188_v28 = vld [vmem:[#allocation9 + $0x1a0] sm:$0xff] }
  0x40   :  { %v196_v29 = vld [vmem:[#allocation9 + $0x1e0] sm:$0xff] }
  0x41   :  { %915 = vmatpush1.bf16.msra.mxu0 %v4573_v51  ;;  %956 = vmatpush1.bf16.msra.mxu1 %v4575_v52  ;;  %v242_v51 = vld [vmem:[#allocation9 + $0x350] sm:$0xff]  ;;  %v235_v52 = vld [vmem:[#allocation9 + $0x318] sm:$0xff]  ;;  %v4550_v34 = vcombine.high %v188_v28, %v196_v29  ;;  %v204_v36 = vld [vmem:[#allocation9 + $0x220] sm:$0xff] }
  0x42   :  { %916 = vmatprep.subr.bf16.mxu0 %v4590_v53  ;;  %957 = vmatprep.subr.bf16.mxu1 %v4592_v54  ;;  %v243_v53 = vld [vmem:[#allocation9 + $0x358] sm:$0xff]  ;;  %v4577_v54 = vcombine.low %v218_v42, %v226_v43  ;;  %v4594_v56 = vcombine.high %v234_v50, %v242_v51  ;;  %v212_v37 = vld [vmem:[#allocation9 + $0x260] sm:$0xff] }
  0x43   :  { %v4596_v57 = vcombine.high %v235_v52, %v243_v53  ;;  %v4595_v63 = vcombine.low %v235_v52, %v243_v53  ;;  %v4566_v42 = vcombine.high %v204_v36, %v212_v37  ;;  %v220_v44 = vld [vmem:[#allocation9 + $0x2a0] sm:$0xff] }
  0x44   :  { %v228_v45 = vld [vmem:[#allocation9 + $0x2e0] sm:$0xff] }
  0x45   :  { %917 = vmatpush1.bf16.msra.mxu0 %v4589_v59  ;;  %958 = vmatpush1.bf16.msra.mxu1 %v4591_v60  ;;  %v258_v59 = vld [vmem:[#allocation9 + $0x3d0] sm:$0xff]  ;;  %v251_v60 = vld [vmem:[#allocation9 + $0x398] sm:$0xff]  ;;  %v236_v52 = vld [vmem:[#allocation9 + $0x320] sm:$0xff] }
  0x46   :  { %918 = vmatprep.subr.bf16.mxu0 %v4606_v61  ;;  %959 = vmatprep.subr.bf16.mxu1 %v4608_v62  ;;  %v259_v61 = vld [vmem:[#allocation9 + $0x3d8] sm:$0xff]  ;;  %v4593_v62 = vcombine.low %v234_v50, %v242_v51  ;;  %v4610_v1 = vcombine.high %v250_v58, %v258_v59  ;;  %v4582_v50 = vcombine.high %v220_v44, %v228_v45  ;;  %v244_v53 = vld [vmem:[#allocation9 + $0x360] sm:$0xff] }
  0x47   :  { %v4612_v2 = vcombine.high %v251_v60, %v259_v61 }
  0x49   :  { %919 = vmatpush1.bf16.msra.mxu0 %v4605_v4  ;;  %960 = vmatpush1.bf16.msra.mxu1 %v4607_v6  ;;  %v148_v4 = vld [vmem:[#allocation9 + $0x60] sm:$0xff]  ;;  %v149_v6 = vld [vmem:[#allocation9 + $0x68] sm:$0xff] }
  0x4a   :  { %986 = vmatprep.subr.bf16.mxu0 %v4498_v7  ;;  %1027 = vmatprep.subr.bf16.mxu1 %v4500_v8  ;;  %v4609_v7 = vcombine.low %v250_v58, %v258_v59  ;;  %v4611_v8 = vcombine.low %v251_v60, %v259_v61  ;;  %v4502_v9 = vcombine.high %v140_v3, %v148_v4  ;;  %v252_v60 = vld [vmem:[#allocation9 + $0x3a0] sm:$0xff] }
  0x4b   :  { %v4504_v10 = vcombine.high %v141_v5, %v149_v6  ;;  %v4598_v58 = vcombine.high %v236_v52, %v244_v53  ;;  %v260_v61 = vld [vmem:[#allocation9 + $0x3e0] sm:$0xff] }
  0x4c   :  { %937 = vmatmul.mubr.bf16.vlgmr.msra.gmra.mrb[0].mxu0 %v5032_v11  ;;  %978 = vmatmul.mubr.bf16.vlgmr.msra.gmra.mrb[0].mxu1 %v5032_v11 }
  0x4d   :  { %987 = vmatpush1.bf16.msra.mxu0 %v4497_v14  ;;  %1028 = vmatpush1.bf16.msra.mxu1 %v4499_v15  ;;  %v157_v14 = vld [vmem:[#allocation9 + $0xa8] sm:$0xff] }
  0x4e   :  { %988 = vmatprep.subr.bf16.mxu0 %v4514_v16  ;;  %1029 = vmatprep.subr.bf16.mxu1 %v4516_v17  ;;  %v165_v15 = vld [vmem:[#allocation9 + $0xe8] sm:$0xff]  ;;  %v4501_v16 = vcombine.low %v140_v3, %v148_v4  ;;  %v4503_v17 = vcombine.low %v141_v5, %v149_v6  ;;  %v4614_v3 = vcombine.high %v252_v60, %v260_v61  ;;  %v142_v5 = vld [vmem:[#allocation9 + $0x30] sm:$0xff] }
  0x4f   :  { %1018 = vmatprep.mubr.bf16.mxu0 %v4922_v0  ;;  %1059 = vmatprep.mubr.bf16.mxu1 %v4922_v0  ;;  %v4520_v19 = vcombine.high %v157_v14, %v165_v15  ;;  %v150_v6 = vld [vmem:[#allocation9 + $0x70] sm:$0xff] }
  0x51   :  { %989 = vmatpush1.bf16.msra.mxu0 %v4513_v22  ;;  %1030 = vmatpush1.bf16.msra.mxu1 %v4515_v23  ;;  %v173_v22 = vld [vmem:[#allocation9 + $0x128] sm:$0xff] }
  0x52   :  { %990 = vmatprep.subr.bf16.mxu0 %v4530_v24  ;;  %1031 = vmatprep.subr.bf16.mxu1 %v4532_v25  ;;  %v181_v23 = vld [vmem:[#allocation9 + $0x168] sm:$0xff]  ;;  %v4517_v24 = vcombine.low %v156_v12, %v164_v13  ;;  %v4519_v25 = vcombine.low %v157_v14, %v165_v15  ;;  %v4506_v12 = vcombine.high %v142_v5, %v150_v6  ;;  %v158_v14 = vld [vmem:[#allocation9 + $0xb0] sm:$0xff] }
  0x53   :  { %v4536_v27 = vcombine.high %v173_v22, %v181_v23  ;;  %v166_v15 = vld [vmem:[#allocation9 + $0xf0] sm:$0xff] }
  0x55   :  { %991 = vmatpush1.bf16.msra.mxu0 %v4529_v30  ;;  %1032 = vmatpush1.bf16.msra.mxu1 %v4531_v31  ;;  %v189_v30 = vld [vmem:[#allocation9 + $0x1a8] sm:$0xff] }
  0x56   :  { %992 = vmatprep.subr.bf16.mxu0 %v4546_v32  ;;  %1033 = vmatprep.subr.bf16.mxu1 %v4548_v33  ;;  %v197_v31 = vld [vmem:[#allocation9 + $0x1e8] sm:$0xff]  ;;  %v4533_v32 = vcombine.low %v172_v20, %v180_v21  ;;  %v4535_v33 = vcombine.low %v173_v22, %v181_v23  ;;  %v4522_v20 = vcombine.high %v158_v14, %v166_v15  ;;  %v174_v22 = vld [vmem:[#allocation9 + $0x130] sm:$0xff] }
  0x57   :  { %v4552_v35 = vcombine.high %v189_v30, %v197_v31  ;;  %v182_v23 = vld [vmem:[#allocation9 + $0x170] sm:$0xff] }
  0x59   :  { %993 = vmatpush1.bf16.msra.mxu0 %v4545_v38  ;;  %1034 = vmatpush1.bf16.msra.mxu1 %v4547_v39  ;;  %v205_v38 = vld [vmem:[#allocation9 + $0x228] sm:$0xff] }
  0x5a   :  { %994 = vmatprep.subr.bf16.mxu0 %v4562_v40  ;;  %1035 = vmatprep.subr.bf16.mxu1 %v4564_v41  ;;  %v213_v39 = vld [vmem:[#allocation9 + $0x268] sm:$0xff]  ;;  %v4549_v40 = vcombine.low %v188_v28, %v196_v29  ;;  %v4551_v41 = vcombine.low %v189_v30, %v197_v31  ;;  %v4538_v28 = vcombine.high %v174_v22, %v182_v23  ;;  %v190_v30 = vld [vmem:[#allocation9 + $0x1b0] sm:$0xff] }
  0x5b   :  { %v4568_v43 = vcombine.high %v205_v38, %v213_v39  ;;  %v198_v31 = vld [vmem:[#allocation9 + $0x1f0] sm:$0xff] }
  0x5d   :  { %995 = vmatpush1.bf16.msra.mxu0 %v4561_v46  ;;  %1036 = vmatpush1.bf16.msra.mxu1 %v4563_v47  ;;  %v221_v46 = vld [vmem:[#allocation9 + $0x2a8] sm:$0xff] }
  0x5e   :  { %996 = vmatprep.subr.bf16.mxu0 %v4578_v48  ;;  %1037 = vmatprep.subr.bf16.mxu1 %v4580_v49  ;;  %v229_v47 = vld [vmem:[#allocation9 + $0x2e8] sm:$0xff]  ;;  %v4565_v48 = vcombine.low %v204_v36, %v212_v37  ;;  %v4567_v49 = vcombine.low %v205_v38, %v213_v39  ;;  %v4554_v36 = vcombine.high %v190_v30, %v198_v31  ;;  %v206_v38 = vld [vmem:[#allocation9 + $0x230] sm:$0xff] }
  0x5f   :  { %v4584_v51 = vcombine.high %v221_v46, %v229_v47  ;;  %v214_v39 = vld [vmem:[#allocation9 + $0x270] sm:$0xff] }
  0x61   :  { %997 = vmatpush1.bf16.msra.mxu0 %v4577_v54  ;;  %1038 = vmatpush1.bf16.msra.mxu1 %v4579_v55  ;;  %v237_v54 = vld [vmem:[#allocation9 + $0x328] sm:$0xff] }
  0x62   :  { %998 = vmatprep.subr.bf16.mxu0 %v4594_v56  ;;  %1039 = vmatprep.subr.bf16.mxu1 %v4596_v57  ;;  %v245_v55 = vld [vmem:[#allocation9 + $0x368] sm:$0xff]  ;;  %v4581_v56 = vcombine.low %v220_v44, %v228_v45  ;;  %v4583_v57 = vcombine.low %v221_v46, %v229_v47  ;;  %v4570_v44 = vcombine.high %v206_v38, %v214_v39  ;;  %v222_v45 = vld [vmem:[#allocation9 + $0x2b0] sm:$0xff]  ;;  %v223_v47 = vld [vmem:[#allocation9 + $0x2b8] sm:$0xff] }
  0x63   :  { %v4600_v59 = vcombine.high %v237_v54, %v245_v55  ;;  %v230_v46 = vld [vmem:[#allocation9 + $0x2f0] sm:$0xff] }
  0x65   :  { %999 = vmatpush1.bf16.msra.mxu0 %v4593_v62  ;;  %1040 = vmatpush1.bf16.msra.mxu1 %v4595_v63  ;;  %v253_v62 = vld [vmem:[#allocation9 + $0x3a8] sm:$0xff] }
  0x66   :  { %1000 = vmatprep.subr.bf16.mxu0 %v4610_v1  ;;  %1041 = vmatprep.subr.bf16.mxu1 %v4612_v2  ;;  %v261_v63 = vld [vmem:[#allocation9 + $0x3e8] sm:$0xff]  ;;  %v4597_v1 = vcombine.low %v236_v52, %v244_v53  ;;  %v4599_v2 = vcombine.low %v237_v54, %v245_v55  ;;  %v238_v53 = vld [vmem:[#allocation9 + $0x330] sm:$0xff]  ;;  %v239_v55 = vld [vmem:[#allocation9 + $0x338] sm:$0xff] }
  0x67   :  { %v4616_v4 = vcombine.high %v253_v62, %v261_v63  ;;  %v246_v54 = vld [vmem:[#allocation9 + $0x370] sm:$0xff] }
  0x69   :  { %1001 = vmatpush1.bf16.msra.mxu0 %v4609_v7  ;;  %1042 = vmatpush1.bf16.msra.mxu1 %v4611_v8  ;;  %v143_v7 = vld [vmem:[#allocation9 + $0x38] sm:$0xff] }
  0x6a   :  { %1068 = vmatprep.subr.bf16.mxu0 %v4502_v9  ;;  %1109 = vmatprep.subr.bf16.mxu1 %v4504_v10  ;;  %v151_v8 = vld [vmem:[#allocation9 + $0x78] sm:$0xff]  ;;  %v4613_v9 = vcombine.low %v252_v60, %v260_v61  ;;  %v4615_v10 = vcombine.low %v253_v62, %v261_v63  ;;  %v254_v61 = vld [vmem:[#allocation9 + $0x3b0] sm:$0xff] }
  0x6b   :  { %v4508_v13 = vcombine.high %v143_v7, %v151_v8  ;;  %v262_v62 = vld [vmem:[#allocation9 + $0x3f0] sm:$0xff]  ;;  %v255_v63 = vld [vmem:[#allocation9 + $0x3b8] sm:$0xff] }
  0x6c   :  { %1019 = vmatmul.mubr.bf16.vlgmr.msra.gmra.mrb[4].mxu0 %v5032_v11  ;;  %1060 = vmatmul.mubr.bf16.vlgmr.msra.gmra.mrb[4].mxu1 %v5032_v11 }
  0x6d   :  { %1069 = vmatpush1.bf16.msra.mxu0 %v4501_v16  ;;  %1110 = vmatpush1.bf16.msra.mxu1 %v4503_v17  ;;  %v159_v16 = vld [vmem:[#allocation9 + $0xb8] sm:$0xff] }
  0x6e   :  { %1070 = vmatprep.subr.bf16.mxu0 %v4518_v18  ;;  %1111 = vmatprep.subr.bf16.mxu1 %v4520_v19  ;;  %v167_v17 = vld [vmem:[#allocation9 + $0xf8] sm:$0xff]  ;;  %v4505_v18 = vcombine.low %v142_v5, %v150_v6  ;;  %v4507_v19 = vcombine.low %v143_v7, %v151_v8  ;;  %v4617_v6 = vcombine.low %v254_v61, %v262_v62 }
  0x6f   :  { %1100 = vmatprep.mubr.bf16.mxu0 %v4922_v0  ;;  %1141 = vmatprep.mubr.bf16.mxu1 %v4922_v0  ;;  %v4524_v21 = vcombine.high %v159_v16, %v167_v17 }
  0x71   :  { %1071 = vmatpush1.bf16.msra.mxu0 %v4517_v24  ;;  %1112 = vmatpush1.bf16.msra.mxu1 %v4519_v25  ;;  %v175_v24 = vld [vmem:[#allocation9 + $0x138] sm:$0xff] }
  0x72   :  { %1072 = vmatprep.subr.bf16.mxu0 %v4534_v26  ;;  %1113 = vmatprep.subr.bf16.mxu1 %v4536_v27  ;;  %v183_v25 = vld [vmem:[#allocation9 + $0x178] sm:$0xff]  ;;  %v4521_v26 = vcombine.low %v158_v14, %v166_v15  ;;  %v4523_v27 = vcombine.low %v159_v16, %v167_v17 }
  0x73   :  { %v4540_v29 = vcombine.high %v175_v24, %v183_v25 }
  0x75   :  { %1073 = vmatpush1.bf16.msra.mxu0 %v4533_v32  ;;  %1114 = vmatpush1.bf16.msra.mxu1 %v4535_v33  ;;  %v191_v32 = vld [vmem:[#allocation9 + $0x1b8] sm:$0xff] }
  0x76   :  { %1074 = vmatprep.subr.bf16.mxu0 %v4550_v34  ;;  %1115 = vmatprep.subr.bf16.mxu1 %v4552_v35  ;;  %v199_v33 = vld [vmem:[#allocation9 + $0x1f8] sm:$0xff]  ;;  %v4537_v34 = vcombine.low %v174_v22, %v182_v23  ;;  %v4539_v35 = vcombine.low %v175_v24, %v183_v25 }
  0x77   :  { %v4556_v37 = vcombine.high %v191_v32, %v199_v33 }
  0x79   :  { %1075 = vmatpush1.bf16.msra.mxu0 %v4549_v40  ;;  %1116 = vmatpush1.bf16.msra.mxu1 %v4551_v41  ;;  %v207_v40 = vld [vmem:[#allocation9 + $0x238] sm:$0xff] }
  0x7a   :  { %1076 = vmatprep.subr.bf16.mxu0 %v4566_v42  ;;  %1117 = vmatprep.subr.bf16.mxu1 %v4568_v43  ;;  %v215_v41 = vld [vmem:[#allocation9 + $0x278] sm:$0xff]  ;;  %v4553_v42 = vcombine.low %v190_v30, %v198_v31  ;;  %v4555_v43 = vcombine.low %v191_v32, %v199_v33 }
  0x7d   :  { %1077 = vmatpush1.bf16.msra.mxu0 %v4565_v48  ;;  %1118 = vmatpush1.bf16.msra.mxu1 %v4567_v49  ;;  %v231_v48 = vld [vmem:[#allocation9 + $0x2f8] sm:$0xff]  ;;  %v4569_v49 = vcombine.low %v206_v38, %v214_v39 }
  0x7e   :  { %1078 = vmatprep.subr.bf16.mxu0 %v4582_v50  ;;  %1119 = vmatprep.subr.bf16.mxu1 %v4584_v51  ;;  %v4571_v50 = vcombine.low %v207_v40, %v215_v41  ;;  %v4586_v51 = vcombine.high %v222_v45, %v230_v46  ;;  %v4588_v52 = vcombine.high %v223_v47, %v231_v48 }
  0x81   :  { %1079 = vmatpush1.bf16.msra.mxu0 %v4581_v56  ;;  %1120 = vmatpush1.bf16.msra.mxu1 %v4583_v57  ;;  %v247_v56 = vld [vmem:[#allocation9 + $0x378] sm:$0xff]  ;;  %v4585_v57 = vcombine.low %v222_v45, %v230_v46 }
  0x82   :  { %1080 = vmatprep.subr.bf16.mxu0 %v4598_v58  ;;  %1121 = vmatprep.subr.bf16.mxu1 %v4600_v59  ;;  %v4587_v58 = vcombine.low %v223_v47, %v231_v48  ;;  %v4602_v59 = vcombine.high %v238_v53, %v246_v54  ;;  %v4604_v60 = vcombine.high %v239_v55, %v247_v56 }
  0x85   :  { %1081 = vmatpush1.bf16.msra.mxu0 %v4597_v1  ;;  %1122 = vmatpush1.bf16.msra.mxu1 %v4599_v2  ;;  %v263_v1 = vld [vmem:[#allocation9 + $0x3f8] sm:$0xff]  ;;  %v4601_v2 = vcombine.low %v238_v53, %v246_v54 }
  0x86   :  { %1082 = vmatprep.subr.bf16.mxu0 %v4614_v3  ;;  %1123 = vmatprep.subr.bf16.mxu1 %v4616_v4  ;;  %v4603_v3 = vcombine.low %v239_v55, %v247_v56  ;;  %v4618_v4 = vcombine.high %v254_v61, %v262_v62  ;;  %v4620_v5 = vcombine.high %v255_v63, %v263_v1 }
  0x87   :  { %v4619_v7 = vcombine.low %v255_v63, %v263_v1 }
  0x89   :  { %1083 = vmatpush1.bf16.msra.mxu0 %v4613_v9  ;;  %1124 = vmatpush1.bf16.msra.mxu1 %v4615_v10 }
  0x8a   :  { %1150 = vmatprep.subr.bf16.mxu0 %v4506_v12  ;;  %1191 = vmatprep.subr.bf16.mxu1 %v4508_v13 }
  0x8c   :  { %1101 = vmatmul.mubr.bf16.vlgmr.msra.gmra.mrb[8].mxu0 %v5032_v11  ;;  %1142 = vmatmul.mubr.bf16.vlgmr.msra.gmra.mrb[8].mxu1 %v5032_v11 }
  0x8d   :  { %1151 = vmatpush1.bf16.msra.mxu0 %v4505_v18  ;;  %1192 = vmatpush1.bf16.msra.mxu1 %v4507_v19 }
  0x8e   :  { %1152 = vmatprep.subr.bf16.mxu0 %v4522_v20  ;;  %1193 = vmatprep.subr.bf16.mxu1 %v4524_v21 }
  0x8f   :  { %1182 = vmatprep.mubr.bf16.mxu0 %v4922_v0  ;;  %1223 = vmatprep.mubr.bf16.mxu1 %v4922_v0  ;;  %v4572_v0 = vcombine.high %v207_v40, %v215_v41 }
  0x91   :  { %1153 = vmatpush1.bf16.msra.mxu0 %v4521_v26  ;;  %1194 = vmatpush1.bf16.msra.mxu1 %v4523_v27 }
  0x92   :  { %1154 = vmatprep.subr.bf16.mxu0 %v4538_v28  ;;  %1195 = vmatprep.subr.bf16.mxu1 %v4540_v29 }
  0x95   :  { %1155 = vmatpush1.bf16.msra.mxu0 %v4537_v34  ;;  %1196 = vmatpush1.bf16.msra.mxu1 %v4539_v35 }
  0x96   :  { %1156 = vmatprep.subr.bf16.mxu0 %v4554_v36  ;;  %1197 = vmatprep.subr.bf16.mxu1 %v4556_v37 }
  0x99   :  { %1157 = vmatpush1.bf16.msra.mxu0 %v4553_v42  ;;  %1198 = vmatpush1.bf16.msra.mxu1 %v4555_v43 }
  0x9a   :  { %1158 = vmatprep.subr.bf16.mxu0 %v4570_v44  ;;  %1199 = vmatprep.subr.bf16.mxu1 %v4572_v0 }
  0x9d   :  { %1159 = vmatpush1.bf16.msra.mxu0 %v4569_v49  ;;  %1200 = vmatpush1.bf16.msra.mxu1 %v4571_v50 }
  0x9e   :  { %1160 = vmatprep.subr.bf16.mxu0 %v4586_v51  ;;  %1201 = vmatprep.subr.bf16.mxu1 %v4588_v52 }
  0xa1   :  { %1161 = vmatpush1.bf16.msra.mxu0 %v4585_v57  ;;  %1202 = vmatpush1.bf16.msra.mxu1 %v4587_v58 }
  0xa2   :  { %1162 = vmatprep.subr.bf16.mxu0 %v4602_v59  ;;  %1203 = vmatprep.subr.bf16.mxu1 %v4604_v60 }
  0xa5   :  { %1163 = vmatpush1.bf16.msra.mxu0 %v4601_v2  ;;  %1204 = vmatpush1.bf16.msra.mxu1 %v4603_v3 }
  0xa6   :  { %1164 = vmatprep.subr.bf16.mxu0 %v4618_v4  ;;  %1205 = vmatprep.subr.bf16.mxu1 %v4620_v5 }
  0xa9   :  { %1165 = vmatpush1.bf16.msra.mxu0 %v4617_v6  ;;  %1206 = vmatpush1.bf16.msra.mxu1 %v4619_v7 }
  0xac   :  { %1183 = vmatmul.mubr.bf16.vlgmr.msra.gmra.mrb[12].mxu0 %v5032_v11  ;;  %1224 = vmatmul.mubr.bf16.vlgmr.msra.gmra.mrb[12].mxu1 %v5032_v11 }
 0x11f   :  { %v5048_v8 = vpop.f32.mrb[0].mxu0  ;;  %v5050_v9 = vpop.f32.mrb[0].mxu1 }
 0x120   :  { %v5052_v10 = vpop.f32.mrb[1].mxu0  ;;  %v5054_v12 = vpop.f32.mrb[1].mxu1  ;;  %v1256_v17 = vmul.f32 %v5048_v8, %v5048_v8  ;;  %v1258_v11 = vmul.f32 %v5050_v9, %v5050_v9 }
 0x121   :  { %v942_v13 = vpop.f32.mrb[2].mxu0  ;;  %v983_v14 = vpop.f32.mrb[2].mxu1  ;;  %v1257_v19 = vmul.f32 %v5052_v10, %v5052_v10  ;;  %v1259_v30 = vmul.f32 %v5054_v12, %v5054_v12 }
 0x122   :  { %v943_v15 = vpop.f32.mrb[3].mxu0  ;;  %v984_v16 = vpop.f32.mrb[3].mxu1 }
 0x13f   :  { %v5058_v18 = vpop.f32.mrb[4].mxu0  ;;  %v5068_v22 = vpop.f32.mrb[4].mxu1 }
 0x140   :  { %v1268_v20 = vadd.f32 %v5058_v18, %v5048_v8  ;;  %v1272_v21 = vmul.f32 %v5058_v18, %v5058_v18  ;;  %v5070_v23 = vpop.f32.mrb[5].mxu0  ;;  %v1270_v24 = vadd.f32 %v5068_v22, %v5050_v9  ;;  %v1274_v25 = vmul.f32 %v5068_v22, %v5068_v22  ;;  %v5080_v28 = vpop.f32.mrb[5].mxu1 }
 0x141   :  { %v1269_v26 = vadd.f32 %v5070_v23, %v5052_v10  ;;  %v1273_v27 = vmul.f32 %v5070_v23, %v5070_v23  ;;  %v1024_v29 = vpop.f32.mrb[6].mxu0  ;;  %v1271_v32 = vadd.f32 %v5080_v28, %v5054_v12  ;;  %v1275_v33 = vmul.f32 %v5080_v28, %v5080_v28  ;;  %v1065_v34 = vpop.f32.mrb[6].mxu1 }
 0x142   :  { %v1276_v31 = vadd.f32 %v1272_v21, %v1256_v17  ;;  %v1025_v35 = vpop.f32.mrb[7].mxu0  ;;  %v1278_v36 = vadd.f32 %v1274_v25, %v1258_v11  ;;  %v1066_v38 = vpop.f32.mrb[7].mxu1 }
 0x143   :  { %v1277_v37 = vadd.f32 %v1273_v27, %v1257_v19  ;;  %v1279_v39 = vadd.f32 %v1275_v33, %v1259_v30 }
 0x144   :  { %4898 = shalt.err (!%p4895_p10)  }
 0x145   :  { %s4899_s20 = scalar_lea.vmem %s126_s13, 4096  ;;  %p4904_p12 = scmp.lt.s32.totalorder %s126_s13, %s126_s13 }
 0x146   :  { %p4900_p11 = scmp.ne.s32.totalorder %s126_s13, %s4899_s20  ;;  %p4905_p13 = scmp.lt.s32.totalorder %s4899_s20, %s4899_s20 }
 0x148   :  { %p4906_p0 = por %p4905_p13, %p4904_p12 }
 0x14a   :  { %p4907_p1 = pnand %p4906_p0, %p4900_p11 }
 0x14c   :  { %4910 = shalt.err (!%p4907_p1)  }
 0x14d   :  { %128 = dma.hbm_to_vmem [thread:$0]  %s6350_s4, 4096, %s126_s13, [#allocation8 + $0x2]  ;;  %v129_v59 = vlaneseq  ;;  %v4935_v61 = vmov 0.0  }
 0x14f   :  { %v5121_v60 = vshrl.u32 %v129_v59, 7 }
 0x151   :  { %vm131_vm0 = vcmp.lt.s32.totalorder %v5121_v60, 2 }
 0x152   :  { %v5124_v62 = vsel %vm131_vm0, 1.0, %v4935_v61 }
 0x153   :  { %6373 = vst [vmem:[#allocation23_spill] sm:$0xff] %v5124_v62 }
 0x15f   :  { %v5100_v40 = vpop.f32.mrb[8].mxu0  ;;  %v5105_v43 = vpop.f32.mrb[8].mxu1 }
 0x160   :  { %v1284_v41 = vadd.f32 %v1268_v20, %v5100_v40  ;;  %v1288_v42 = vmul.f32 %v5100_v40, %v5100_v40  ;;  %v5107_v44 = vpop.f32.mrb[9].mxu0  ;;  %v1286_v0 = vadd.f32 %v1270_v24, %v5105_v43  ;;  %v1290_v45 = vmul.f32 %v5105_v43, %v5105_v43  ;;  %v5115_v48 = vpop.f32.mrb[9].mxu1 }
 0x161   :  { %v1285_v46 = vadd.f32 %v1269_v26, %v5107_v44  ;;  %v1289_v47 = vmul.f32 %v5107_v44, %v5107_v44  ;;  %v1106_v49 = vpop.f32.mrb[10].mxu0  ;;  %v1287_v51 = vadd.f32 %v1271_v32, %v5115_v48  ;;  %v1291_v52 = vmul.f32 %v5115_v48, %v5115_v48  ;;  %v1147_v53 = vpop.f32.mrb[10].mxu1 }
 0x162   :  { %v1292_v50 = vadd.f32 %v1288_v42, %v1276_v31  ;;  %v1107_v54 = vpop.f32.mrb[11].mxu0  ;;  %v1294_v55 = vadd.f32 %v1290_v45, %v1278_v36  ;;  %v1148_v57 = vpop.f32.mrb[11].mxu1 }
 0x163   :  { %v1293_v56 = vadd.f32 %v1289_v47, %v1277_v37  ;;  %v1295_v58 = vadd.f32 %v1291_v52, %v1279_v39 }
 0x17f   :  { %v5126_v63 = vpop.f32.mrb[12].mxu0  ;;  %v5131_v3 = vpop.f32.mrb[12].mxu1 }
 0x180   :  { %v1300_v1 = vadd.f32 %v1284_v41, %v5126_v63  ;;  %v1304_v2 = vmul.f32 %v5126_v63, %v5126_v63  ;;  %v5133_v4 = vpop.f32.mrb[13].mxu0  ;;  %v1302_v5 = vadd.f32 %v1286_v0, %v5131_v3  ;;  %v1306_v6 = vmul.f32 %v5131_v3, %v5131_v3  ;;  %v5141_v14 = vpop.f32.mrb[13].mxu1 }
 0x181   :  { %v1301_v7 = vadd.f32 %v1285_v46, %v5133_v4  ;;  %v1305_v13 = vmul.f32 %v5133_v4, %v5133_v4  ;;  %v1188_v15 = vpop.f32.mrb[14].mxu0  ;;  %v1303_v11 = vadd.f32 %v1287_v51, %v5141_v14  ;;  %v1307_v19 = vmul.f32 %v5141_v14, %v5141_v14  ;;  %v1229_v20 = vpop.f32.mrb[14].mxu1 }
 0x182   :  { %v1308_v16 = vadd.f32 %v1304_v2, %v1292_v50  ;;  %v1312_v17 = vmul.f32 %v5124_v62, %v1300_v1  ;;  %v1189_v21 = vpop.f32.mrb[15].mxu0  ;;  %v1310_v24 = vadd.f32 %v1306_v6, %v1294_v55  ;;  %v1314_v25 = vmul.f32 %v5124_v62, %v1302_v5  ;;  %v1230_v29 = vpop.f32.mrb[15].mxu1 }
 0x183   :  { %v1309_v26 = vadd.f32 %v1305_v13, %v1293_v56  ;;  %v1313_v27 = vmul.f32 %v5124_v62, %v1301_v7  ;;  %v1311_v31 = vadd.f32 %v1307_v19, %v1295_v58  ;;  %v1315_v32 = vmul.f32 %v5124_v62, %v1303_v11 }
 0x184   :  { %v1322_v30 = vmul.f32 %v5124_v62, %v1308_v16  ;;  %v1324_v33 = vmul.f32 %v5124_v62, %v1310_v24 }
 0x185   :  { %v1317_v34 = vadd.f32 %v1313_v27, %v1312_v17  ;;  %v1318_v35 = vadd.f32 %v1314_v25, %v1313_v27  ;;  %v1323_v36 = vmul.f32 %v5124_v62, %v1309_v26  ;;  %v1316_v37 = vadd.f32 %v1315_v32, %v1312_v17 }
 0x186   :  { %v1319_v38 = vadd.f32 %v1315_v32, %v1314_v25  ;;  %v1325_v39 = vmul.f32 %v5124_v62, %v1311_v31 }
 0x187   :  { %v1327_v41 = vadd.f32 %v1323_v36, %v1322_v30  ;;  %v1328_v42 = vadd.f32 %v1324_v33, %v1323_v36  ;;  %v1320_v0 = vadd.f32 %v1318_v35, %v1316_v37 }
 0x188   :  { %v1321_v45 = vadd.f32 %v1319_v38, %v1317_v34  ;;  %v1326_v46 = vadd.f32 %v1325_v39, %v1322_v30  ;;  %v1329_v47 = vadd.f32 %v1325_v39, %v1324_v33  ;;  %v4936_v39 = vmov 1966171168  }
 0x189   :  { %v1332_v51 = vrot.slane %v1320_v0, 4 }
 0x18a   :  { %v1330_v49 = vadd.f32 %v1328_v42, %v1326_v46  ;;  %v1331_v50 = vadd.f32 %v1329_v47, %v1327_v41  ;;  %v1338_v52 = vrot.slane %v1321_v45, 4  ;;  %v1375_v41 = vunpack.c.l.s4 %v4936_v39 }
 0x18b   :  { %v1333_v53 = vadd.f32 %v1332_v51, %v1320_v0  ;;  %v1366_v51 = vld [vmem:[%s6351_s5] sm:$0xf] }
 0x18c   :  { %v1339_v54 = vadd.f32 %v1338_v52, %v1321_v45  ;;  %v1344_v55 = vrot.slane %v1330_v49, 4  ;;  %v1350_v56 = vrot.slane %v1331_v50, 4  ;;  %v1376_v42 = vunpack.c.0.s8 %v1375_v41 }
 0x18d   :  { %v1334_v57 = vrot.slane %v1333_v53, 2  ;;  %v5162_v52 = vsub.s32 0, %v5121_v60 }
 0x18e   :  { %v1340_v58 = vrot.slane %v1339_v54, 2  ;;  %v1345_v61 = vadd.f32 %v1344_v55, %v1330_v49  ;;  %v1351_v1 = vadd.f32 %v1350_v56, %v1331_v50  ;;  %v5155_v45 = vsub.s32 %v1376_v42, %v5121_v60 }
 0x18f   :  { %v1335_v2 = vadd.f32 %v1334_v57, %v1333_v53  ;;  %v5169_v55 = vsub.s32 2, %v5121_v60  ;;  %v5172_v56 = vsub.s32 3, %v5121_v60 }
 0x190   :  { %v1341_v5 = vadd.f32 %v1340_v58, %v1339_v54  ;;  %v1346_v6 = vrot.slane %v1345_v61, 2  ;;  %v1352_v7 = vrot.slane %v1351_v1, 2  ;;  %v5166_v54 = vsub.s32 1, %v5121_v60 }
 0x191   :  { %v1336_v13 = vrot.slane %v1335_v2, 1 }
 0x192   :  { %v1342_v15 = vrot.slane %v1341_v5, 1  ;;  %v1347_v16 = vadd.f32 %v1346_v6, %v1345_v61  ;;  %v1353_v17 = vadd.f32 %v1352_v7, %v1351_v1 }
 0x193   :  { %v1337_v11 = vadd.f32 %v1336_v13, %v1335_v2 }
 0x194   :  { %v1343_v19 = vadd.f32 %v1342_v15, %v1341_v5  ;;  %v1348_v20 = vrot.slane %v1347_v16, 1  ;;  %v1354_v21 = vrot.slane %v1353_v17, 1 }
 0x195   :  { %v1356_v26 = vmul.f32 0.03125, %v1337_v11 }
 0x196   :  { %v1349_v24 = vadd.f32 %v1348_v20, %v1347_v16  ;;  %v1355_v25 = vadd.f32 %v1354_v21, %v1353_v17  ;;  %v1357_v27 = vmul.f32 0.03125, %v1343_v19 }
 0x197   :  { %v1360_v31 = vmul.f32 %v1356_v26, %v1356_v26 }
 0x198   :  { %v1358_v29 = vmul.f32 0.03125, %v1349_v24  ;;  %v1359_v30 = vmul.f32 0.03125, %v1355_v25  ;;  %v1361_v32 = vmul.f32 %v1357_v27, %v1357_v27 }
 0x19a   :  { %v1362_v33 = vsub.f32 %v1358_v29, %v1360_v31  ;;  %v1363_v34 = vsub.f32 %v1359_v30, %v1361_v32 }
 0x19c   :  { %v1364_v35 = vmax.f32 %v1362_v33, 0.0  ;;  %v1365_v36 = vmax.f32 %v1363_v34, 0.0 }
 0x19e   :  { %v1367_v37 = vadd.f32 1e-05, %v1364_v35  ;;  %v1368_v38 = vadd.f32 1e-05, %v1365_v36 }
 0x1a0   :  { %4815 = vrsqrt.f32 %v1367_v37 }
 0x1a1   :  { %4817 = vrsqrt.f32 %v1368_v38 }
 0x1aa   :  { %v4816_v0 = vpop.eup %4815 }
 0x1ab   :  { %v4818_v46 = vpop.eup %4817 }
 0x1ac   :  { %v1373_v47 = vcombine.low %v4816_v0, %v4818_v46 }
 0x1ae   :  { %v1380_v49 = vrot.slane %v1373_v47, %v5155_v45 }
 0x1b0   :  { %v1381_v50 = vcombine.low %v1380_v49, %v1380_v49 }
 0x1b2   :  { %v1388_v53 = vrot.slane %v1381_v50, %v5155_v45 }
 0x1b4   :  { %v1390_v57 = vmul.f32 %v1388_v53, %v1366_v51 }
 0x1b6   :  { %v1396_v58 = vrot.slane %v1390_v57, %v5162_v52  ;;  %v1400_v61 = vrot.slane %v1390_v57, %v5166_v54  ;;  %v1404_v1 = vrot.slane %v1390_v57, %v5169_v55  ;;  %v1408_v2 = vrot.slane %v1390_v57, %v5172_v56 }
 0x1b8   :  { %v1413_v5 = vmul.f32 %v1396_v58, %v1356_v26  ;;  %v1414_v6 = vmul.f32 %v1400_v61, %v1357_v27  ;;  %v1415_v7 = vmul.f32 %v1404_v1, %v1356_v26  ;;  %v1416_v13 = vmul.f32 %v1408_v2, %v1357_v27 }
 0x1b9   :  { %v1447_v15 = vmul.f32 %v1396_v58, %v5048_v8  ;;  %v1448_v16 = vmul.f32 %v1400_v61, %v5052_v10  ;;  %v1449_v60 = vmul.f32 %v1404_v1, %v5050_v9  ;;  %v1450_v17 = vmul.f32 %v1408_v2, %v5054_v12 }
 0x1ba   :  { %v1421_v11 = vcombine.low %v1413_v5, %v1414_v6  ;;  %v1422_v19 = vcombine.low %v1415_v7, %v1416_v13  ;;  %v1492_v20 = vmul.f32 %v1396_v58, %v5058_v18  ;;  %v1493_v21 = vmul.f32 %v1400_v61, %v5070_v23 }
 0x1bb   :  { %v1494_v24 = vmul.f32 %v1404_v1, %v5068_v22  ;;  %v1495_v25 = vmul.f32 %v1408_v2, %v5080_v28  ;;  %v1516_v26 = vmul.f32 %v1396_v58, %v5100_v40  ;;  %v1517_v8 = vmul.f32 %v1400_v61, %v5107_v44  ;;  %v1391_v40 = vld [vmem:[%s6352_s6] sm:$0xf] }
 0x1bc   :  { %v1429_v10 = vrot.slane %v1421_v11, %v5155_v45  ;;  %v1436_v9 = vrot.slane %v1422_v19, %v5155_v45  ;;  %v1518_v12 = vmul.f32 %v1404_v1, %v5105_v43  ;;  %v1519_v27 = vmul.f32 %v1408_v2, %v5115_v48 }
 0x1bd   :  { %v1540_v18 = vmul.f32 %v1396_v58, %v5126_v63  ;;  %v1541_v23 = vmul.f32 %v1400_v61, %v5133_v4  ;;  %v1542_v22 = vmul.f32 %v1404_v1, %v5131_v3  ;;  %v1543_v28 = vmul.f32 %v1408_v2, %v5141_v14 }
 0x1be   :  { %v1437_v29 = vcombine.low %v1429_v10, %v1436_v9 }
 0x1c0   :  { %v1444_v44 = vrot.slane %v1437_v29, %v5155_v45 }
 0x1c2   :  { %v1446_v30 = vsub.f32 %v1391_v40, %v1444_v44 }
 0x1c4   :  { %v1455_v43 = vrot.slane %v1446_v30, %v5162_v52  ;;  %v1459_v48 = vrot.slane %v1446_v30, %v5166_v54  ;;  %v1463_v63 = vrot.slane %v1446_v30, %v5169_v55  ;;  %v1467_v4 = vrot.slane %v1446_v30, %v5172_v56 }
 0x1c6   :  { %v1472_v31 = vadd.f32 %v1455_v43, %v1447_v15  ;;  %v1473_v3 = vadd.f32 %v1459_v48, %v1448_v16  ;;  %v1474_v32 = vadd.f32 %v1463_v63, %v1449_v60  ;;  %v1475_v14 = vadd.f32 %v1467_v4, %v1450_v17 }
 0x1c7   :  { %v1496_v33 = vadd.f32 %v1492_v20, %v1455_v43  ;;  %v1497_v34 = vadd.f32 %v1493_v21, %v1459_v48  ;;  %v1498_v35 = vadd.f32 %v1494_v24, %v1463_v63  ;;  %v1499_v36 = vadd.f32 %v1495_v25, %v1467_v4 }
 0x1c8   :  { %v1476_v37 = vmax.f32 %v1472_v31, 0.0  ;;  %v1477_v38 = vmax.f32 %v1473_v3, 0.0  ;;  %v1478_v39 = vmax.f32 %v1474_v32, 0.0  ;;  %v1479_v41 = vmax.f32 %v1475_v14, 0.0 }
 0x1c9   :  { %v1500_v42 = vmax.f32 %v1496_v33, 0.0  ;;  %v1501_v0 = vmax.f32 %v1497_v34, 0.0  ;;  %v1502_v46 = vmax.f32 %v1498_v35, 0.0  ;;  %v1503_v47 = vmax.f32 %v1499_v36, 0.0 }
 0x1ca   :  { %v5205_v49 = vmul.f32 %v5124_v62, %v1476_v37  ;;  %v1481_v50 = vmul.f32 %v5124_v62, %v1477_v38  ;;  %v5209_v51 = vmul.f32 %v5124_v62, %v1478_v39  ;;  %v5212_v53 = vmul.f32 %v5124_v62, %v1479_v41 }
 0x1cb   :  { %v5215_v57 = vmul.f32 %v5124_v62, %v1500_v42  ;;  %v1505_v58 = vmul.f32 %v5124_v62, %v1501_v0  ;;  %v5219_v61 = vmul.f32 %v5124_v62, %v1502_v46  ;;  %v5222_v1 = vmul.f32 %v5124_v62, %v1503_v47 }
 0x1cc   :  { %v1520_v2 = vadd.f32 %v1516_v26, %v1455_v43  ;;  %v1521_v5 = vadd.f32 %v1517_v8, %v1459_v48  ;;  %v1522_v6 = vadd.f32 %v1518_v12, %v1463_v63  ;;  %v1523_v7 = vadd.f32 %v1519_v27, %v1467_v4 }
 0x1cd   :  { %v1544_v13 = vadd.f32 %v1540_v18, %v1455_v43  ;;  %v1545_v15 = vadd.f32 %v1541_v23, %v1459_v48  ;;  %v1546_v16 = vadd.f32 %v1542_v22, %v1463_v63  ;;  %v1547_v60 = vadd.f32 %v1543_v28, %v1467_v4 }
 0x1ce   :  { %v1524_v17 = vmax.f32 %v1520_v2, 0.0  ;;  %v1525_v11 = vmax.f32 %v1521_v5, 0.0  ;;  %v1526_v19 = vmax.f32 %v1522_v6, 0.0  ;;  %v1527_v20 = vmax.f32 %v1523_v7, 0.0 }
 0x1cf   :  { %v1548_v21 = vmax.f32 %v1544_v13, 0.0  ;;  %v1549_v24 = vmax.f32 %v1545_v15, 0.0  ;;  %v1550_v25 = vmax.f32 %v1546_v16, 0.0  ;;  %v1551_v10 = vmax.f32 %v1547_v60, 0.0 }
 0x1d0   :  { %v5225_v9 = vmul.f32 %v5124_v62, %v1524_v17  ;;  %v5228_v26 = vmul.f32 %v5124_v62, %v1525_v11  ;;  %v5231_v8 = vmul.f32 %v5124_v62, %v1526_v19  ;;  %v5234_v12 = vmul.f32 %v5124_v62, %v1527_v20 }
 0x1d1   :  { %v5237_v27 = vmul.f32 %v5124_v62, %v1548_v21  ;;  %v5240_v18 = vmul.f32 %v5124_v62, %v1549_v24  ;;  %v5243_v23 = vmul.f32 %v5124_v62, %v1550_v25  ;;  %v5246_v22 = vmul.f32 %v5124_v62, %v1551_v10 }
 0x1d2   :  { %4913 = dma.done.wait [#allocation8], 32768 }
 0x1d3   :  { %4914 = vsyncadd [#allocation8], 4294934528  ;;  %v5248_v28 = vpack.c.bf16 %v1505_v58, %v1481_v50  ;;  %v1589_v29 = vld [vmem:[#allocation5 + $0x8] sm:$0xff]  ;;  %v1591_v40 = vld [vmem:[#allocation5 + $0x18] sm:$0xff] }
 0x1d4   :  { %v1588_v44 = vld [vmem:[#allocation5] sm:$0xff]  ;;  %1844 = vmatprep.subr.bf16.mxu0 %v1589_v29  ;;  %1946 = vmatprep.subr.bf16.mxu1 %v1591_v40  ;;  %v1590_v30 = vld [vmem:[#allocation5 + $0x10] sm:$0xff]  ;;  %v1597_v43 = vld [vmem:[#allocation5 + $0x48] sm:$0xff] }
 0x1d5   :  { %1876 = vmatprep.mubr.bf16.mxu0 %v5248_v28  ;;  %1978 = vmatprep.mubr.bf16.mxu1 %v5248_v28  ;;  %v1599_v48 = vld [vmem:[#allocation5 + $0x58] sm:$0xff]  ;;  %v1596_v63 = vld [vmem:[#allocation5 + $0x40] sm:$0xff]  ;;  %v1598_v4 = vld [vmem:[#allocation5 + $0x50] sm:$0xff] }
 0x1d6   :  { %1845 = vmatpush1.bf16.msra.mxu0 %v1588_v44  ;;  %1947 = vmatpush1.bf16.msra.mxu1 %v1590_v30  ;;  %v1605_v31 = vld [vmem:[#allocation5 + $0x88] sm:$0xff]  ;;  %v1607_v3 = vld [vmem:[#allocation5 + $0x98] sm:$0xff]  ;;  %v1604_v32 = vld [vmem:[#allocation5 + $0x80] sm:$0xff] }
 0x1d7   :  { %1846 = vmatprep.subr.bf16.mxu0 %v1597_v43  ;;  %1948 = vmatprep.subr.bf16.mxu1 %v1599_v48  ;;  %v1606_v14 = vld [vmem:[#allocation5 + $0x90] sm:$0xff]  ;;  %v1613_v33 = vld [vmem:[#allocation5 + $0xc8] sm:$0xff]  ;;  %v1615_v34 = vld [vmem:[#allocation5 + $0xd8] sm:$0xff] }
 0x1d8   :  { %v1612_v35 = vld [vmem:[#allocation5 + $0xc0] sm:$0xff]  ;;  %v1614_v36 = vld [vmem:[#allocation5 + $0xd0] sm:$0xff]  ;;  %v1621_v37 = vld [vmem:[#allocation5 + $0x108] sm:$0xff] }
 0x1d9   :  { %v1623_v38 = vld [vmem:[#allocation5 + $0x118] sm:$0xff]  ;;  %v1620_v39 = vld [vmem:[#allocation5 + $0x100] sm:$0xff]  ;;  %v1622_v41 = vld [vmem:[#allocation5 + $0x110] sm:$0xff] }
 0x1da   :  { %1847 = vmatpush1.bf16.msra.mxu0 %v1596_v63  ;;  %1949 = vmatpush1.bf16.msra.mxu1 %v1598_v4  ;;  %v1629_v42 = vld [vmem:[#allocation5 + $0x148] sm:$0xff]  ;;  %v1631_v0 = vld [vmem:[#allocation5 + $0x158] sm:$0xff]  ;;  %v1628_v46 = vld [vmem:[#allocation5 + $0x140] sm:$0xff] }
 0x1db   :  { %1848 = vmatprep.subr.bf16.mxu0 %v1605_v31  ;;  %1950 = vmatprep.subr.bf16.mxu1 %v1607_v3  ;;  %v1630_v47 = vld [vmem:[#allocation5 + $0x150] sm:$0xff]  ;;  %v1637_v50 = vld [vmem:[#allocation5 + $0x188] sm:$0xff]  ;;  %v1639_v58 = vld [vmem:[#allocation5 + $0x198] sm:$0xff] }
 0x1dc   :  { %v1636_v2 = vld [vmem:[#allocation5 + $0x180] sm:$0xff]  ;;  %v1638_v5 = vld [vmem:[#allocation5 + $0x190] sm:$0xff]  ;;  %v1645_v6 = vld [vmem:[#allocation5 + $0x1c8] sm:$0xff] }
 0x1dd   :  { %v1647_v7 = vld [vmem:[#allocation5 + $0x1d8] sm:$0xff]  ;;  %v1644_v13 = vld [vmem:[#allocation5 + $0x1c0] sm:$0xff]  ;;  %v1646_v15 = vld [vmem:[#allocation5 + $0x1d0] sm:$0xff] }
 0x1de   :  { %1849 = vmatpush1.bf16.msra.mxu0 %v1604_v32  ;;  %1951 = vmatpush1.bf16.msra.mxu1 %v1606_v14  ;;  %v1653_v16 = vld [vmem:[#allocation5 + $0x208] sm:$0xff]  ;;  %v1655_v60 = vld [vmem:[#allocation5 + $0x218] sm:$0xff]  ;;  %v1652_v17 = vld [vmem:[#allocation5 + $0x200] sm:$0xff] }
 0x1df   :  { %1850 = vmatprep.subr.bf16.mxu0 %v1613_v33  ;;  %1952 = vmatprep.subr.bf16.mxu1 %v1615_v34  ;;  %v1654_v11 = vld [vmem:[#allocation5 + $0x210] sm:$0xff]  ;;  %v1661_v19 = vld [vmem:[#allocation5 + $0x248] sm:$0xff]  ;;  %v1663_v20 = vld [vmem:[#allocation5 + $0x258] sm:$0xff] }
 0x1e0   :  { %v1660_v21 = vld [vmem:[#allocation5 + $0x240] sm:$0xff]  ;;  %v1662_v24 = vld [vmem:[#allocation5 + $0x250] sm:$0xff]  ;;  %v1669_v25 = vld [vmem:[#allocation5 + $0x288] sm:$0xff] }
 0x1e1   :  { %v1671_v10 = vld [vmem:[#allocation5 + $0x298] sm:$0xff]  ;;  %v1668_v29 = vld [vmem:[#allocation5 + $0x280] sm:$0xff]  ;;  %v1670_v40 = vld [vmem:[#allocation5 + $0x290] sm:$0xff] }
 0x1e2   :  { %1851 = vmatpush1.bf16.msra.mxu0 %v1612_v35  ;;  %1953 = vmatpush1.bf16.msra.mxu1 %v1614_v36  ;;  %v1677_v44 = vld [vmem:[#allocation5 + $0x2c8] sm:$0xff]  ;;  %v1679_v30 = vld [vmem:[#allocation5 + $0x2d8] sm:$0xff]  ;;  %v1676_v43 = vld [vmem:[#allocation5 + $0x2c0] sm:$0xff] }
 0x1e3   :  { %1852 = vmatprep.subr.bf16.mxu0 %v1621_v37  ;;  %1954 = vmatprep.subr.bf16.mxu1 %v1623_v38  ;;  %v1678_v48 = vld [vmem:[#allocation5 + $0x2d0] sm:$0xff]  ;;  %v1685_v63 = vld [vmem:[#allocation5 + $0x308] sm:$0xff]  ;;  %v1687_v4 = vld [vmem:[#allocation5 + $0x318] sm:$0xff] }
 0x1e4   :  { %v1684_v31 = vld [vmem:[#allocation5 + $0x300] sm:$0xff]  ;;  %v1686_v3 = vld [vmem:[#allocation5 + $0x310] sm:$0xff]  ;;  %v1693_v32 = vld [vmem:[#allocation5 + $0x348] sm:$0xff] }
 0x1e5   :  { %v1695_v14 = vld [vmem:[#allocation5 + $0x358] sm:$0xff]  ;;  %v1692_v33 = vld [vmem:[#allocation5 + $0x340] sm:$0xff]  ;;  %v1694_v34 = vld [vmem:[#allocation5 + $0x350] sm:$0xff] }
 0x1e6   :  { %1853 = vmatpush1.bf16.msra.mxu0 %v1620_v39  ;;  %1955 = vmatpush1.bf16.msra.mxu1 %v1622_v41  ;;  %v1701_v35 = vld [vmem:[#allocation5 + $0x388] sm:$0xff]  ;;  %v1703_v36 = vld [vmem:[#allocation5 + $0x398] sm:$0xff]  ;;  %v1700_v37 = vld [vmem:[#allocation5 + $0x380] sm:$0xff] }
 0x1e7   :  { %1854 = vmatprep.subr.bf16.mxu0 %v1629_v42  ;;  %1956 = vmatprep.subr.bf16.mxu1 %v1631_v0  ;;  %v1702_v38 = vld [vmem:[#allocation5 + $0x390] sm:$0xff]  ;;  %v1709_v39 = vld [vmem:[#allocation5 + $0x3c8] sm:$0xff]  ;;  %v1711_v41 = vld [vmem:[#allocation5 + $0x3d8] sm:$0xff] }
 0x1e8   :  { %v1708_v42 = vld [vmem:[#allocation5 + $0x3c0] sm:$0xff]  ;;  %v1710_v0 = vld [vmem:[#allocation5 + $0x3d0] sm:$0xff] }
 0x1ea   :  { %1855 = vmatpush1.bf16.msra.mxu0 %v1628_v46  ;;  %1957 = vmatpush1.bf16.msra.mxu1 %v1630_v47  ;;  %v1717_v46 = vld [vmem:[#allocation5 + $0x408] sm:$0xff]  ;;  %v1719_v47 = vld [vmem:[#allocation5 + $0x418] sm:$0xff] }
 0x1eb   :  { %1856 = vmatprep.subr.bf16.mxu0 %v1637_v50  ;;  %1958 = vmatprep.subr.bf16.mxu1 %v1639_v58  ;;  %v5254_v50 = vpack.c.bf16 %v5215_v57, %v5205_v49  ;;  %v1716_v58 = vld [vmem:[#allocation5 + $0x400] sm:$0xff]  ;;  %v1726_v57 = vld [vmem:[#allocation5 + $0x450] sm:$0xff] }
 0x1ec   :  { %v1724_v49 = vld [vmem:[#allocation5 + $0x440] sm:$0xff] }
 0x1ee   :  { %1857 = vmatpush1.bf16.msra.mxu0 %v1636_v2  ;;  %1959 = vmatpush1.bf16.msra.mxu1 %v1638_v5  ;;  %v1718_v2 = vld [vmem:[#allocation5 + $0x410] sm:$0xff]  ;;  %v1725_v5 = vld [vmem:[#allocation5 + $0x448] sm:$0xff] }
 0x1ef   :  { %1858 = vmatprep.subr.bf16.mxu0 %v1645_v6  ;;  %1960 = vmatprep.subr.bf16.mxu1 %v1647_v7  ;;  %v1727_v6 = vld [vmem:[#allocation5 + $0x458] sm:$0xff]  ;;  %v5258_v7 = vpack.c.bf16 %v5240_v18, %v5228_v26  ;;  %v5266_v26 = vpack.c.bf16 %v5237_v27, %v5225_v9  ;;  %v1732_v18 = vld [vmem:[#allocation5 + $0x480] sm:$0xff]  ;;  %v1742_v27 = vld [vmem:[#allocation5 + $0x4d0] sm:$0xff] }
 0x1f0   :  { %v1740_v9 = vld [vmem:[#allocation5 + $0x4c0] sm:$0xff] }
 0x1f2   :  { %1859 = vmatpush1.bf16.msra.mxu0 %v1644_v13  ;;  %1961 = vmatpush1.bf16.msra.mxu1 %v1646_v15  ;;  %v1733_v13 = vld [vmem:[#allocation5 + $0x488] sm:$0xff]  ;;  %v1735_v15 = vld [vmem:[#allocation5 + $0x498] sm:$0xff] }
 0x1f3   :  { %1860 = vmatprep.subr.bf16.mxu0 %v1653_v16  ;;  %1962 = vmatprep.subr.bf16.mxu1 %v1655_v60  ;;  %v1734_v16 = vld [vmem:[#allocation5 + $0x490] sm:$0xff]  ;;  %v1741_v60 = vld [vmem:[#allocation5 + $0x4c8] sm:$0xff] }
 0x1f6   :  { %1861 = vmatpush1.bf16.msra.mxu0 %v1652_v17  ;;  %1963 = vmatpush1.bf16.msra.mxu1 %v1654_v11  ;;  %v1743_v17 = vld [vmem:[#allocation5 + $0x4d8] sm:$0xff]  ;;  %v5270_v11 = vpack.c.bf16 %v5222_v1, %v5212_v53  ;;  %v1748_v53 = vld [vmem:[#allocation5 + $0x500] sm:$0xff]  ;;  %v1750_v1 = vld [vmem:[#allocation5 + $0x510] sm:$0xff] }
 0x1f7   :  { %1862 = vmatprep.subr.bf16.mxu0 %v1661_v19  ;;  %1964 = vmatprep.subr.bf16.mxu1 %v1663_v20  ;;  %v1749_v19 = vld [vmem:[#allocation5 + $0x508] sm:$0xff]  ;;  %v1751_v20 = vld [vmem:[#allocation5 + $0x518] sm:$0xff] }
 0x1fa   :  { %1863 = vmatpush1.bf16.msra.mxu0 %v1660_v21  ;;  %1965 = vmatpush1.bf16.msra.mxu1 %v1662_v24  ;;  %v1757_v21 = vld [vmem:[#allocation5 + $0x548] sm:$0xff]  ;;  %v1759_v24 = vld [vmem:[#allocation5 + $0x558] sm:$0xff] }
 0x1fb   :  { %1864 = vmatprep.subr.bf16.mxu0 %v1669_v25  ;;  %1966 = vmatprep.subr.bf16.mxu1 %v1671_v10  ;;  %v1756_v25 = vld [vmem:[#allocation5 + $0x540] sm:$0xff]  ;;  %v1758_v10 = vld [vmem:[#allocation5 + $0x550] sm:$0xff] }
 0x1fe   :  { %1865 = vmatpush1.bf16.msra.mxu0 %v1668_v29  ;;  %1967 = vmatpush1.bf16.msra.mxu1 %v1670_v40  ;;  %v1765_v29 = vld [vmem:[#allocation5 + $0x588] sm:$0xff]  ;;  %v1767_v40 = vld [vmem:[#allocation5 + $0x598] sm:$0xff] }
 0x1ff   :  { %1866 = vmatprep.subr.bf16.mxu0 %v1677_v44  ;;  %1968 = vmatprep.subr.bf16.mxu1 %v1679_v30  ;;  %v1764_v44 = vld [vmem:[#allocation5 + $0x580] sm:$0xff]  ;;  %v1766_v30 = vld [vmem:[#allocation5 + $0x590] sm:$0xff] }
 0x202   :  { %1867 = vmatpush1.bf16.msra.mxu0 %v1676_v43  ;;  %1969 = vmatpush1.bf16.msra.mxu1 %v1678_v48  ;;  %v1773_v43 = vld [vmem:[#allocation5 + $0x5c8] sm:$0xff]  ;;  %v1775_v48 = vld [vmem:[#allocation5 + $0x5d8] sm:$0xff] }
 0x203   :  { %1868 = vmatprep.subr.bf16.mxu0 %v1685_v63  ;;  %1970 = vmatprep.subr.bf16.mxu1 %v1687_v4  ;;  %v1772_v63 = vld [vmem:[#allocation5 + $0x5c0] sm:$0xff]  ;;  %v1774_v4 = vld [vmem:[#allocation5 + $0x5d0] sm:$0xff] }
 0x206   :  { %1869 = vmatpush1.bf16.msra.mxu0 %v1684_v31  ;;  %1971 = vmatpush1.bf16.msra.mxu1 %v1686_v3  ;;  %v1781_v31 = vld [vmem:[#allocation5 + $0x608] sm:$0xff]  ;;  %v1783_v3 = vld [vmem:[#allocation5 + $0x618] sm:$0xff] }
 0x207   :  { %1870 = vmatprep.subr.bf16.mxu0 %v1693_v32  ;;  %1972 = vmatprep.subr.bf16.mxu1 %v1695_v14  ;;  %v1780_v32 = vld [vmem:[#allocation5 + $0x600] sm:$0xff]  ;;  %v1782_v14 = vld [vmem:[#allocation5 + $0x610] sm:$0xff] }
 0x20a   :  { %1871 = vmatpush1.bf16.msra.mxu0 %v1692_v33  ;;  %1973 = vmatpush1.bf16.msra.mxu1 %v1694_v34  ;;  %v1789_v33 = vld [vmem:[#allocation5 + $0x648] sm:$0xff]  ;;  %v1791_v34 = vld [vmem:[#allocation5 + $0x658] sm:$0xff] }
 0x20b   :  { %1872 = vmatprep.subr.bf16.mxu0 %v1701_v35  ;;  %1974 = vmatprep.subr.bf16.mxu1 %v1703_v36  ;;  %v1788_v35 = vld [vmem:[#allocation5 + $0x640] sm:$0xff]  ;;  %v1790_v36 = vld [vmem:[#allocation5 + $0x650] sm:$0xff] }
 0x20e   :  { %1873 = vmatpush1.bf16.msra.mxu0 %v1700_v37  ;;  %1975 = vmatpush1.bf16.msra.mxu1 %v1702_v38  ;;  %v1797_v37 = vld [vmem:[#allocation5 + $0x688] sm:$0xff]  ;;  %v1799_v38 = vld [vmem:[#allocation5 + $0x698] sm:$0xff] }
 0x20f   :  { %1874 = vmatprep.subr.bf16.mxu0 %v1709_v39  ;;  %1976 = vmatprep.subr.bf16.mxu1 %v1711_v41  ;;  %v1796_v39 = vld [vmem:[#allocation5 + $0x680] sm:$0xff]  ;;  %v1798_v41 = vld [vmem:[#allocation5 + $0x690] sm:$0xff] }
 0x212   :  { %1875 = vmatpush1.bf16.msra.mxu0 %v1708_v42  ;;  %1977 = vmatpush1.bf16.msra.mxu1 %v1710_v0  ;;  %v1805_v42 = vld [vmem:[#allocation5 + $0x6c8] sm:$0xff]  ;;  %v1807_v0 = vld [vmem:[#allocation5 + $0x6d8] sm:$0xff] }
 0x213   :  { %1895 = vmatprep.subr.bf16.mxu0 %v1717_v46  ;;  %1997 = vmatprep.subr.bf16.mxu1 %v1719_v47  ;;  %v1804_v46 = vld [vmem:[#allocation5 + $0x6c0] sm:$0xff]  ;;  %v1806_v47 = vld [vmem:[#allocation5 + $0x6d0] sm:$0xff] }
 0x215   :  { %1877 = vmatmul.mubr.bf16.vlgmr.msra.gmra.mrb[16].mxu0 %v5254_v50  ;;  %1979 = vmatmul.mubr.bf16.vlgmr.msra.gmra.mrb[16].mxu1 %v5254_v50 }
 0x216   :  { %1896 = vmatpush1.bf16.msra.mxu0 %v1716_v58  ;;  %1998 = vmatpush1.bf16.msra.mxu1 %v1718_v2  ;;  %v1813_v58 = vld [vmem:[#allocation5 + $0x708] sm:$0xff]  ;;  %v1815_v2 = vld [vmem:[#allocation5 + $0x718] sm:$0xff] }
 0x217   :  { %1897 = vmatprep.subr.bf16.mxu0 %v1725_v5  ;;  %1999 = vmatprep.subr.bf16.mxu1 %v1727_v6  ;;  %v1812_v5 = vld [vmem:[#allocation5 + $0x700] sm:$0xff]  ;;  %v1814_v6 = vld [vmem:[#allocation5 + $0x710] sm:$0xff] }
 0x218   :  { %1886 = vmatprep.mubr.bf16.mxu0 %v5258_v7  ;;  %1988 = vmatprep.mubr.bf16.mxu1 %v5258_v7 }
 0x21a   :  { %1898 = vmatpush1.bf16.msra.mxu0 %v1724_v49  ;;  %2000 = vmatpush1.bf16.msra.mxu1 %v1726_v57  ;;  %v1821_v49 = vld [vmem:[#allocation5 + $0x748] sm:$0xff]  ;;  %v1823_v57 = vld [vmem:[#allocation5 + $0x758] sm:$0xff] }
 0x21b   :  { %1899 = vmatprep.subr.bf16.mxu0 %v1733_v13  ;;  %2001 = vmatprep.subr.bf16.mxu1 %v1735_v15  ;;  %v1820_v13 = vld [vmem:[#allocation5 + $0x740] sm:$0xff]  ;;  %v1822_v15 = vld [vmem:[#allocation5 + $0x750] sm:$0xff] }
 0x21d   :  { %1887 = vmatmul.mubr.bf16.gmra.mrb[20].mxu0 %v5266_v26  ;;  %1989 = vmatmul.mubr.bf16.gmra.mrb[20].mxu1 %v5266_v26 }
 0x21e   :  { %1900 = vmatpush1.bf16.msra.mxu0 %v1732_v18  ;;  %2002 = vmatpush1.bf16.msra.mxu1 %v1734_v16  ;;  %v1829_v18 = vld [vmem:[#allocation5 + $0x788] sm:$0xff]  ;;  %v1831_v16 = vld [vmem:[#allocation5 + $0x798] sm:$0xff] }
 0x21f   :  { %1901 = vmatprep.subr.bf16.mxu0 %v1741_v60  ;;  %2003 = vmatprep.subr.bf16.mxu1 %v1743_v17  ;;  %v1828_v60 = vld [vmem:[#allocation5 + $0x780] sm:$0xff]  ;;  %v1830_v17 = vld [vmem:[#allocation5 + $0x790] sm:$0xff] }
 0x220   :  { %1927 = vmatprep.mubr.bf16.mxu0 %v5270_v11  ;;  %2029 = vmatprep.mubr.bf16.mxu1 %v5270_v11 }
 0x222   :  { %1902 = vmatpush1.bf16.msra.mxu0 %v1740_v9  ;;  %2004 = vmatpush1.bf16.msra.mxu1 %v1742_v27  ;;  %v1837_v9 = vld [vmem:[#allocation5 + $0x7c8] sm:$0xff]  ;;  %v1839_v27 = vld [vmem:[#allocation5 + $0x7d8] sm:$0xff] }
 0x223   :  { %1903 = vmatprep.subr.bf16.mxu0 %v1749_v19  ;;  %2005 = vmatprep.subr.bf16.mxu1 %v1751_v20  ;;  %v1836_v19 = vld [vmem:[#allocation5 + $0x7c0] sm:$0xff]  ;;  %v1838_v20 = vld [vmem:[#allocation5 + $0x7d0] sm:$0xff] }
 0x226   :  { %1904 = vmatpush1.bf16.msra.mxu0 %v1748_v53  ;;  %2006 = vmatpush1.bf16.msra.mxu1 %v1750_v1  ;;  %v1593_v53 = vld [vmem:[#allocation5 + $0x28] sm:$0xff]  ;;  %v1595_v1 = vld [vmem:[#allocation5 + $0x38] sm:$0xff] }
 0x227   :  { %1905 = vmatprep.subr.bf16.mxu0 %v1757_v21  ;;  %2007 = vmatprep.subr.bf16.mxu1 %v1759_v24  ;;  %v5278_v21 = vpack.c.bf16 %v5219_v61, %v5209_v51  ;;  %v1592_v24 = vld [vmem:[#allocation5 + $0x20] sm:$0xff]  ;;  %v1602_v61 = vld [vmem:[#allocation5 + $0x70] sm:$0xff] }
 0x228   :  { %v1600_v51 = vld [vmem:[#allocation5 + $0x60] sm:$0xff] }
 0x22a   :  { %1906 = vmatpush1.bf16.msra.mxu0 %v1756_v25  ;;  %2008 = vmatpush1.bf16.msra.mxu1 %v1758_v10  ;;  %v1594_v25 = vld [vmem:[#allocation5 + $0x30] sm:$0xff]  ;;  %v1601_v10 = vld [vmem:[#allocation5 + $0x68] sm:$0xff] }
 0x22b   :  { %1907 = vmatprep.subr.bf16.mxu0 %v1765_v29  ;;  %2009 = vmatprep.subr.bf16.mxu1 %v1767_v40  ;;  %v1603_v29 = vld [vmem:[#allocation5 + $0x78] sm:$0xff]  ;;  %v5282_v40 = vpack.c.bf16 %v5246_v22, %v5234_v12  ;;  %v5290_v12 = vpack.c.bf16 %v5243_v23, %v5231_v8  ;;  %v1608_v22 = vld [vmem:[#allocation5 + $0xa0] sm:$0xff]  ;;  %v1625_v8 = vld [vmem:[#allocation5 + $0x128] sm:$0xff] }
 0x22c   :  { %v1627_v23 = vld [vmem:[#allocation5 + $0x138] sm:$0xff] }
 0x22e   :  { %1908 = vmatpush1.bf16.msra.mxu0 %v1764_v44  ;;  %2010 = vmatpush1.bf16.msra.mxu1 %v1766_v30  ;;  %v1609_v44 = vld [vmem:[#allocation5 + $0xa8] sm:$0xff]  ;;  %v1611_v30 = vld [vmem:[#allocation5 + $0xb8] sm:$0xff] }
 0x22f   :  { %1909 = vmatprep.subr.bf16.mxu0 %v1773_v43  ;;  %2011 = vmatprep.subr.bf16.mxu1 %v1775_v48  ;;  %v1610_v43 = vld [vmem:[#allocation5 + $0xb0] sm:$0xff]  ;;  %v1617_v48 = vld [vmem:[#allocation5 + $0xe8] sm:$0xff] }
 0x232   :  { %1910 = vmatpush1.bf16.msra.mxu0 %v1772_v63  ;;  %2012 = vmatpush1.bf16.msra.mxu1 %v1774_v4  ;;  %v1619_v63 = vld [vmem:[#allocation5 + $0xf8] sm:$0xff]  ;;  %v1616_v4 = vld [vmem:[#allocation5 + $0xe0] sm:$0xff] }
 0x233   :  { %1911 = vmatprep.subr.bf16.mxu0 %v1781_v31  ;;  %2013 = vmatprep.subr.bf16.mxu1 %v1783_v3  ;;  %v1618_v31 = vld [vmem:[#allocation5 + $0xf0] sm:$0xff]  ;;  %v1624_v3 = vld [vmem:[#allocation5 + $0x120] sm:$0xff] }
 0x236   :  { %1912 = vmatpush1.bf16.msra.mxu0 %v1780_v32  ;;  %2014 = vmatpush1.bf16.msra.mxu1 %v1782_v14  ;;  %v1626_v32 = vld [vmem:[#allocation5 + $0x130] sm:$0xff]  ;;  %v1633_v14 = vld [vmem:[#allocation5 + $0x168] sm:$0xff] }
 0x237   :  { %1913 = vmatprep.subr.bf16.mxu0 %v1789_v33  ;;  %2015 = vmatprep.subr.bf16.mxu1 %v1791_v34  ;;  %v1635_v33 = vld [vmem:[#allocation5 + $0x178] sm:$0xff]  ;;  %v1632_v34 = vld [vmem:[#allocation5 + $0x160] sm:$0xff] }
 0x23a   :  { %1914 = vmatpush1.bf16.msra.mxu0 %v1788_v35  ;;  %2016 = vmatpush1.bf16.msra.mxu1 %v1790_v36  ;;  %v1634_v35 = vld [vmem:[#allocation5 + $0x170] sm:$0xff]  ;;  %v1641_v36 = vld [vmem:[#allocation5 + $0x1a8] sm:$0xff] }
 0x23b   :  { %1915 = vmatprep.subr.bf16.mxu0 %v1797_v37  ;;  %2017 = vmatprep.subr.bf16.mxu1 %v1799_v38  ;;  %v1643_v37 = vld [vmem:[#allocation5 + $0x1b8] sm:$0xff]  ;;  %v1642_v38 = vld [vmem:[#allocation5 + $0x1b0] sm:$0xff] }
 0x23e   :  { %1916 = vmatpush1.bf16.msra.mxu0 %v1796_v39  ;;  %2018 = vmatpush1.bf16.msra.mxu1 %v1798_v41  ;;  %v1649_v39 = vld [vmem:[#allocation5 + $0x1e8] sm:$0xff]  ;;  %v1651_v41 = vld [vmem:[#allocation5 + $0x1f8] sm:$0xff] }
 0x23f   :  { %1917 = vmatprep.subr.bf16.mxu0 %v1805_v42  ;;  %2019 = vmatprep.subr.bf16.mxu1 %v1807_v0  ;;  %v1648_v42 = vld [vmem:[#allocation5 + $0x1e0] sm:$0xff]  ;;  %v1650_v0 = vld [vmem:[#allocation5 + $0x1f0] sm:$0xff] }
 0x242   :  { %1918 = vmatpush1.bf16.msra.mxu0 %v1804_v46  ;;  %2020 = vmatpush1.bf16.msra.mxu1 %v1806_v47  ;;  %v1657_v46 = vld [vmem:[#allocation5 + $0x228] sm:$0xff]  ;;  %v1659_v47 = vld [vmem:[#allocation5 + $0x238] sm:$0xff] }
 0x243   :  { %1919 = vmatprep.subr.bf16.mxu0 %v1813_v58  ;;  %2021 = vmatprep.subr.bf16.mxu1 %v1815_v2  ;;  %v1656_v58 = vld [vmem:[#allocation5 + $0x220] sm:$0xff]  ;;  %v1658_v2 = vld [vmem:[#allocation5 + $0x230] sm:$0xff] }
 0x246   :  { %1920 = vmatpush1.bf16.msra.mxu0 %v1812_v5  ;;  %2022 = vmatpush1.bf16.msra.mxu1 %v1814_v6  ;;  %v1665_v5 = vld [vmem:[#allocation5 + $0x268] sm:$0xff]  ;;  %v1667_v6 = vld [vmem:[#allocation5 + $0x278] sm:$0xff] }
 0x247   :  { %1921 = vmatprep.subr.bf16.mxu0 %v1821_v49  ;;  %2023 = vmatprep.subr.bf16.mxu1 %v1823_v57  ;;  %v1664_v49 = vld [vmem:[#allocation5 + $0x260] sm:$0xff]  ;;  %v1666_v57 = vld [vmem:[#allocation5 + $0x270] sm:$0xff] }
 0x24a   :  { %1922 = vmatpush1.bf16.msra.mxu0 %v1820_v13  ;;  %2024 = vmatpush1.bf16.msra.mxu1 %v1822_v15  ;;  %v1673_v13 = vld [vmem:[#allocation5 + $0x2a8] sm:$0xff]  ;;  %v1675_v15 = vld [vmem:[#allocation5 + $0x2b8] sm:$0xff] }
 0x24b   :  { %1923 = vmatprep.subr.bf16.mxu0 %v1829_v18  ;;  %2025 = vmatprep.subr.bf16.mxu1 %v1831_v16  ;;  %v1672_v18 = vld [vmem:[#allocation5 + $0x2a0] sm:$0xff]  ;;  %v1674_v16 = vld [vmem:[#allocation5 + $0x2b0] sm:$0xff] }
 0x24e   :  { %1924 = vmatpush1.bf16.msra.mxu0 %v1828_v60  ;;  %2026 = vmatpush1.bf16.msra.mxu1 %v1830_v17  ;;  %v1681_v60 = vld [vmem:[#allocation5 + $0x2e8] sm:$0xff]  ;;  %v1683_v17 = vld [vmem:[#allocation5 + $0x2f8] sm:$0xff] }
 0x24f   :  { %1925 = vmatprep.subr.bf16.mxu0 %v1837_v9  ;;  %2027 = vmatprep.subr.bf16.mxu1 %v1839_v27  ;;  %v1680_v9 = vld [vmem:[#allocation5 + $0x2e0] sm:$0xff]  ;;  %v1682_v27 = vld [vmem:[#allocation5 + $0x2f0] sm:$0xff] }
 0x252   :  { %1926 = vmatpush1.bf16.msra.mxu0 %v1836_v19  ;;  %2028 = vmatpush1.bf16.msra.mxu1 %v1838_v20  ;;  %v1689_v19 = vld [vmem:[#allocation5 + $0x328] sm:$0xff]  ;;  %v1691_v20 = vld [vmem:[#allocation5 + $0x338] sm:$0xff] }
 0x253   :  { %2048 = vmatprep.subr.bf16.mxu0 %v1593_v53  ;;  %2150 = vmatprep.subr.bf16.mxu1 %v1595_v1  ;;  %v1688_v53 = vld [vmem:[#allocation5 + $0x320] sm:$0xff]  ;;  %v1690_v1 = vld [vmem:[#allocation5 + $0x330] sm:$0xff] }
 0x255   :  { %1928 = vmatmul.mubr.bf16.vlgmr.msra.gmra.mrb[16].mxu0 %v5278_v21  ;;  %2030 = vmatmul.mubr.bf16.vlgmr.msra.gmra.mrb[16].mxu1 %v5278_v21 }
 0x256   :  { %2049 = vmatpush1.bf16.msra.mxu0 %v1592_v24  ;;  %2151 = vmatpush1.bf16.msra.mxu1 %v1594_v25  ;;  %v1697_v24 = vld [vmem:[#allocation5 + $0x368] sm:$0xff]  ;;  %v1699_v25 = vld [vmem:[#allocation5 + $0x378] sm:$0xff] }
 0x257   :  { %2050 = vmatprep.subr.bf16.mxu0 %v1601_v10  ;;  %2152 = vmatprep.subr.bf16.mxu1 %v1603_v29  ;;  %v1696_v10 = vld [vmem:[#allocation5 + $0x360] sm:$0xff]  ;;  %v1698_v29 = vld [vmem:[#allocation5 + $0x370] sm:$0xff] }
 0x258   :  { %1937 = vmatprep.mubr.bf16.mxu0 %v5282_v40  ;;  %2039 = vmatprep.mubr.bf16.mxu1 %v5282_v40 }
 0x25a   :  { %2051 = vmatpush1.bf16.msra.mxu0 %v1600_v51  ;;  %2153 = vmatpush1.bf16.msra.mxu1 %v1602_v61  ;;  %v1705_v51 = vld [vmem:[#allocation5 + $0x3a8] sm:$0xff]  ;;  %v1707_v61 = vld [vmem:[#allocation5 + $0x3b8] sm:$0xff] }
 0x25b   :  { %2052 = vmatprep.subr.bf16.mxu0 %v1609_v44  ;;  %2154 = vmatprep.subr.bf16.mxu1 %v1611_v30  ;;  %v1704_v44 = vld [vmem:[#allocation5 + $0x3a0] sm:$0xff]  ;;  %v1706_v30 = vld [vmem:[#allocation5 + $0x3b0] sm:$0xff] }
 0x25d   :  { %1938 = vmatmul.mubr.bf16.gmra.mrb[20].mxu0 %v5290_v12  ;;  %2040 = vmatmul.mubr.bf16.gmra.mrb[20].mxu1 %v5290_v12 }
 0x25e   :  { %2053 = vmatpush1.bf16.msra.mxu0 %v1608_v22  ;;  %2155 = vmatpush1.bf16.msra.mxu1 %v1610_v43  ;;  %v1713_v22 = vld [vmem:[#allocation5 + $0x3e8] sm:$0xff]  ;;  %v1715_v43 = vld [vmem:[#allocation5 + $0x3f8] sm:$0xff] }
 0x25f   :  { %2054 = vmatprep.subr.bf16.mxu0 %v1617_v48  ;;  %2156 = vmatprep.subr.bf16.mxu1 %v1619_v63  ;;  %v1712_v48 = vld [vmem:[#allocation5 + $0x3e0] sm:$0xff]  ;;  %v1714_v63 = vld [vmem:[#allocation5 + $0x3f0] sm:$0xff] }
 0x260   :  { %2080 = vmatprep.mubr.bf16.mxu0 %v5248_v28  ;;  %2182 = vmatprep.mubr.bf16.mxu1 %v5248_v28  ;;  %v1640_v28 = vld [vmem:[#allocation5 + $0x1a0] sm:$0xff] }
 0x262   :  { %2055 = vmatpush1.bf16.msra.mxu0 %v1616_v4  ;;  %2157 = vmatpush1.bf16.msra.mxu1 %v1618_v31  ;;  %v1721_v4 = vld [vmem:[#allocation5 + $0x428] sm:$0xff]  ;;  %v1723_v31 = vld [vmem:[#allocation5 + $0x438] sm:$0xff] }
 0x263   :  { %2056 = vmatprep.subr.bf16.mxu0 %v1625_v8  ;;  %2158 = vmatprep.subr.bf16.mxu1 %v1627_v23  ;;  %v1720_v8 = vld [vmem:[#allocation5 + $0x420] sm:$0xff]  ;;  %v1722_v23 = vld [vmem:[#allocation5 + $0x430] sm:$0xff] }
 0x266   :  { %2057 = vmatpush1.bf16.msra.mxu0 %v1624_v3  ;;  %2159 = vmatpush1.bf16.msra.mxu1 %v1626_v32  ;;  %v1729_v3 = vld [vmem:[#allocation5 + $0x468] sm:$0xff]  ;;  %v1731_v32 = vld [vmem:[#allocation5 + $0x478] sm:$0xff] }
 0x267   :  { %2058 = vmatprep.subr.bf16.mxu0 %v1633_v14  ;;  %2160 = vmatprep.subr.bf16.mxu1 %v1635_v33  ;;  %v1728_v14 = vld [vmem:[#allocation5 + $0x460] sm:$0xff]  ;;  %v1730_v33 = vld [vmem:[#allocation5 + $0x470] sm:$0xff] }
 0x26a   :  { %2059 = vmatpush1.bf16.msra.mxu0 %v1632_v34  ;;  %2161 = vmatpush1.bf16.msra.mxu1 %v1634_v35  ;;  %v1737_v34 = vld [vmem:[#allocation5 + $0x4a8] sm:$0xff]  ;;  %v1739_v35 = vld [vmem:[#allocation5 + $0x4b8] sm:$0xff] }
 0x26b   :  { %2060 = vmatprep.subr.bf16.mxu0 %v1641_v36  ;;  %2162 = vmatprep.subr.bf16.mxu1 %v1643_v37  ;;  %v1736_v36 = vld [vmem:[#allocation5 + $0x4a0] sm:$0xff]  ;;  %v1738_v37 = vld [vmem:[#allocation5 + $0x4b0] sm:$0xff] }
 0x26e   :  { %2061 = vmatpush1.bf16.msra.mxu0 %v1640_v28  ;;  %2163 = vmatpush1.bf16.msra.mxu1 %v1642_v38  ;;  %v1745_v28 = vld [vmem:[#allocation5 + $0x4e8] sm:$0xff]  ;;  %v1744_v38 = vld [vmem:[#allocation5 + $0x4e0] sm:$0xff] }
 0x26f   :  { %2062 = vmatprep.subr.bf16.mxu0 %v1649_v39  ;;  %2164 = vmatprep.subr.bf16.mxu1 %v1651_v41  ;;  %v1746_v39 = vld [vmem:[#allocation5 + $0x4f0] sm:$0xff]  ;;  %v1753_v41 = vld [vmem:[#allocation5 + $0x528] sm:$0xff] }
 0x272   :  { %2063 = vmatpush1.bf16.msra.mxu0 %v1648_v42  ;;  %2165 = vmatpush1.bf16.msra.mxu1 %v1650_v0  ;;  %v1752_v42 = vld [vmem:[#allocation5 + $0x520] sm:$0xff]  ;;  %v1754_v0 = vld [vmem:[#allocation5 + $0x530] sm:$0xff] }
 0x273   :  { %2064 = vmatprep.subr.bf16.mxu0 %v1657_v46  ;;  %2166 = vmatprep.subr.bf16.mxu1 %v1659_v47  ;;  %v1761_v46 = vld [vmem:[#allocation5 + $0x568] sm:$0xff]  ;;  %v1760_v47 = vld [vmem:[#allocation5 + $0x560] sm:$0xff] }
 0x276   :  { %2065 = vmatpush1.bf16.msra.mxu0 %v1656_v58  ;;  %2167 = vmatpush1.bf16.msra.mxu1 %v1658_v2  ;;  %v1762_v58 = vld [vmem:[#allocation5 + $0x570] sm:$0xff]  ;;  %v1769_v2 = vld [vmem:[#allocation5 + $0x5a8] sm:$0xff] }
 0x277   :  { %2066 = vmatprep.subr.bf16.mxu0 %v1665_v5  ;;  %2168 = vmatprep.subr.bf16.mxu1 %v1667_v6  ;;  %v1771_v5 = vld [vmem:[#allocation5 + $0x5b8] sm:$0xff]  ;;  %v1770_v6 = vld [vmem:[#allocation5 + $0x5b0] sm:$0xff] }
 0x27a   :  { %2067 = vmatpush1.bf16.msra.mxu0 %v1664_v49  ;;  %2169 = vmatpush1.bf16.msra.mxu1 %v1666_v57  ;;  %v1777_v49 = vld [vmem:[#allocation5 + $0x5e8] sm:$0xff]  ;;  %v1779_v57 = vld [vmem:[#allocation5 + $0x5f8] sm:$0xff] }
 0x27b   :  { %2068 = vmatprep.subr.bf16.mxu0 %v1673_v13  ;;  %2170 = vmatprep.subr.bf16.mxu1 %v1675_v15  ;;  %v1776_v13 = vld [vmem:[#allocation5 + $0x5e0] sm:$0xff]  ;;  %v1778_v15 = vld [vmem:[#allocation5 + $0x5f0] sm:$0xff] }
 0x27e   :  { %2069 = vmatpush1.bf16.msra.mxu0 %v1672_v18  ;;  %2171 = vmatpush1.bf16.msra.mxu1 %v1674_v16  ;;  %v1785_v18 = vld [vmem:[#allocation5 + $0x628] sm:$0xff]  ;;  %v1787_v16 = vld [vmem:[#allocation5 + $0x638] sm:$0xff] }
 0x27f   :  { %2070 = vmatprep.subr.bf16.mxu0 %v1681_v60  ;;  %2172 = vmatprep.subr.bf16.mxu1 %v1683_v17  ;;  %v1784_v60 = vld [vmem:[#allocation5 + $0x620] sm:$0xff]  ;;  %v1786_v17 = vld [vmem:[#allocation5 + $0x630] sm:$0xff] }
 0x282   :  { %2071 = vmatpush1.bf16.msra.mxu0 %v1680_v9  ;;  %2173 = vmatpush1.bf16.msra.mxu1 %v1682_v27  ;;  %v1793_v9 = vld [vmem:[#allocation5 + $0x668] sm:$0xff]  ;;  %v1795_v27 = vld [vmem:[#allocation5 + $0x678] sm:$0xff] }
 0x283   :  { %2072 = vmatprep.subr.bf16.mxu0 %v1689_v19  ;;  %2174 = vmatprep.subr.bf16.mxu1 %v1691_v20  ;;  %v1792_v19 = vld [vmem:[#allocation5 + $0x660] sm:$0xff]  ;;  %v1794_v20 = vld [vmem:[#allocation5 + $0x670] sm:$0xff] }
 0x286   :  { %2073 = vmatpush1.bf16.msra.mxu0 %v1688_v53  ;;  %2175 = vmatpush1.bf16.msra.mxu1 %v1690_v1  ;;  %v1801_v53 = vld [vmem:[#allocation5 + $0x6a8] sm:$0xff]  ;;  %v1803_v1 = vld [vmem:[#allocation5 + $0x6b8] sm:$0xff] }
 0x287   :  { %2074 = vmatprep.subr.bf16.mxu0 %v1697_v24  ;;  %2176 = vmatprep.subr.bf16.mxu1 %v1699_v25  ;;  %v1800_v24 = vld [vmem:[#allocation5 + $0x6a0] sm:$0xff]  ;;  %v1802_v25 = vld [vmem:[#allocation5 + $0x6b0] sm:$0xff] }
 0x28a   :  { %2075 = vmatpush1.bf16.msra.mxu0 %v1696_v10  ;;  %2177 = vmatpush1.bf16.msra.mxu1 %v1698_v29  ;;  %v1809_v10 = vld [vmem:[#allocation5 + $0x6e8] sm:$0xff]  ;;  %v1811_v29 = vld [vmem:[#allocation5 + $0x6f8] sm:$0xff] }
 0x28b   :  { %2076 = vmatprep.subr.bf16.mxu0 %v1705_v51  ;;  %2178 = vmatprep.subr.bf16.mxu1 %v1707_v61  ;;  %v1808_v51 = vld [vmem:[#allocation5 + $0x6e0] sm:$0xff]  ;;  %v1810_v61 = vld [vmem:[#allocation5 + $0x6f0] sm:$0xff] }
 0x28e   :  { %2077 = vmatpush1.bf16.msra.mxu0 %v1704_v44  ;;  %2179 = vmatpush1.bf16.msra.mxu1 %v1706_v30  ;;  %v1817_v44 = vld [vmem:[#allocation5 + $0x728] sm:$0xff]  ;;  %v1819_v30 = vld [vmem:[#allocation5 + $0x738] sm:$0xff] }
 0x28f   :  { %2078 = vmatprep.subr.bf16.mxu0 %v1713_v22  ;;  %2180 = vmatprep.subr.bf16.mxu1 %v1715_v43  ;;  %v1816_v22 = vld [vmem:[#allocation5 + $0x720] sm:$0xff]  ;;  %v1818_v43 = vld [vmem:[#allocation5 + $0x730] sm:$0xff] }
 0x292   :  { %2079 = vmatpush1.bf16.msra.mxu0 %v1712_v48  ;;  %2181 = vmatpush1.bf16.msra.mxu1 %v1714_v63  ;;  %v1825_v48 = vld [vmem:[#allocation5 + $0x768] sm:$0xff]  ;;  %v1827_v63 = vld [vmem:[#allocation5 + $0x778] sm:$0xff] }
 0x293   :  { %2099 = vmatprep.subr.bf16.mxu0 %v1721_v4  ;;  %2201 = vmatprep.subr.bf16.mxu1 %v1723_v31  ;;  %v1824_v4 = vld [vmem:[#allocation5 + $0x760] sm:$0xff]  ;;  %v1826_v31 = vld [vmem:[#allocation5 + $0x770] sm:$0xff] }
 0x295   :  { %2081 = vmatmul.mubr.bf16.vlgmr.msra.gmra.mrb[24].mxu0 %v5254_v50  ;;  %2183 = vmatmul.mubr.bf16.vlgmr.msra.gmra.mrb[24].mxu1 %v5254_v50  ;;  %v1747_v50 = vld [vmem:[#allocation5 + $0x4f8] sm:$0xff] }
 0x296   :  { %2100 = vmatpush1.bf16.msra.mxu0 %v1720_v8  ;;  %2202 = vmatpush1.bf16.msra.mxu1 %v1722_v23  ;;  %v1833_v8 = vld [vmem:[#allocation5 + $0x7a8] sm:$0xff]  ;;  %v1835_v23 = vld [vmem:[#allocation5 + $0x7b8] sm:$0xff] }
 0x297   :  { %2101 = vmatprep.subr.bf16.mxu0 %v1729_v3  ;;  %2203 = vmatprep.subr.bf16.mxu1 %v1731_v32  ;;  %v1832_v3 = vld [vmem:[#allocation5 + $0x7a0] sm:$0xff]  ;;  %v1834_v32 = vld [vmem:[#allocation5 + $0x7b0] sm:$0xff] }
 0x298   :  { %2088 = vmatprep.mubr.bf16.mxu0 %v5258_v7  ;;  %2190 = vmatprep.mubr.bf16.mxu1 %v5258_v7  ;;  %v1755_v7 = vld [vmem:[#allocation5 + $0x538] sm:$0xff] }
 0x29a   :  { %2102 = vmatpush1.bf16.msra.mxu0 %v1728_v14  ;;  %2204 = vmatpush1.bf16.msra.mxu1 %v1730_v33  ;;  %v1841_v14 = vld [vmem:[#allocation5 + $0x7e8] sm:$0xff]  ;;  %v1843_v33 = vld [vmem:[#allocation5 + $0x7f8] sm:$0xff] }
 0x29b   :  { %2103 = vmatprep.subr.bf16.mxu0 %v1737_v34  ;;  %2205 = vmatprep.subr.bf16.mxu1 %v1739_v35  ;;  %v1840_v34 = vld [vmem:[#allocation5 + $0x7e0] sm:$0xff]  ;;  %v1842_v35 = vld [vmem:[#allocation5 + $0x7f0] sm:$0xff] }
 0x29d   :  { %2089 = vmatmul.mubr.bf16.gmra.mrb[28].mxu0 %v5266_v26  ;;  %2191 = vmatmul.mubr.bf16.gmra.mrb[28].mxu1 %v5266_v26  ;;  %v1763_v26 = vld [vmem:[#allocation5 + $0x578] sm:$0xff] }
 0x29e   :  { %2104 = vmatpush1.bf16.msra.mxu0 %v1736_v36  ;;  %2206 = vmatpush1.bf16.msra.mxu1 %v1738_v37 }
 0x29f   :  { %2105 = vmatprep.subr.bf16.mxu0 %v1745_v28  ;;  %2207 = vmatprep.subr.bf16.mxu1 %v1747_v50 }
 0x2a0   :  { %2131 = vmatprep.mubr.bf16.mxu0 %v5270_v11  ;;  %2233 = vmatprep.mubr.bf16.mxu1 %v5270_v11  ;;  %v1768_v11 = vld [vmem:[#allocation5 + $0x5a0] sm:$0xff] }
 0x2a2   :  { %2106 = vmatpush1.bf16.msra.mxu0 %v1744_v38  ;;  %2208 = vmatpush1.bf16.msra.mxu1 %v1746_v39 }
 0x2a3   :  { %2107 = vmatprep.subr.bf16.mxu0 %v1753_v41  ;;  %2209 = vmatprep.subr.bf16.mxu1 %v1755_v7 }
 0x2a6   :  { %2108 = vmatpush1.bf16.msra.mxu0 %v1752_v42  ;;  %2210 = vmatpush1.bf16.msra.mxu1 %v1754_v0 }
 0x2a7   :  { %2109 = vmatprep.subr.bf16.mxu0 %v1761_v46  ;;  %2211 = vmatprep.subr.bf16.mxu1 %v1763_v26 }
 0x2aa   :  { %2110 = vmatpush1.bf16.msra.mxu0 %v1760_v47  ;;  %2212 = vmatpush1.bf16.msra.mxu1 %v1762_v58 }
 0x2ab   :  { %2111 = vmatprep.subr.bf16.mxu0 %v1769_v2  ;;  %2213 = vmatprep.subr.bf16.mxu1 %v1771_v5 }
 0x2ae   :  { %2112 = vmatpush1.bf16.msra.mxu0 %v1768_v11  ;;  %2214 = vmatpush1.bf16.msra.mxu1 %v1770_v6 }
 0x2af   :  { %2113 = vmatprep.subr.bf16.mxu0 %v1777_v49  ;;  %2215 = vmatprep.subr.bf16.mxu1 %v1779_v57 }
 0x2b2   :  { %2114 = vmatpush1.bf16.msra.mxu0 %v1776_v13  ;;  %2216 = vmatpush1.bf16.msra.mxu1 %v1778_v15 }
 0x2b3   :  { %2115 = vmatprep.subr.bf16.mxu0 %v1785_v18  ;;  %2217 = vmatprep.subr.bf16.mxu1 %v1787_v16 }
 0x2b6   :  { %2116 = vmatpush1.bf16.msra.mxu0 %v1784_v60  ;;  %2218 = vmatpush1.bf16.msra.mxu1 %v1786_v17 }
 0x2b7   :  { %2117 = vmatprep.subr.bf16.mxu0 %v1793_v9  ;;  %2219 = vmatprep.subr.bf16.mxu1 %v1795_v27 }
 0x2ba   :  { %2118 = vmatpush1.bf16.msra.mxu0 %v1792_v19  ;;  %2220 = vmatpush1.bf16.msra.mxu1 %v1794_v20 }
 0x2bb   :  { %2119 = vmatprep.subr.bf16.mxu0 %v1801_v53  ;;  %2221 = vmatprep.subr.bf16.mxu1 %v1803_v1 }
 0x2be   :  { %2120 = vmatpush1.bf16.msra.mxu0 %v1800_v24  ;;  %2222 = vmatpush1.bf16.msra.mxu1 %v1802_v25 }
 0x2bf   :  { %2121 = vmatprep.subr.bf16.mxu0 %v1809_v10  ;;  %2223 = vmatprep.subr.bf16.mxu1 %v1811_v29 }
 0x2c2   :  { %2122 = vmatpush1.bf16.msra.mxu0 %v1808_v51  ;;  %2224 = vmatpush1.bf16.msra.mxu1 %v1810_v61 }
 0x2c3   :  { %2123 = vmatprep.subr.bf16.mxu0 %v1817_v44  ;;  %2225 = vmatprep.subr.bf16.mxu1 %v1819_v30 }
 0x2c6   :  { %2124 = vmatpush1.bf16.msra.mxu0 %v1816_v22  ;;  %2226 = vmatpush1.bf16.msra.mxu1 %v1818_v43 }
 0x2c7   :  { %2125 = vmatprep.subr.bf16.mxu0 %v1825_v48  ;;  %2227 = vmatprep.subr.bf16.mxu1 %v1827_v63 }
 0x2ca   :  { %2126 = vmatpush1.bf16.msra.mxu0 %v1824_v4  ;;  %2228 = vmatpush1.bf16.msra.mxu1 %v1826_v31 }
 0x2cb   :  { %2127 = vmatprep.subr.bf16.mxu0 %v1833_v8  ;;  %2229 = vmatprep.subr.bf16.mxu1 %v1835_v23 }
 0x2ce   :  { %2128 = vmatpush1.bf16.msra.mxu0 %v1832_v3  ;;  %2230 = vmatpush1.bf16.msra.mxu1 %v1834_v32 }
 0x2cf   :  { %2129 = vmatprep.subr.bf16.mxu0 %v1841_v14  ;;  %2231 = vmatprep.subr.bf16.mxu1 %v1843_v33 }
 0x2d2   :  { %2130 = vmatpush1.bf16.msra.mxu0 %v1840_v34  ;;  %2232 = vmatpush1.bf16.msra.mxu1 %v1842_v35 }
 0x2d5   :  { %2132 = vmatmul.mubr.bf16.vlgmr.msra.gmra.mrb[24].mxu0 %v5278_v21  ;;  %2234 = vmatmul.mubr.bf16.vlgmr.msra.gmra.mrb[24].mxu1 %v5278_v21 }
 0x2d6   :  { %2139 = vmatprep.mubr.bf16.mxu0 %v5282_v40  ;;  %2241 = vmatprep.mubr.bf16.mxu1 %v5282_v40 }
 0x2dd   :  { %2140 = vmatmul.mubr.bf16.gmra.mrb[28].mxu0 %v5290_v12  ;;  %2242 = vmatmul.mubr.bf16.gmra.mrb[28].mxu1 %v5290_v12 }
 0x328   :  { %v5310_v36 = vpop.f32.mrb[16].mxu0  ;;  %v5312_v37 = vpop.f32.mrb[16].mxu1 }
 0x329   :  { %v5314_v28 = vpop.f32.mrb[17].mxu0  ;;  %v5316_v50 = vpop.f32.mrb[17].mxu1  ;;  %v2284_v5 = vmul.f32 %v5310_v36, %v5310_v36  ;;  %v2286_v11 = vmul.f32 %v5312_v37, %v5312_v37 }
 0x32a   :  { %v5318_v38 = vpop.f32.mrb[18].mxu0  ;;  %v5320_v39 = vpop.f32.mrb[18].mxu1  ;;  %v2285_v6 = vmul.f32 %v5314_v28, %v5314_v28  ;;  %v2287_v49 = vmul.f32 %v5316_v50, %v5316_v50 }
 0x32b   :  { %v5322_v21 = vpop.f32.mrb[19].mxu0  ;;  %v5324_v41 = vpop.f32.mrb[19].mxu1  ;;  %v2316_v15 = vmul.f32 %v5318_v38, %v5318_v38  ;;  %v2318_v18 = vmul.f32 %v5320_v39, %v5320_v39 }
 0x32c   :  { %v2317_v16 = vmul.f32 %v5322_v21, %v5322_v21  ;;  %v2319_v60 = vmul.f32 %v5324_v41, %v5324_v41 }
 0x330   :  { %v5326_v40 = vpop.f32.mrb[20].mxu0  ;;  %v5328_v7 = vpop.f32.mrb[20].mxu1 }
 0x331   :  { %v5330_v12 = vpop.f32.mrb[21].mxu0  ;;  %v5332_v42 = vpop.f32.mrb[21].mxu1  ;;  %v2348_v31 = vmul.f32 %v5326_v40, %v5326_v40  ;;  %v2350_v8 = vmul.f32 %v5328_v7, %v5328_v7 }
 0x332   :  { %v1943_v0 = vpop.f32.mrb[22].mxu0  ;;  %v2045_v46 = vpop.f32.mrb[22].mxu1  ;;  %v2349_v32 = vmul.f32 %v5330_v12, %v5330_v12  ;;  %v2351_v14 = vmul.f32 %v5332_v42, %v5332_v42 }
 0x333   :  { %v1944_v26 = vpop.f32.mrb[23].mxu0  ;;  %v2046_v47 = vpop.f32.mrb[23].mxu1 }
 0x3a8   :  { %v2133_v58 = vpop.f32.mrb[24].mxu0  ;;  %v2235_v2 = vpop.f32.mrb[24].mxu1 }
 0x3a9   :  { %v2134_v57 = vpop.f32.mrb[25].mxu0  ;;  %v2236_v13 = vpop.f32.mrb[25].mxu1 }
 0x3aa   :  { %v5350_v17 = vpop.f32.mrb[26].mxu0  ;;  %v5352_v9 = vpop.f32.mrb[26].mxu1 }
 0x3ab   :  { %v2296_v27 = vadd.f32 %v5350_v17, %v5310_v36  ;;  %v2300_v19 = vmul.f32 %v5350_v17, %v5350_v17  ;;  %v2298_v20 = vadd.f32 %v5352_v9, %v5312_v37  ;;  %v2302_v53 = vmul.f32 %v5352_v9, %v5352_v9  ;;  %v5362_v1 = vpop.f32.mrb[27].mxu0  ;;  %v5364_v24 = vpop.f32.mrb[27].mxu1 }
 0x3ac   :  { %v2297_v25 = vadd.f32 %v5362_v1, %v5314_v28  ;;  %v2301_v10 = vmul.f32 %v5362_v1, %v5362_v1  ;;  %v2299_v29 = vadd.f32 %v5364_v24, %v5316_v50  ;;  %v2303_v51 = vmul.f32 %v5364_v24, %v5364_v24 }
 0x3ad   :  { %v2304_v61 = vadd.f32 %v2300_v19, %v2284_v5  ;;  %v2306_v44 = vadd.f32 %v2302_v53, %v2286_v11  ;;  %v2312_v30 = vadd.f32 %v2296_v27, %v5318_v38  ;;  %v2314_v22 = vadd.f32 %v2298_v20, %v5320_v39 }
 0x3ae   :  { %v2305_v43 = vadd.f32 %v2301_v10, %v2285_v6  ;;  %v2307_v48 = vadd.f32 %v2303_v51, %v2287_v49  ;;  %v2313_v63 = vadd.f32 %v2297_v25, %v5322_v21  ;;  %v2315_v4 = vadd.f32 %v2299_v29, %v5324_v41 }
 0x3af   :  { %v2320_v23 = vadd.f32 %v2316_v15, %v2304_v61  ;;  %v2322_v3 = vadd.f32 %v2318_v18, %v2306_v44 }
 0x3b0   :  { %v5386_v33 = vpop.f32.mrb[28].mxu0  ;;  %v5388_v34 = vpop.f32.mrb[28].mxu1  ;;  %v2321_v35 = vadd.f32 %v2317_v16, %v2305_v43  ;;  %v2323_v0 = vadd.f32 %v2319_v60, %v2307_v48 }
 0x3b1   :  { %v2328_v46 = vadd.f32 %v2312_v30, %v5386_v33  ;;  %v2332_v26 = vmul.f32 %v5386_v33, %v5386_v33  ;;  %v2330_v47 = vadd.f32 %v2314_v22, %v5388_v34  ;;  %v2334_v58 = vmul.f32 %v5388_v34, %v5388_v34  ;;  %v5396_v2 = vpop.f32.mrb[29].mxu0  ;;  %v5398_v5 = vpop.f32.mrb[29].mxu1 }
 0x3b2   :  { %v2329_v11 = vadd.f32 %v2313_v63, %v5396_v2  ;;  %v2333_v6 = vmul.f32 %v5396_v2, %v5396_v2  ;;  %v2331_v49 = vadd.f32 %v2315_v4, %v5398_v5  ;;  %v2335_v57 = vmul.f32 %v5398_v5, %v5398_v5  ;;  %v5406_v13 = vpop.f32.mrb[30].mxu0  ;;  %v5408_v15 = vpop.f32.mrb[30].mxu1 }
 0x3b3   :  { %v2336_v18 = vadd.f32 %v2332_v26, %v2320_v23  ;;  %v2338_v16 = vadd.f32 %v2334_v58, %v2322_v3  ;;  %v2364_v60 = vmul.f32 %v5406_v13, %v5406_v13  ;;  %v2366_v27 = vmul.f32 %v5408_v15, %v5408_v15  ;;  %v5414_v19 = vpop.f32.mrb[31].mxu0  ;;  %v5416_v20 = vpop.f32.mrb[31].mxu1 }
 0x3b4   :  { %v2337_v53 = vadd.f32 %v2333_v6, %v2321_v35  ;;  %v2339_v25 = vadd.f32 %v2335_v57, %v2323_v0  ;;  %v2345_v10 = vadd.f32 %v2329_v11, %v5330_v12  ;;  %v2365_v29 = vmul.f32 %v5414_v19, %v5414_v19 }
 0x3b5   :  { %v2347_v51 = vadd.f32 %v2331_v49, %v5332_v42  ;;  %v2367_v61 = vmul.f32 %v5416_v20, %v5416_v20  ;;  %v2346_v44 = vadd.f32 %v2330_v47, %v5328_v7  ;;  %v2344_v30 = vadd.f32 %v2328_v46, %v5326_v40 }
 0x3b6   :  { %v2361_v22 = vadd.f32 %v2345_v10, %v5414_v19  ;;  %v2353_v43 = vadd.f32 %v2349_v32, %v2337_v53  ;;  %v2352_v48 = vadd.f32 %v2348_v31, %v2336_v18  ;;  %v2355_v63 = vadd.f32 %v2351_v14, %v2339_v25 }
 0x3b7   :  { %v2363_v4 = vadd.f32 %v2347_v51, %v5416_v20  ;;  %v2362_v23 = vadd.f32 %v2346_v44, %v5408_v15  ;;  %v2360_v3 = vadd.f32 %v2344_v30, %v5406_v13  ;;  %v2354_v35 = vadd.f32 %v2350_v8, %v2338_v16 }
 0x3b8   :  { %v2369_v0 = vadd.f32 %v2365_v29, %v2353_v43  ;;  %v2368_v26 = vadd.f32 %v2364_v60, %v2352_v48  ;;  %v2371_v58 = vadd.f32 %v2367_v61, %v2355_v63  ;;  %v2373_v32 = vmul.f32 %v5124_v62, %v2361_v22 }
 0x3b9   :  { %v2374_v11 = vmul.f32 %v5124_v62, %v2362_v23  ;;  %v2372_v47 = vmul.f32 %v5124_v62, %v2360_v3  ;;  %v2370_v46 = vadd.f32 %v2366_v27, %v2354_v35  ;;  %v2375_v31 = vmul.f32 %v5124_v62, %v2363_v4 }
 0x3ba   :  { %v2402_v8 = vmul.f32 %v5124_v62, %v2369_v0  ;;  %v2401_v14 = vmul.f32 %v5124_v62, %v2368_v26  ;;  %v2404_v6 = vmul.f32 %v5124_v62, %v2371_v58  ;;  %v5447_v57 = vand.u32 127, %v129_v59 }
 0x3bb   :  { %2380 = vrot.lane.b32.xlu1 %v2374_v11, %s4921_s28  ;;  %2376 = vrot.lane.b32.xlu0 %v2372_v47, %s4921_s28  ;;  %v2403_v49 = vmul.f32 %v5124_v62, %v2370_v46 }
 0x3bc   :  { %vm2386_vm1 = vcmp.lt.s32.totalorder %v5447_v57, 64 }
 0x3bf   :  { %2382 = vrot.lane.b32.xlu1 %v2375_v31, %s4921_s28  ;;  %2378 = vrot.lane.b32.xlu0 %v2373_v32, %s4921_s28 }
 0x3c3   :  { %2407 = vrot.lane.b32.xlu1 %v2402_v8, %s4921_s28  ;;  %2405 = vrot.lane.b32.xlu0 %v2401_v14, %s4921_s28 }
 0x3c7   :  { %2411 = vrot.lane.b32.xlu1 %v2404_v6, %s4921_s28  ;;  %2409 = vrot.lane.b32.xlu0 %v2403_v49, %s4921_s28 }
 0x42d   :  { %v2381_v18 = vpop.permute.xlu1 %2380  ;;  %v2377_v16 = vpop.permute.xlu0 %2376 }
 0x431   :  { %v2383_v60 = vpop.permute.xlu1 %2382  ;;  %v2379_v27 = vpop.permute.xlu0 %2378 }
 0x432   :  { %v2387_v53 = vsel %vm2386_vm1, %v2381_v18, %v2383_v60  ;;  %v2390_v25 = vsel %vm2386_vm1, %v2383_v60, %v2377_v16  ;;  %v2388_v10 = vsel %vm2386_vm1, %v2379_v27, %v2381_v18  ;;  %v2389_v29 = vsel %vm2386_vm1, %v2377_v16, %v2379_v27 }
 0x433   :  { %v2391_v59 = vadd.f32 %v2390_v25, %v2372_v47  ;;  %v2394_v51 = vadd.f32 %v2387_v53, %v2375_v31  ;;  %v2392_v61 = vadd.f32 %v2389_v29, %v2373_v32  ;;  %v2393_v44 = vadd.f32 %v2388_v10, %v2374_v11 }
 0x435   :  { %v2395_v30 = vadd.f32 %v2394_v51, %v2391_v59  ;;  %v2396_v22 = vadd.f32 %v2392_v61, %v2391_v59  ;;  %v2397_v43 = vadd.f32 %v2393_v44, %v2392_v61  ;;  %v2398_v48 = vadd.f32 %v2394_v51, %v2393_v44  ;;  %v2408_v63 = vpop.permute.xlu1 %2407  ;;  %v2406_v4 = vpop.permute.xlu0 %2405 }
 0x436   :  { %v2415_v35 = vsel %vm2386_vm1, %v2406_v4, %v2408_v63 }
 0x437   :  { %v2399_v23 = vadd.f32 %v2397_v43, %v2395_v30  ;;  %v2400_v3 = vadd.f32 %v2398_v48, %v2396_v22  ;;  %v2418_v18 = vadd.f32 %v2415_v35, %v2402_v8 }
 0x439   :  { %v2427_v0 = vrot.slane %v2399_v23, 4  ;;  %v2433_v26 = vrot.slane %v2400_v3, 4  ;;  %v2412_v58 = vpop.permute.xlu1 %2411  ;;  %v2410_v46 = vpop.permute.xlu0 %2409 }
 0x43a   :  { %v2416_v47 = vsel %vm2386_vm1, %v2412_v58, %v2406_v4  ;;  %v2413_v11 = vsel %vm2386_vm1, %v2410_v46, %v2412_v58  ;;  %v2414_v31 = vsel %vm2386_vm1, %v2408_v63, %v2410_v46 }
 0x43b   :  { %v2428_v32 = vadd.f32 %v2427_v0, %v2399_v23  ;;  %v2434_v16 = vadd.f32 %v2433_v26, %v2400_v3  ;;  %v2417_v60 = vadd.f32 %v2416_v47, %v2401_v14  ;;  %v2419_v27 = vadd.f32 %v2414_v31, %v2403_v49 }
 0x43c   :  { %v2420_v53 = vadd.f32 %v2413_v11, %v2404_v6 }
 0x43d   :  { %v2429_v25 = vrot.slane %v2428_v32, 2  ;;  %v2435_v10 = vrot.slane %v2434_v16, 2  ;;  %v2422_v29 = vadd.f32 %v2418_v18, %v2417_v60  ;;  %v2423_v59 = vadd.f32 %v2419_v27, %v2418_v18 }
 0x43e   :  { %v2421_v51 = vadd.f32 %v2420_v53, %v2417_v60  ;;  %v2424_v8 = vadd.f32 %v2420_v53, %v2419_v27 }
 0x43f   :  { %v2430_v61 = vadd.f32 %v2429_v25, %v2428_v32  ;;  %v2436_v44 = vadd.f32 %v2435_v10, %v2434_v16 }
 0x440   :  { %v2425_v30 = vadd.f32 %v2423_v59, %v2421_v51  ;;  %v2426_v22 = vadd.f32 %v2424_v8, %v2422_v29 }
 0x441   :  { %v2431_v43 = vrot.slane %v2430_v61, 1  ;;  %v2437_v48 = vrot.slane %v2436_v44, 1 }
 0x442   :  { %v2439_v4 = vrot.slane %v2425_v30, 4  ;;  %v2445_v35 = vrot.slane %v2426_v22, 4 }
 0x443   :  { %v2432_v3 = vadd.f32 %v2431_v43, %v2430_v61  ;;  %v2438_v14 = vadd.f32 %v2437_v48, %v2436_v44  ;;  %v2461_v43 = vld [vmem:[%s6353_s7] sm:$0xf] }
 0x444   :  { %v2440_v63 = vadd.f32 %v2439_v4, %v2425_v30  ;;  %v2446_v23 = vadd.f32 %v2445_v35, %v2426_v22 }
 0x445   :  { %v2451_v58 = vmul.f32 0.010416667, %v2432_v3  ;;  %v2452_v46 = vmul.f32 0.010416667, %v2438_v14 }
 0x446   :  { %v2441_v49 = vrot.slane %v2440_v63, 2  ;;  %v2447_v6 = vrot.slane %v2446_v23, 2 }
 0x447   :  { %v2455_v32 = vmul.f32 %v2451_v58, %v2451_v58  ;;  %v2456_v16 = vmul.f32 %v2452_v46, %v2452_v46 }
 0x448   :  { %v2442_v0 = vadd.f32 %v2441_v49, %v2440_v63  ;;  %v2448_v26 = vadd.f32 %v2447_v6, %v2446_v23 }
 0x44a   :  { %v2443_v18 = vrot.slane %v2442_v0, 1  ;;  %v2449_v47 = vrot.slane %v2448_v26, 1 }
 0x44c   :  { %v2444_v11 = vadd.f32 %v2443_v18, %v2442_v0  ;;  %v2450_v31 = vadd.f32 %v2449_v47, %v2448_v26 }
 0x44e   :  { %v2453_v60 = vmul.f32 0.010416667, %v2444_v11  ;;  %v2454_v27 = vmul.f32 0.010416667, %v2450_v31 }
 0x450   :  { %v2457_v53 = vsub.f32 %v2453_v60, %v2455_v32  ;;  %v2458_v25 = vsub.f32 %v2454_v27, %v2456_v16  ;;  %v2486_v60 = vld [vmem:[%s6354_s8] sm:$0xf] }
 0x452   :  { %v2459_v10 = vmax.f32 %v2457_v53, 0.0  ;;  %v2460_v29 = vmax.f32 %v2458_v25, 0.0 }
 0x454   :  { %v2462_v59 = vadd.f32 1e-05, %v2459_v10  ;;  %v2463_v51 = vadd.f32 1e-05, %v2460_v29 }
 0x456   :  { %4819 = vrsqrt.f32 %v2462_v59 }
 0x457   :  { %4821 = vrsqrt.f32 %v2463_v51 }
 0x460   :  { %v4820_v8 = vpop.eup %4819 }
 0x461   :  { %v4822_v61 = vpop.eup %4821 }
 0x462   :  { %v2468_v44 = vcombine.low %v4820_v8, %v4822_v61 }
 0x464   :  { %v2475_v30 = vrot.slane %v2468_v44, %v5155_v45 }
 0x466   :  { %v2476_v22 = vcombine.low %v2475_v30, %v2475_v30 }
 0x468   :  { %v2483_v48 = vrot.slane %v2476_v22, %v5155_v45 }
 0x46a   :  { %v2485_v4 = vmul.f32 %v2483_v48, %v2461_v43 }
 0x46c   :  { %v2491_v35 = vrot.slane %v2485_v4, %v5162_v52  ;;  %v2495_v63 = vrot.slane %v2485_v4, %v5166_v54  ;;  %v2499_v23 = vrot.slane %v2485_v4, %v5169_v55  ;;  %v2503_v3 = vrot.slane %v2485_v4, %v5172_v56 }
 0x46e   :  { %v2508_v14 = vmul.f32 %v2491_v35, %v2451_v58  ;;  %v2509_v49 = vmul.f32 %v2495_v63, %v2452_v46  ;;  %v2510_v6 = vmul.f32 %v2499_v23, %v2451_v58  ;;  %v2511_v0 = vmul.f32 %v2503_v3, %v2452_v46 }
 0x46f   :  { %v2542_v32 = vmul.f32 %v2491_v35, %v5310_v36  ;;  %v2543_v16 = vmul.f32 %v2495_v63, %v5314_v28  ;;  %v2544_v27 = vmul.f32 %v2499_v23, %v5312_v37  ;;  %v2545_v58 = vmul.f32 %v2503_v3, %v5316_v50 }
 0x470   :  { %v2516_v26 = vcombine.low %v2508_v14, %v2509_v49  ;;  %v2517_v18 = vcombine.low %v2510_v6, %v2511_v0  ;;  %v2587_v46 = vmul.f32 %v2491_v35, %v5350_v17  ;;  %v2588_v53 = vmul.f32 %v2495_v63, %v5362_v1 }
 0x471   :  { %v2589_v10 = vmul.f32 %v2499_v23, %v5352_v9  ;;  %v2590_v36 = vmul.f32 %v2503_v3, %v5364_v24  ;;  %v2611_v28 = vmul.f32 %v2491_v35, %v5318_v38  ;;  %v2612_v29 = vmul.f32 %v2495_v63, %v5322_v21 }
 0x472   :  { %v2524_v47 = vrot.slane %v2516_v26, %v5155_v45  ;;  %v2531_v11 = vrot.slane %v2517_v18, %v5155_v45  ;;  %v2613_v59 = vmul.f32 %v2499_v23, %v5320_v39  ;;  %v2614_v37 = vmul.f32 %v2503_v3, %v5324_v41 }
 0x473   :  { %v2635_v50 = vmul.f32 %v2491_v35, %v5386_v33  ;;  %v2636_v17 = vmul.f32 %v2495_v63, %v5396_v2  ;;  %v2637_v1 = vmul.f32 %v2499_v23, %v5388_v34  ;;  %v2638_v8 = vmul.f32 %v2503_v3, %v5398_v5 }
 0x474   :  { %v2532_v31 = vcombine.low %v2524_v47, %v2531_v11  ;;  %v2659_v9 = vmul.f32 %v2491_v35, %v5326_v40  ;;  %v2660_v24 = vmul.f32 %v2495_v63, %v5330_v12  ;;  %v2661_v38 = vmul.f32 %v2499_v23, %v5328_v7 }
 0x475   :  { %v2662_v21 = vmul.f32 %v2503_v3, %v5332_v42  ;;  %v2683_v34 = vmul.f32 %v2491_v35, %v5406_v13  ;;  %v2684_v5 = vmul.f32 %v2495_v63, %v5414_v19  ;;  %v2685_v40 = vmul.f32 %v2499_v23, %v5408_v15 }
 0x476   :  { %v2539_v25 = vrot.slane %v2532_v31, %v5155_v45  ;;  %v2686_v12 = vmul.f32 %v2503_v3, %v5416_v20 }
 0x478   :  { %v2541_v51 = vsub.f32 %v2486_v60, %v2539_v25 }
 0x47a   :  { %v2550_v39 = vrot.slane %v2541_v51, %v5162_v52  ;;  %v2554_v41 = vrot.slane %v2541_v51, %v5166_v54  ;;  %v2558_v33 = vrot.slane %v2541_v51, %v5169_v55  ;;  %v2562_v2 = vrot.slane %v2541_v51, %v5172_v56 }
 0x47c   :  { %v2567_v61 = vadd.f32 %v2550_v39, %v2542_v32  ;;  %v2568_v7 = vadd.f32 %v2554_v41, %v2543_v16  ;;  %v2569_v44 = vadd.f32 %v2558_v33, %v2544_v27  ;;  %v2570_v42 = vadd.f32 %v2562_v2, %v2545_v58 }
 0x47d   :  { %v2591_v30 = vadd.f32 %v2587_v46, %v2550_v39  ;;  %v2592_v22 = vadd.f32 %v2588_v53, %v2554_v41  ;;  %v2593_v43 = vadd.f32 %v2589_v10, %v2558_v33  ;;  %v2594_v48 = vadd.f32 %v2590_v36, %v2562_v2 }
 0x47e   :  { %v2571_v4 = vmax.f32 %v2567_v61, 0.0  ;;  %v2572_v14 = vmax.f32 %v2568_v7, 0.0  ;;  %v2573_v49 = vmax.f32 %v2569_v44, 0.0  ;;  %v2574_v6 = vmax.f32 %v2570_v42, 0.0 }
 0x47f   :  { %v2595_v0 = vmax.f32 %v2591_v30, 0.0  ;;  %v2596_v13 = vmax.f32 %v2592_v22, 0.0  ;;  %v2597_v35 = vmax.f32 %v2593_v43, 0.0  ;;  %v2598_v19 = vmax.f32 %v2594_v48, 0.0 }
 0x480   :  { %v5510_v15 = vmul.f32 %v5124_v62, %v2571_v4  ;;  %v2576_v20 = vmul.f32 %v5124_v62, %v2572_v14  ;;  %v5514_v63 = vmul.f32 %v5124_v62, %v2573_v49  ;;  %v5517_v23 = vmul.f32 %v5124_v62, %v2574_v6 }
 0x481   :  { %v5520_v3 = vmul.f32 %v5124_v62, %v2595_v0  ;;  %v2600_v26 = vmul.f32 %v5124_v62, %v2596_v13  ;;  %v5524_v18 = vmul.f32 %v5124_v62, %v2597_v35  ;;  %v5527_v47 = vmul.f32 %v5124_v62, %v2598_v19 }
 0x482   :  { %v2615_v11 = vadd.f32 %v2611_v28, %v2550_v39  ;;  %v2616_v31 = vadd.f32 %v2612_v29, %v2554_v41  ;;  %v2617_v32 = vadd.f32 %v2613_v59, %v2558_v33  ;;  %v2618_v16 = vadd.f32 %v2614_v37, %v2562_v2 }
 0x483   :  { %v2639_v60 = vadd.f32 %v2635_v50, %v2550_v39  ;;  %v2640_v27 = vadd.f32 %v2636_v17, %v2554_v41  ;;  %v2641_v58 = vadd.f32 %v2637_v1, %v2558_v33  ;;  %v2642_v46 = vadd.f32 %v2638_v8, %v2562_v2 }
 0x484   :  { %v2619_v53 = vmax.f32 %v2615_v11, 0.0  ;;  %v2620_v25 = vmax.f32 %v2616_v31, 0.0  ;;  %v2621_v10 = vmax.f32 %v2617_v32, 0.0  ;;  %v2622_v36 = vmax.f32 %v2618_v16, 0.0 }
 0x485   :  { %v2643_v51 = vmax.f32 %v2639_v60, 0.0  ;;  %v2644_v61 = vmax.f32 %v2640_v27, 0.0  ;;  %v2645_v7 = vmax.f32 %v2641_v58, 0.0  ;;  %v2646_v44 = vmax.f32 %v2642_v46, 0.0 }
 0x486   :  { %v5530_v42 = vmul.f32 %v5124_v62, %v2619_v53  ;;  %v5533_v28 = vmul.f32 %v5124_v62, %v2620_v25  ;;  %v5536_v29 = vmul.f32 %v5124_v62, %v2621_v10  ;;  %v5539_v59 = vmul.f32 %v5124_v62, %v2622_v36 }
 0x487   :  { %v5542_v37 = vmul.f32 %v5124_v62, %v2643_v51  ;;  %v5545_v50 = vmul.f32 %v5124_v62, %v2644_v61  ;;  %v5548_v17 = vmul.f32 %v5124_v62, %v2645_v7  ;;  %v5551_v1 = vmul.f32 %v5124_v62, %v2646_v44 }
 0x488   :  { %v2663_v8 = vadd.f32 %v2659_v9, %v2550_v39  ;;  %v2664_v30 = vadd.f32 %v2660_v24, %v2554_v41  ;;  %v2665_v22 = vadd.f32 %v2661_v38, %v2558_v33  ;;  %v2666_v43 = vadd.f32 %v2662_v21, %v2562_v2 }
 0x489   :  { %v2687_v48 = vadd.f32 %v2683_v34, %v2550_v39  ;;  %v2688_v4 = vadd.f32 %v2684_v5, %v2554_v41  ;;  %v2689_v14 = vadd.f32 %v2685_v40, %v2558_v33  ;;  %v2690_v49 = vadd.f32 %v2686_v12, %v2562_v2 }
 0x48a   :  { %v2667_v6 = vmax.f32 %v2663_v8, 0.0  ;;  %v2668_v0 = vmax.f32 %v2664_v30, 0.0  ;;  %v2669_v13 = vmax.f32 %v2665_v22, 0.0  ;;  %v2670_v35 = vmax.f32 %v2666_v43, 0.0 }
 0x48b   :  { %v2691_v19 = vmax.f32 %v2687_v48, 0.0  ;;  %v2692_v11 = vmax.f32 %v2688_v4, 0.0  ;;  %v2693_v31 = vmax.f32 %v2689_v14, 0.0  ;;  %v2694_v32 = vmax.f32 %v2690_v49, 0.0 }
 0x48c   :  { %v5554_v16 = vmul.f32 %v5124_v62, %v2667_v6  ;;  %v5557_v9 = vmul.f32 %v5124_v62, %v2668_v0  ;;  %v5560_v24 = vmul.f32 %v5124_v62, %v2669_v13  ;;  %v5563_v38 = vmul.f32 %v5124_v62, %v2670_v35 }
 0x48d   :  { %v5566_v21 = vmul.f32 %v5124_v62, %v2691_v19  ;;  %v5569_v39 = vmul.f32 %v5124_v62, %v2692_v11  ;;  %v5572_v41 = vmul.f32 %v5124_v62, %v2693_v31  ;;  %v5575_v33 = vmul.f32 %v5124_v62, %v2694_v32 }
 0x48e   :  { %4915 = dma.done.wait [#allocation8 + $0x1], 32768 }
 0x48f   :  { %4916 = vsyncadd [#allocation8 + $0x1], 4294934528  ;;  %v5577_v2 = vpack.c.bf16 %v2600_v26, %v2576_v20  ;;  %v2742_v34 = vld [vmem:[#allocation6 + $0x8] sm:$0xff]  ;;  %v2744_v5 = vld [vmem:[#allocation6 + $0x18] sm:$0xff]  ;;  %s4937_s8 = smov 32   ;;  %vm3697_vm2 = vcmp.lt.s32.totalorder %v5447_v57, 32 }
 0x490   :  { %v2741_v40 = vld [vmem:[#allocation6] sm:$0xff]  ;;  %2997 = vmatprep.subr.bf16.mxu0 %v2742_v34  ;;  %3119 = vmatprep.subr.bf16.mxu1 %v2744_v5  ;;  %v2743_v12 = vld [vmem:[#allocation6 + $0x10] sm:$0xff]  ;;  %v2750_v60 = vld [vmem:[#allocation6 + $0x48] sm:$0xff] }
 0x491   :  { %3029 = vmatprep.mubr.bf16.mxu0 %v5577_v2  ;;  %3151 = vmatprep.mubr.bf16.mxu1 %v5577_v2  ;;  %v2752_v27 = vld [vmem:[#allocation6 + $0x58] sm:$0xff]  ;;  %v2749_v58 = vld [vmem:[#allocation6 + $0x40] sm:$0xff]  ;;  %v2751_v46 = vld [vmem:[#allocation6 + $0x50] sm:$0xff] }
 0x492   :  { %2998 = vmatpush1.bf16.msra.mxu0 %v2741_v40  ;;  %3120 = vmatpush1.bf16.msra.mxu1 %v2743_v12  ;;  %v2758_v20 = vld [vmem:[#allocation6 + $0x88] sm:$0xff]  ;;  %v2760_v26 = vld [vmem:[#allocation6 + $0x98] sm:$0xff]  ;;  %v2757_v53 = vld [vmem:[#allocation6 + $0x80] sm:$0xff] }
 0x493   :  { %2999 = vmatprep.subr.bf16.mxu0 %v2750_v60  ;;  %3121 = vmatprep.subr.bf16.mxu1 %v2752_v27  ;;  %v2759_v25 = vld [vmem:[#allocation6 + $0x90] sm:$0xff]  ;;  %v2766_v10 = vld [vmem:[#allocation6 + $0xc8] sm:$0xff]  ;;  %v2768_v36 = vld [vmem:[#allocation6 + $0xd8] sm:$0xff] }
 0x494   :  { %v2765_v51 = vld [vmem:[#allocation6 + $0xc0] sm:$0xff]  ;;  %v2767_v61 = vld [vmem:[#allocation6 + $0xd0] sm:$0xff]  ;;  %v2774_v7 = vld [vmem:[#allocation6 + $0x108] sm:$0xff] }
 0x495   :  { %v2776_v44 = vld [vmem:[#allocation6 + $0x118] sm:$0xff]  ;;  %v2773_v8 = vld [vmem:[#allocation6 + $0x100] sm:$0xff]  ;;  %v2775_v30 = vld [vmem:[#allocation6 + $0x110] sm:$0xff] }
 0x496   :  { %3000 = vmatpush1.bf16.msra.mxu0 %v2749_v58  ;;  %3122 = vmatpush1.bf16.msra.mxu1 %v2751_v46  ;;  %v2782_v22 = vld [vmem:[#allocation6 + $0x148] sm:$0xff]  ;;  %v2784_v43 = vld [vmem:[#allocation6 + $0x158] sm:$0xff]  ;;  %v2781_v48 = vld [vmem:[#allocation6 + $0x140] sm:$0xff] }
 0x497   :  { %3001 = vmatprep.subr.bf16.mxu0 %v2758_v20  ;;  %3123 = vmatprep.subr.bf16.mxu1 %v2760_v26  ;;  %v2783_v4 = vld [vmem:[#allocation6 + $0x150] sm:$0xff]  ;;  %v2790_v14 = vld [vmem:[#allocation6 + $0x188] sm:$0xff]  ;;  %v2792_v49 = vld [vmem:[#allocation6 + $0x198] sm:$0xff] }
 0x498   :  { %v2789_v6 = vld [vmem:[#allocation6 + $0x180] sm:$0xff]  ;;  %v2791_v0 = vld [vmem:[#allocation6 + $0x190] sm:$0xff]  ;;  %v2798_v13 = vld [vmem:[#allocation6 + $0x1c8] sm:$0xff] }
 0x499   :  { %v2800_v35 = vld [vmem:[#allocation6 + $0x1d8] sm:$0xff]  ;;  %v2797_v19 = vld [vmem:[#allocation6 + $0x1c0] sm:$0xff]  ;;  %v2799_v11 = vld [vmem:[#allocation6 + $0x1d0] sm:$0xff] }
 0x49a   :  { %3002 = vmatpush1.bf16.msra.mxu0 %v2757_v53  ;;  %3124 = vmatpush1.bf16.msra.mxu1 %v2759_v25  ;;  %v2806_v31 = vld [vmem:[#allocation6 + $0x208] sm:$0xff]  ;;  %v2808_v32 = vld [vmem:[#allocation6 + $0x218] sm:$0xff]  ;;  %v2805_v34 = vld [vmem:[#allocation6 + $0x200] sm:$0xff] }
 0x49b   :  { %3003 = vmatprep.subr.bf16.mxu0 %v2766_v10  ;;  %3125 = vmatprep.subr.bf16.mxu1 %v2768_v36  ;;  %v2807_v5 = vld [vmem:[#allocation6 + $0x210] sm:$0xff]  ;;  %v2814_v40 = vld [vmem:[#allocation6 + $0x248] sm:$0xff]  ;;  %v2816_v12 = vld [vmem:[#allocation6 + $0x258] sm:$0xff] }
 0x49c   :  { %v2813_v60 = vld [vmem:[#allocation6 + $0x240] sm:$0xff]  ;;  %v2815_v27 = vld [vmem:[#allocation6 + $0x250] sm:$0xff]  ;;  %v2822_v58 = vld [vmem:[#allocation6 + $0x288] sm:$0xff] }
 0x49d   :  { %v2824_v46 = vld [vmem:[#allocation6 + $0x298] sm:$0xff]  ;;  %v2821_v20 = vld [vmem:[#allocation6 + $0x280] sm:$0xff]  ;;  %v2823_v26 = vld [vmem:[#allocation6 + $0x290] sm:$0xff] }
 0x49e   :  { %3004 = vmatpush1.bf16.msra.mxu0 %v2765_v51  ;;  %3126 = vmatpush1.bf16.msra.mxu1 %v2767_v61  ;;  %v2830_v53 = vld [vmem:[#allocation6 + $0x2c8] sm:$0xff]  ;;  %v2832_v25 = vld [vmem:[#allocation6 + $0x2d8] sm:$0xff]  ;;  %v2829_v10 = vld [vmem:[#allocation6 + $0x2c0] sm:$0xff] }
 0x49f   :  { %3005 = vmatprep.subr.bf16.mxu0 %v2774_v7  ;;  %3127 = vmatprep.subr.bf16.mxu1 %v2776_v44  ;;  %v2831_v36 = vld [vmem:[#allocation6 + $0x2d0] sm:$0xff]  ;;  %v2838_v51 = vld [vmem:[#allocation6 + $0x308] sm:$0xff]  ;;  %v2840_v61 = vld [vmem:[#allocation6 + $0x318] sm:$0xff] }
 0x4a0   :  { %v2837_v7 = vld [vmem:[#allocation6 + $0x300] sm:$0xff]  ;;  %v2839_v44 = vld [vmem:[#allocation6 + $0x310] sm:$0xff] }
 0x4a2   :  { %3006 = vmatpush1.bf16.msra.mxu0 %v2773_v8  ;;  %3128 = vmatpush1.bf16.msra.mxu1 %v2775_v30  ;;  %v2846_v8 = vld [vmem:[#allocation6 + $0x348] sm:$0xff]  ;;  %v2848_v30 = vld [vmem:[#allocation6 + $0x358] sm:$0xff] }
 0x4a3   :  { %3007 = vmatprep.subr.bf16.mxu0 %v2782_v22  ;;  %3129 = vmatprep.subr.bf16.mxu1 %v2784_v43  ;;  %v2845_v22 = vld [vmem:[#allocation6 + $0x340] sm:$0xff]  ;;  %v2847_v43 = vld [vmem:[#allocation6 + $0x350] sm:$0xff] }
 0x4a6   :  { %3008 = vmatpush1.bf16.msra.mxu0 %v2781_v48  ;;  %3130 = vmatpush1.bf16.msra.mxu1 %v2783_v4  ;;  %v2854_v48 = vld [vmem:[#allocation6 + $0x388] sm:$0xff]  ;;  %v2856_v4 = vld [vmem:[#allocation6 + $0x398] sm:$0xff] }
 0x4a7   :  { %3009 = vmatprep.subr.bf16.mxu0 %v2790_v14  ;;  %3131 = vmatprep.subr.bf16.mxu1 %v2792_v49  ;;  %v2853_v14 = vld [vmem:[#allocation6 + $0x380] sm:$0xff]  ;;  %v2855_v49 = vld [vmem:[#allocation6 + $0x390] sm:$0xff] }
 0x4aa   :  { %3010 = vmatpush1.bf16.msra.mxu0 %v2789_v6  ;;  %3132 = vmatpush1.bf16.msra.mxu1 %v2791_v0  ;;  %v2862_v6 = vld [vmem:[#allocation6 + $0x3c8] sm:$0xff]  ;;  %v2864_v0 = vld [vmem:[#allocation6 + $0x3d8] sm:$0xff] }
 0x4ab   :  { %3011 = vmatprep.subr.bf16.mxu0 %v2798_v13  ;;  %3133 = vmatprep.subr.bf16.mxu1 %v2800_v35  ;;  %v2861_v13 = vld [vmem:[#allocation6 + $0x3c0] sm:$0xff]  ;;  %v2863_v35 = vld [vmem:[#allocation6 + $0x3d0] sm:$0xff] }
 0x4ae   :  { %3012 = vmatpush1.bf16.msra.mxu0 %v2797_v19  ;;  %3134 = vmatpush1.bf16.msra.mxu1 %v2799_v11  ;;  %v2870_v19 = vld [vmem:[#allocation6 + $0x408] sm:$0xff]  ;;  %v2872_v11 = vld [vmem:[#allocation6 + $0x418] sm:$0xff] }
 0x4af   :  { %3013 = vmatprep.subr.bf16.mxu0 %v2806_v31  ;;  %3135 = vmatprep.subr.bf16.mxu1 %v2808_v32  ;;  %v5583_v31 = vpack.c.bf16 %v5520_v3, %v5510_v15  ;;  %v2869_v32 = vld [vmem:[#allocation6 + $0x400] sm:$0xff]  ;;  %v2879_v3 = vld [vmem:[#allocation6 + $0x450] sm:$0xff] }
 0x4b0   :  { %v2877_v15 = vld [vmem:[#allocation6 + $0x440] sm:$0xff] }
 0x4b2   :  { %3014 = vmatpush1.bf16.msra.mxu0 %v2805_v34  ;;  %3136 = vmatpush1.bf16.msra.mxu1 %v2807_v5  ;;  %v2871_v34 = vld [vmem:[#allocation6 + $0x410] sm:$0xff]  ;;  %v2878_v5 = vld [vmem:[#allocation6 + $0x448] sm:$0xff] }
 0x4b3   :  { %3015 = vmatprep.subr.bf16.mxu0 %v2814_v40  ;;  %3137 = vmatprep.subr.bf16.mxu1 %v2816_v12  ;;  %v2880_v40 = vld [vmem:[#allocation6 + $0x458] sm:$0xff]  ;;  %v5587_v12 = vpack.c.bf16 %v5545_v50, %v5533_v28  ;;  %v5595_v28 = vpack.c.bf16 %v5542_v37, %v5530_v42  ;;  %v2885_v50 = vld [vmem:[#allocation6 + $0x480] sm:$0xff]  ;;  %v2895_v37 = vld [vmem:[#allocation6 + $0x4d0] sm:$0xff] }
 0x4b4   :  { %v2893_v42 = vld [vmem:[#allocation6 + $0x4c0] sm:$0xff] }
 0x4b6   :  { %3016 = vmatpush1.bf16.msra.mxu0 %v2813_v60  ;;  %3138 = vmatpush1.bf16.msra.mxu1 %v2815_v27  ;;  %v2886_v60 = vld [vmem:[#allocation6 + $0x488] sm:$0xff]  ;;  %v2888_v27 = vld [vmem:[#allocation6 + $0x498] sm:$0xff] }
 0x4b7   :  { %3017 = vmatprep.subr.bf16.mxu0 %v2822_v58  ;;  %3139 = vmatprep.subr.bf16.mxu1 %v2824_v46  ;;  %v2887_v58 = vld [vmem:[#allocation6 + $0x490] sm:$0xff]  ;;  %v2894_v46 = vld [vmem:[#allocation6 + $0x4c8] sm:$0xff] }
 0x4ba   :  { %3018 = vmatpush1.bf16.msra.mxu0 %v2821_v20  ;;  %3140 = vmatpush1.bf16.msra.mxu1 %v2823_v26  ;;  %v2896_v20 = vld [vmem:[#allocation6 + $0x4d8] sm:$0xff]  ;;  %v5599_v26 = vpack.c.bf16 %v5569_v39, %v5557_v9  ;;  %v5607_v9 = vpack.c.bf16 %v5566_v21, %v5554_v16  ;;  %v2901_v39 = vld [vmem:[#allocation6 + $0x500] sm:$0xff]  ;;  %v2911_v21 = vld [vmem:[#allocation6 + $0x550] sm:$0xff] }
 0x4bb   :  { %3019 = vmatprep.subr.bf16.mxu0 %v2830_v53  ;;  %3141 = vmatprep.subr.bf16.mxu1 %v2832_v25  ;;  %v2902_v53 = vld [vmem:[#allocation6 + $0x508] sm:$0xff]  ;;  %v2904_v25 = vld [vmem:[#allocation6 + $0x518] sm:$0xff]  ;;  %v2909_v16 = vld [vmem:[#allocation6 + $0x540] sm:$0xff] }
 0x4be   :  { %3020 = vmatpush1.bf16.msra.mxu0 %v2829_v10  ;;  %3142 = vmatpush1.bf16.msra.mxu1 %v2831_v36  ;;  %v2903_v10 = vld [vmem:[#allocation6 + $0x510] sm:$0xff]  ;;  %v2910_v36 = vld [vmem:[#allocation6 + $0x548] sm:$0xff] }
 0x4bf   :  { %3021 = vmatprep.subr.bf16.mxu0 %v2838_v51  ;;  %3143 = vmatprep.subr.bf16.mxu1 %v2840_v61  ;;  %v2912_v51 = vld [vmem:[#allocation6 + $0x558] sm:$0xff]  ;;  %v5611_v61 = vpack.c.bf16 %v5527_v47, %v5517_v23  ;;  %v2917_v23 = vld [vmem:[#allocation6 + $0x580] sm:$0xff]  ;;  %v2919_v47 = vld [vmem:[#allocation6 + $0x590] sm:$0xff] }
 0x4c2   :  { %3022 = vmatpush1.bf16.msra.mxu0 %v2837_v7  ;;  %3144 = vmatpush1.bf16.msra.mxu1 %v2839_v44  ;;  %v2918_v7 = vld [vmem:[#allocation6 + $0x588] sm:$0xff]  ;;  %v2920_v44 = vld [vmem:[#allocation6 + $0x598] sm:$0xff] }
 0x4c3   :  { %3023 = vmatprep.subr.bf16.mxu0 %v2846_v8  ;;  %3145 = vmatprep.subr.bf16.mxu1 %v2848_v30  ;;  %v2926_v8 = vld [vmem:[#allocation6 + $0x5c8] sm:$0xff]  ;;  %v2928_v30 = vld [vmem:[#allocation6 + $0x5d8] sm:$0xff] }
 0x4c6   :  { %3024 = vmatpush1.bf16.msra.mxu0 %v2845_v22  ;;  %3146 = vmatpush1.bf16.msra.mxu1 %v2847_v43  ;;  %v2925_v22 = vld [vmem:[#allocation6 + $0x5c0] sm:$0xff]  ;;  %v2927_v43 = vld [vmem:[#allocation6 + $0x5d0] sm:$0xff] }
 0x4c7   :  { %3025 = vmatprep.subr.bf16.mxu0 %v2854_v48  ;;  %3147 = vmatprep.subr.bf16.mxu1 %v2856_v4  ;;  %v2934_v48 = vld [vmem:[#allocation6 + $0x608] sm:$0xff]  ;;  %v2936_v4 = vld [vmem:[#allocation6 + $0x618] sm:$0xff] }
 0x4ca   :  { %3026 = vmatpush1.bf16.msra.mxu0 %v2853_v14  ;;  %3148 = vmatpush1.bf16.msra.mxu1 %v2855_v49  ;;  %v2933_v14 = vld [vmem:[#allocation6 + $0x600] sm:$0xff]  ;;  %v2935_v49 = vld [vmem:[#allocation6 + $0x610] sm:$0xff] }
 0x4cb   :  { %3027 = vmatprep.subr.bf16.mxu0 %v2862_v6  ;;  %3149 = vmatprep.subr.bf16.mxu1 %v2864_v0  ;;  %v2942_v6 = vld [vmem:[#allocation6 + $0x648] sm:$0xff]  ;;  %v2944_v0 = vld [vmem:[#allocation6 + $0x658] sm:$0xff] }
 0x4ce   :  { %3028 = vmatpush1.bf16.msra.mxu0 %v2861_v13  ;;  %3150 = vmatpush1.bf16.msra.mxu1 %v2863_v35  ;;  %v2941_v13 = vld [vmem:[#allocation6 + $0x640] sm:$0xff]  ;;  %v2943_v35 = vld [vmem:[#allocation6 + $0x650] sm:$0xff] }
 0x4cf   :  { %3058 = vmatprep.subr.bf16.mxu0 %v2870_v19  ;;  %3180 = vmatprep.subr.bf16.mxu1 %v2872_v11  ;;  %v2950_v19 = vld [vmem:[#allocation6 + $0x688] sm:$0xff]  ;;  %v2952_v11 = vld [vmem:[#allocation6 + $0x698] sm:$0xff] }
 0x4d1   :  { %3030 = vmatmul.mubr.bf16.vlgmr.msra.gmra.mrb[32].mxu0 %v5583_v31  ;;  %3152 = vmatmul.mubr.bf16.vlgmr.msra.gmra.mrb[32].mxu1 %v5583_v31 }
 0x4d2   :  { %3059 = vmatpush1.bf16.msra.mxu0 %v2869_v32  ;;  %3181 = vmatpush1.bf16.msra.mxu1 %v2871_v34  ;;  %v2949_v32 = vld [vmem:[#allocation6 + $0x680] sm:$0xff]  ;;  %v2951_v34 = vld [vmem:[#allocation6 + $0x690] sm:$0xff] }
 0x4d3   :  { %3060 = vmatprep.subr.bf16.mxu0 %v2878_v5  ;;  %3182 = vmatprep.subr.bf16.mxu1 %v2880_v40  ;;  %v2958_v5 = vld [vmem:[#allocation6 + $0x6c8] sm:$0xff]  ;;  %v2960_v40 = vld [vmem:[#allocation6 + $0x6d8] sm:$0xff] }
 0x4d4   :  { %3039 = vmatprep.mubr.bf16.mxu0 %v5587_v12  ;;  %3161 = vmatprep.mubr.bf16.mxu1 %v5587_v12 }
 0x4d6   :  { %3061 = vmatpush1.bf16.msra.mxu0 %v2877_v15  ;;  %3183 = vmatpush1.bf16.msra.mxu1 %v2879_v3  ;;  %v2957_v15 = vld [vmem:[#allocation6 + $0x6c0] sm:$0xff]  ;;  %v2959_v3 = vld [vmem:[#allocation6 + $0x6d0] sm:$0xff] }
 0x4d7   :  { %3062 = vmatprep.subr.bf16.mxu0 %v2886_v60  ;;  %3184 = vmatprep.subr.bf16.mxu1 %v2888_v27  ;;  %v2966_v60 = vld [vmem:[#allocation6 + $0x708] sm:$0xff]  ;;  %v2968_v27 = vld [vmem:[#allocation6 + $0x718] sm:$0xff] }
 0x4d9   :  { %3040 = vmatmul.mubr.bf16.gmra.mrb[36].mxu0 %v5595_v28  ;;  %3162 = vmatmul.mubr.bf16.gmra.mrb[36].mxu1 %v5595_v28 }
 0x4da   :  { %3063 = vmatpush1.bf16.msra.mxu0 %v2885_v50  ;;  %3185 = vmatpush1.bf16.msra.mxu1 %v2887_v58  ;;  %v2965_v50 = vld [vmem:[#allocation6 + $0x700] sm:$0xff]  ;;  %v2967_v58 = vld [vmem:[#allocation6 + $0x710] sm:$0xff] }
 0x4db   :  { %3064 = vmatprep.subr.bf16.mxu0 %v2894_v46  ;;  %3186 = vmatprep.subr.bf16.mxu1 %v2896_v20  ;;  %v2974_v46 = vld [vmem:[#allocation6 + $0x748] sm:$0xff]  ;;  %v2976_v20 = vld [vmem:[#allocation6 + $0x758] sm:$0xff] }
 0x4dc   :  { %3049 = vmatprep.mubr.bf16.mxu0 %v5599_v26  ;;  %3171 = vmatprep.mubr.bf16.mxu1 %v5599_v26 }
 0x4de   :  { %3065 = vmatpush1.bf16.msra.mxu0 %v2893_v42  ;;  %3187 = vmatpush1.bf16.msra.mxu1 %v2895_v37  ;;  %v2973_v42 = vld [vmem:[#allocation6 + $0x740] sm:$0xff]  ;;  %v2975_v37 = vld [vmem:[#allocation6 + $0x750] sm:$0xff] }
 0x4df   :  { %3066 = vmatprep.subr.bf16.mxu0 %v2902_v53  ;;  %3188 = vmatprep.subr.bf16.mxu1 %v2904_v25  ;;  %v2982_v53 = vld [vmem:[#allocation6 + $0x788] sm:$0xff]  ;;  %v2984_v25 = vld [vmem:[#allocation6 + $0x798] sm:$0xff] }
 0x4e1   :  { %3050 = vmatmul.mubr.bf16.gmra.mrb[40].mxu0 %v5607_v9  ;;  %3172 = vmatmul.mubr.bf16.gmra.mrb[40].mxu1 %v5607_v9 }
 0x4e2   :  { %3067 = vmatpush1.bf16.msra.mxu0 %v2901_v39  ;;  %3189 = vmatpush1.bf16.msra.mxu1 %v2903_v10  ;;  %v2981_v39 = vld [vmem:[#allocation6 + $0x780] sm:$0xff]  ;;  %v2983_v10 = vld [vmem:[#allocation6 + $0x790] sm:$0xff] }
 0x4e3   :  { %3068 = vmatprep.subr.bf16.mxu0 %v2910_v36  ;;  %3190 = vmatprep.subr.bf16.mxu1 %v2912_v51  ;;  %v2990_v36 = vld [vmem:[#allocation6 + $0x7c8] sm:$0xff]  ;;  %v2992_v51 = vld [vmem:[#allocation6 + $0x7d8] sm:$0xff] }
 0x4e4   :  { %3090 = vmatprep.mubr.bf16.mxu0 %v5611_v61  ;;  %3212 = vmatprep.mubr.bf16.mxu1 %v5611_v61 }
 0x4e6   :  { %3069 = vmatpush1.bf16.msra.mxu0 %v2909_v16  ;;  %3191 = vmatpush1.bf16.msra.mxu1 %v2911_v21  ;;  %v2989_v16 = vld [vmem:[#allocation6 + $0x7c0] sm:$0xff]  ;;  %v2991_v21 = vld [vmem:[#allocation6 + $0x7d0] sm:$0xff] }
 0x4e7   :  { %3070 = vmatprep.subr.bf16.mxu0 %v2918_v7  ;;  %3192 = vmatprep.subr.bf16.mxu1 %v2920_v44  ;;  %v2746_v7 = vld [vmem:[#allocation6 + $0x28] sm:$0xff]  ;;  %v2748_v44 = vld [vmem:[#allocation6 + $0x38] sm:$0xff] }
 0x4ea   :  { %3071 = vmatpush1.bf16.msra.mxu0 %v2917_v23  ;;  %3193 = vmatpush1.bf16.msra.mxu1 %v2919_v47  ;;  %v5619_v23 = vpack.c.bf16 %v5524_v18, %v5514_v63  ;;  %v2745_v47 = vld [vmem:[#allocation6 + $0x20] sm:$0xff]  ;;  %v2755_v18 = vld [vmem:[#allocation6 + $0x70] sm:$0xff] }
 0x4eb   :  { %3072 = vmatprep.subr.bf16.mxu0 %v2926_v8  ;;  %3194 = vmatprep.subr.bf16.mxu1 %v2928_v30  ;;  %v2747_v8 = vld [vmem:[#allocation6 + $0x30] sm:$0xff]  ;;  %v2754_v30 = vld [vmem:[#allocation6 + $0x68] sm:$0xff]  ;;  %v2753_v63 = vld [vmem:[#allocation6 + $0x60] sm:$0xff] }
 0x4ee   :  { %3073 = vmatpush1.bf16.msra.mxu0 %v2925_v22  ;;  %3195 = vmatpush1.bf16.msra.mxu1 %v2927_v43  ;;  %v2756_v22 = vld [vmem:[#allocation6 + $0x78] sm:$0xff]  ;;  %v5623_v43 = vpack.c.bf16 %v5551_v1, %v5539_v59  ;;  %v5631_v59 = vpack.c.bf16 %v5548_v17, %v5536_v29  ;;  %v2761_v1 = vld [vmem:[#allocation6 + $0xa0] sm:$0xff]  ;;  %v2771_v17 = vld [vmem:[#allocation6 + $0xf0] sm:$0xff] }
 0x4ef   :  { %3074 = vmatprep.subr.bf16.mxu0 %v2934_v48  ;;  %3196 = vmatprep.subr.bf16.mxu1 %v2936_v4  ;;  %v2762_v48 = vld [vmem:[#allocation6 + $0xa8] sm:$0xff]  ;;  %v2764_v4 = vld [vmem:[#allocation6 + $0xb8] sm:$0xff]  ;;  %v2769_v29 = vld [vmem:[#allocation6 + $0xe0] sm:$0xff] }
 0x4f2   :  { %3075 = vmatpush1.bf16.msra.mxu0 %v2933_v14  ;;  %3197 = vmatpush1.bf16.msra.mxu1 %v2935_v49  ;;  %v2763_v14 = vld [vmem:[#allocation6 + $0xb0] sm:$0xff]  ;;  %v2770_v49 = vld [vmem:[#allocation6 + $0xe8] sm:$0xff] }
 0x4f3   :  { %3076 = vmatprep.subr.bf16.mxu0 %v2942_v6  ;;  %3198 = vmatprep.subr.bf16.mxu1 %v2944_v0  ;;  %v2772_v6 = vld [vmem:[#allocation6 + $0xf8] sm:$0xff]  ;;  %v5635_v0 = vpack.c.bf16 %v5575_v33, %v5563_v38  ;;  %v5643_v38 = vpack.c.bf16 %v5572_v41, %v5560_v24  ;;  %v2777_v33 = vld [vmem:[#allocation6 + $0x120] sm:$0xff]  ;;  %v2794_v24 = vld [vmem:[#allocation6 + $0x1a8] sm:$0xff] }
 0x4f4   :  { %v2796_v41 = vld [vmem:[#allocation6 + $0x1b8] sm:$0xff] }
 0x4f6   :  { %3077 = vmatpush1.bf16.msra.mxu0 %v2941_v13  ;;  %3199 = vmatpush1.bf16.msra.mxu1 %v2943_v35  ;;  %v2778_v13 = vld [vmem:[#allocation6 + $0x128] sm:$0xff]  ;;  %v2780_v35 = vld [vmem:[#allocation6 + $0x138] sm:$0xff] }
 0x4f7   :  { %3078 = vmatprep.subr.bf16.mxu0 %v2950_v19  ;;  %3200 = vmatprep.subr.bf16.mxu1 %v2952_v11  ;;  %v2779_v19 = vld [vmem:[#allocation6 + $0x130] sm:$0xff]  ;;  %v2786_v11 = vld [vmem:[#allocation6 + $0x168] sm:$0xff] }
 0x4fa   :  { %3079 = vmatpush1.bf16.msra.mxu0 %v2949_v32  ;;  %3201 = vmatpush1.bf16.msra.mxu1 %v2951_v34  ;;  %v2788_v32 = vld [vmem:[#allocation6 + $0x178] sm:$0xff]  ;;  %v2785_v34 = vld [vmem:[#allocation6 + $0x160] sm:$0xff] }
 0x4fb   :  { %3080 = vmatprep.subr.bf16.mxu0 %v2958_v5  ;;  %3202 = vmatprep.subr.bf16.mxu1 %v2960_v40  ;;  %v2787_v5 = vld [vmem:[#allocation6 + $0x170] sm:$0xff]  ;;  %v2793_v40 = vld [vmem:[#allocation6 + $0x1a0] sm:$0xff] }
 0x4fe   :  { %3081 = vmatpush1.bf16.msra.mxu0 %v2957_v15  ;;  %3203 = vmatpush1.bf16.msra.mxu1 %v2959_v3  ;;  %v2795_v15 = vld [vmem:[#allocation6 + $0x1b0] sm:$0xff]  ;;  %v2802_v3 = vld [vmem:[#allocation6 + $0x1e8] sm:$0xff] }
 0x4ff   :  { %3082 = vmatprep.subr.bf16.mxu0 %v2966_v60  ;;  %3204 = vmatprep.subr.bf16.mxu1 %v2968_v27  ;;  %v2804_v60 = vld [vmem:[#allocation6 + $0x1f8] sm:$0xff]  ;;  %v2801_v27 = vld [vmem:[#allocation6 + $0x1e0] sm:$0xff] }
 0x502   :  { %3083 = vmatpush1.bf16.msra.mxu0 %v2965_v50  ;;  %3205 = vmatpush1.bf16.msra.mxu1 %v2967_v58  ;;  %v2803_v50 = vld [vmem:[#allocation6 + $0x1f0] sm:$0xff]  ;;  %v2810_v58 = vld [vmem:[#allocation6 + $0x228] sm:$0xff] }
 0x503   :  { %3084 = vmatprep.subr.bf16.mxu0 %v2974_v46  ;;  %3206 = vmatprep.subr.bf16.mxu1 %v2976_v20  ;;  %v2812_v46 = vld [vmem:[#allocation6 + $0x238] sm:$0xff]  ;;  %v2811_v20 = vld [vmem:[#allocation6 + $0x230] sm:$0xff] }
 0x506   :  { %3085 = vmatpush1.bf16.msra.mxu0 %v2973_v42  ;;  %3207 = vmatpush1.bf16.msra.mxu1 %v2975_v37  ;;  %v2818_v42 = vld [vmem:[#allocation6 + $0x268] sm:$0xff]  ;;  %v2820_v37 = vld [vmem:[#allocation6 + $0x278] sm:$0xff] }
 0x507   :  { %3086 = vmatprep.subr.bf16.mxu0 %v2982_v53  ;;  %3208 = vmatprep.subr.bf16.mxu1 %v2984_v25  ;;  %v2817_v53 = vld [vmem:[#allocation6 + $0x260] sm:$0xff]  ;;  %v2819_v25 = vld [vmem:[#allocation6 + $0x270] sm:$0xff] }
 0x50a   :  { %3087 = vmatpush1.bf16.msra.mxu0 %v2981_v39  ;;  %3209 = vmatpush1.bf16.msra.mxu1 %v2983_v10  ;;  %v2826_v39 = vld [vmem:[#allocation6 + $0x2a8] sm:$0xff]  ;;  %v2828_v10 = vld [vmem:[#allocation6 + $0x2b8] sm:$0xff] }
 0x50b   :  { %3088 = vmatprep.subr.bf16.mxu0 %v2990_v36  ;;  %3210 = vmatprep.subr.bf16.mxu1 %v2992_v51  ;;  %v2825_v36 = vld [vmem:[#allocation6 + $0x2a0] sm:$0xff]  ;;  %v2827_v51 = vld [vmem:[#allocation6 + $0x2b0] sm:$0xff] }
 0x50e   :  { %3089 = vmatpush1.bf16.msra.mxu0 %v2989_v16  ;;  %3211 = vmatpush1.bf16.msra.mxu1 %v2991_v21  ;;  %v2834_v16 = vld [vmem:[#allocation6 + $0x2e8] sm:$0xff]  ;;  %v2836_v21 = vld [vmem:[#allocation6 + $0x2f8] sm:$0xff] }
 0x50f   :  { %3241 = vmatprep.subr.bf16.mxu0 %v2746_v7  ;;  %3363 = vmatprep.subr.bf16.mxu1 %v2748_v44  ;;  %v2833_v7 = vld [vmem:[#allocation6 + $0x2e0] sm:$0xff]  ;;  %v2835_v44 = vld [vmem:[#allocation6 + $0x2f0] sm:$0xff] }
 0x511   :  { %3091 = vmatmul.mubr.bf16.vlgmr.msra.gmra.mrb[32].mxu0 %v5619_v23  ;;  %3213 = vmatmul.mubr.bf16.vlgmr.msra.gmra.mrb[32].mxu1 %v5619_v23 }
 0x512   :  { %3242 = vmatpush1.bf16.msra.mxu0 %v2745_v47  ;;  %3364 = vmatpush1.bf16.msra.mxu1 %v2747_v8  ;;  %v2842_v47 = vld [vmem:[#allocation6 + $0x328] sm:$0xff]  ;;  %v2844_v8 = vld [vmem:[#allocation6 + $0x338] sm:$0xff] }
 0x513   :  { %3243 = vmatprep.subr.bf16.mxu0 %v2754_v30  ;;  %3365 = vmatprep.subr.bf16.mxu1 %v2756_v22  ;;  %v2841_v30 = vld [vmem:[#allocation6 + $0x320] sm:$0xff]  ;;  %v2843_v22 = vld [vmem:[#allocation6 + $0x330] sm:$0xff] }
 0x514   :  { %3100 = vmatprep.mubr.bf16.mxu0 %v5623_v43  ;;  %3222 = vmatprep.mubr.bf16.mxu1 %v5623_v43 }
 0x516   :  { %3244 = vmatpush1.bf16.msra.mxu0 %v2753_v63  ;;  %3366 = vmatpush1.bf16.msra.mxu1 %v2755_v18  ;;  %v2850_v63 = vld [vmem:[#allocation6 + $0x368] sm:$0xff]  ;;  %v2852_v18 = vld [vmem:[#allocation6 + $0x378] sm:$0xff] }
 0x517   :  { %3245 = vmatprep.subr.bf16.mxu0 %v2762_v48  ;;  %3367 = vmatprep.subr.bf16.mxu1 %v2764_v4  ;;  %v2849_v48 = vld [vmem:[#allocation6 + $0x360] sm:$0xff]  ;;  %v2851_v4 = vld [vmem:[#allocation6 + $0x370] sm:$0xff] }
 0x519   :  { %3101 = vmatmul.mubr.bf16.gmra.mrb[36].mxu0 %v5631_v59  ;;  %3223 = vmatmul.mubr.bf16.gmra.mrb[36].mxu1 %v5631_v59 }
 0x51a   :  { %3246 = vmatpush1.bf16.msra.mxu0 %v2761_v1  ;;  %3368 = vmatpush1.bf16.msra.mxu1 %v2763_v14  ;;  %v2858_v1 = vld [vmem:[#allocation6 + $0x3a8] sm:$0xff]  ;;  %v2860_v14 = vld [vmem:[#allocation6 + $0x3b8] sm:$0xff] }
 0x51b   :  { %3247 = vmatprep.subr.bf16.mxu0 %v2770_v49  ;;  %3369 = vmatprep.subr.bf16.mxu1 %v2772_v6  ;;  %v2857_v49 = vld [vmem:[#allocation6 + $0x3a0] sm:$0xff]  ;;  %v2859_v6 = vld [vmem:[#allocation6 + $0x3b0] sm:$0xff] }
 0x51c   :  { %3110 = vmatprep.mubr.bf16.mxu0 %v5635_v0  ;;  %3232 = vmatprep.mubr.bf16.mxu1 %v5635_v0 }
 0x51e   :  { %3248 = vmatpush1.bf16.msra.mxu0 %v2769_v29  ;;  %3370 = vmatpush1.bf16.msra.mxu1 %v2771_v17  ;;  %v2866_v29 = vld [vmem:[#allocation6 + $0x3e8] sm:$0xff]  ;;  %v2868_v17 = vld [vmem:[#allocation6 + $0x3f8] sm:$0xff] }
 0x51f   :  { %3249 = vmatprep.subr.bf16.mxu0 %v2778_v13  ;;  %3371 = vmatprep.subr.bf16.mxu1 %v2780_v35  ;;  %v2865_v13 = vld [vmem:[#allocation6 + $0x3e0] sm:$0xff]  ;;  %v2867_v35 = vld [vmem:[#allocation6 + $0x3f0] sm:$0xff] }
 0x521   :  { %3111 = vmatmul.mubr.bf16.gmra.mrb[40].mxu0 %v5643_v38  ;;  %3233 = vmatmul.mubr.bf16.gmra.mrb[40].mxu1 %v5643_v38 }
 0x522   :  { %3250 = vmatpush1.bf16.msra.mxu0 %v2777_v33  ;;  %3372 = vmatpush1.bf16.msra.mxu1 %v2779_v19  ;;  %v2874_v33 = vld [vmem:[#allocation6 + $0x428] sm:$0xff]  ;;  %v2876_v19 = vld [vmem:[#allocation6 + $0x438] sm:$0xff] }
 0x523   :  { %3251 = vmatprep.subr.bf16.mxu0 %v2786_v11  ;;  %3373 = vmatprep.subr.bf16.mxu1 %v2788_v32  ;;  %v2873_v11 = vld [vmem:[#allocation6 + $0x420] sm:$0xff]  ;;  %v2875_v32 = vld [vmem:[#allocation6 + $0x430] sm:$0xff] }
 0x524   :  { %3273 = vmatprep.mubr.bf16.mxu0 %v5577_v2  ;;  %3395 = vmatprep.mubr.bf16.mxu1 %v5577_v2  ;;  %v2809_v2 = vld [vmem:[#allocation6 + $0x220] sm:$0xff] }
 0x526   :  { %3252 = vmatpush1.bf16.msra.mxu0 %v2785_v34  ;;  %3374 = vmatpush1.bf16.msra.mxu1 %v2787_v5  ;;  %v2882_v34 = vld [vmem:[#allocation6 + $0x468] sm:$0xff]  ;;  %v2884_v5 = vld [vmem:[#allocation6 + $0x478] sm:$0xff] }
 0x527   :  { %3253 = vmatprep.subr.bf16.mxu0 %v2794_v24  ;;  %3375 = vmatprep.subr.bf16.mxu1 %v2796_v41  ;;  %v2881_v24 = vld [vmem:[#allocation6 + $0x460] sm:$0xff]  ;;  %v2883_v41 = vld [vmem:[#allocation6 + $0x470] sm:$0xff] }
 0x52a   :  { %3254 = vmatpush1.bf16.msra.mxu0 %v2793_v40  ;;  %3376 = vmatpush1.bf16.msra.mxu1 %v2795_v15  ;;  %v2890_v40 = vld [vmem:[#allocation6 + $0x4a8] sm:$0xff]  ;;  %v2892_v15 = vld [vmem:[#allocation6 + $0x4b8] sm:$0xff] }
 0x52b   :  { %3255 = vmatprep.subr.bf16.mxu0 %v2802_v3  ;;  %3377 = vmatprep.subr.bf16.mxu1 %v2804_v60  ;;  %v2889_v3 = vld [vmem:[#allocation6 + $0x4a0] sm:$0xff]  ;;  %v2891_v60 = vld [vmem:[#allocation6 + $0x4b0] sm:$0xff] }
 0x52e   :  { %3256 = vmatpush1.bf16.msra.mxu0 %v2801_v27  ;;  %3378 = vmatpush1.bf16.msra.mxu1 %v2803_v50  ;;  %v2898_v27 = vld [vmem:[#allocation6 + $0x4e8] sm:$0xff]  ;;  %v2897_v50 = vld [vmem:[#allocation6 + $0x4e0] sm:$0xff] }
 0x52f   :  { %3257 = vmatprep.subr.bf16.mxu0 %v2810_v58  ;;  %3379 = vmatprep.subr.bf16.mxu1 %v2812_v46  ;;  %v2899_v58 = vld [vmem:[#allocation6 + $0x4f0] sm:$0xff]  ;;  %v2906_v46 = vld [vmem:[#allocation6 + $0x528] sm:$0xff] }
 0x532   :  { %3258 = vmatpush1.bf16.msra.mxu0 %v2809_v2  ;;  %3380 = vmatpush1.bf16.msra.mxu1 %v2811_v20  ;;  %v2905_v2 = vld [vmem:[#allocation6 + $0x520] sm:$0xff]  ;;  %v2907_v20 = vld [vmem:[#allocation6 + $0x530] sm:$0xff] }
 0x533   :  { %3259 = vmatprep.subr.bf16.mxu0 %v2818_v42  ;;  %3381 = vmatprep.subr.bf16.mxu1 %v2820_v37  ;;  %v2914_v42 = vld [vmem:[#allocation6 + $0x568] sm:$0xff]  ;;  %v2913_v37 = vld [vmem:[#allocation6 + $0x560] sm:$0xff] }
 0x536   :  { %3260 = vmatpush1.bf16.msra.mxu0 %v2817_v53  ;;  %3382 = vmatpush1.bf16.msra.mxu1 %v2819_v25  ;;  %v2915_v53 = vld [vmem:[#allocation6 + $0x570] sm:$0xff]  ;;  %v2922_v25 = vld [vmem:[#allocation6 + $0x5a8] sm:$0xff] }
 0x537   :  { %3261 = vmatprep.subr.bf16.mxu0 %v2826_v39  ;;  %3383 = vmatprep.subr.bf16.mxu1 %v2828_v10  ;;  %v2921_v39 = vld [vmem:[#allocation6 + $0x5a0] sm:$0xff]  ;;  %v2923_v10 = vld [vmem:[#allocation6 + $0x5b0] sm:$0xff] }
 0x53a   :  { %3262 = vmatpush1.bf16.msra.mxu0 %v2825_v36  ;;  %3384 = vmatpush1.bf16.msra.mxu1 %v2827_v51  ;;  %v2930_v36 = vld [vmem:[#allocation6 + $0x5e8] sm:$0xff]  ;;  %v2929_v51 = vld [vmem:[#allocation6 + $0x5e0] sm:$0xff] }
 0x53b   :  { %3263 = vmatprep.subr.bf16.mxu0 %v2834_v16  ;;  %3385 = vmatprep.subr.bf16.mxu1 %v2836_v21  ;;  %v2931_v16 = vld [vmem:[#allocation6 + $0x5f0] sm:$0xff]  ;;  %v2938_v21 = vld [vmem:[#allocation6 + $0x628] sm:$0xff] }
 0x53e   :  { %3264 = vmatpush1.bf16.msra.mxu0 %v2833_v7  ;;  %3386 = vmatpush1.bf16.msra.mxu1 %v2835_v44  ;;  %v2940_v7 = vld [vmem:[#allocation6 + $0x638] sm:$0xff]  ;;  %v2939_v44 = vld [vmem:[#allocation6 + $0x630] sm:$0xff] }
 0x53f   :  { %3265 = vmatprep.subr.bf16.mxu0 %v2842_v47  ;;  %3387 = vmatprep.subr.bf16.mxu1 %v2844_v8  ;;  %v2946_v47 = vld [vmem:[#allocation6 + $0x668] sm:$0xff]  ;;  %v2948_v8 = vld [vmem:[#allocation6 + $0x678] sm:$0xff] }
 0x542   :  { %3266 = vmatpush1.bf16.msra.mxu0 %v2841_v30  ;;  %3388 = vmatpush1.bf16.msra.mxu1 %v2843_v22  ;;  %v2945_v30 = vld [vmem:[#allocation6 + $0x660] sm:$0xff]  ;;  %v2947_v22 = vld [vmem:[#allocation6 + $0x670] sm:$0xff] }
 0x543   :  { %3267 = vmatprep.subr.bf16.mxu0 %v2850_v63  ;;  %3389 = vmatprep.subr.bf16.mxu1 %v2852_v18  ;;  %v2954_v63 = vld [vmem:[#allocation6 + $0x6a8] sm:$0xff]  ;;  %v2956_v18 = vld [vmem:[#allocation6 + $0x6b8] sm:$0xff] }
 0x546   :  { %3268 = vmatpush1.bf16.msra.mxu0 %v2849_v48  ;;  %3390 = vmatpush1.bf16.msra.mxu1 %v2851_v4  ;;  %v2953_v48 = vld [vmem:[#allocation6 + $0x6a0] sm:$0xff]  ;;  %v2955_v4 = vld [vmem:[#allocation6 + $0x6b0] sm:$0xff] }
 0x547   :  { %3269 = vmatprep.subr.bf16.mxu0 %v2858_v1  ;;  %3391 = vmatprep.subr.bf16.mxu1 %v2860_v14  ;;  %v2962_v1 = vld [vmem:[#allocation6 + $0x6e8] sm:$0xff]  ;;  %v2964_v14 = vld [vmem:[#allocation6 + $0x6f8] sm:$0xff] }
 0x54a   :  { %3270 = vmatpush1.bf16.msra.mxu0 %v2857_v49  ;;  %3392 = vmatpush1.bf16.msra.mxu1 %v2859_v6  ;;  %v2961_v49 = vld [vmem:[#allocation6 + $0x6e0] sm:$0xff]  ;;  %v2963_v6 = vld [vmem:[#allocation6 + $0x6f0] sm:$0xff] }
 0x54b   :  { %3271 = vmatprep.subr.bf16.mxu0 %v2866_v29  ;;  %3393 = vmatprep.subr.bf16.mxu1 %v2868_v17  ;;  %v2970_v29 = vld [vmem:[#allocation6 + $0x728] sm:$0xff]  ;;  %v2972_v17 = vld [vmem:[#allocation6 + $0x738] sm:$0xff] }
 0x54e   :  { %3272 = vmatpush1.bf16.msra.mxu0 %v2865_v13  ;;  %3394 = vmatpush1.bf16.msra.mxu1 %v2867_v35  ;;  %v2969_v13 = vld [vmem:[#allocation6 + $0x720] sm:$0xff]  ;;  %v2971_v35 = vld [vmem:[#allocation6 + $0x730] sm:$0xff] }
 0x54f   :  { %3302 = vmatprep.subr.bf16.mxu0 %v2874_v33  ;;  %3424 = vmatprep.subr.bf16.mxu1 %v2876_v19  ;;  %v2978_v33 = vld [vmem:[#allocation6 + $0x768] sm:$0xff]  ;;  %v2980_v19 = vld [vmem:[#allocation6 + $0x778] sm:$0xff] }
 0x551   :  { %3274 = vmatmul.mubr.bf16.vlgmr.msra.gmra.mrb[44].mxu0 %v5583_v31  ;;  %3396 = vmatmul.mubr.bf16.vlgmr.msra.gmra.mrb[44].mxu1 %v5583_v31  ;;  %v2900_v31 = vld [vmem:[#allocation6 + $0x4f8] sm:$0xff] }
 0x552   :  { %3303 = vmatpush1.bf16.msra.mxu0 %v2873_v11  ;;  %3425 = vmatpush1.bf16.msra.mxu1 %v2875_v32  ;;  %v2977_v11 = vld [vmem:[#allocation6 + $0x760] sm:$0xff]  ;;  %v2979_v32 = vld [vmem:[#allocation6 + $0x770] sm:$0xff] }
 0x553   :  { %3304 = vmatprep.subr.bf16.mxu0 %v2882_v34  ;;  %3426 = vmatprep.subr.bf16.mxu1 %v2884_v5  ;;  %v2986_v34 = vld [vmem:[#allocation6 + $0x7a8] sm:$0xff]  ;;  %v2988_v5 = vld [vmem:[#allocation6 + $0x7b8] sm:$0xff] }
 0x554   :  { %3281 = vmatprep.mubr.bf16.mxu0 %v5587_v12  ;;  %3403 = vmatprep.mubr.bf16.mxu1 %v5587_v12  ;;  %v2908_v12 = vld [vmem:[#allocation6 + $0x538] sm:$0xff] }
 0x556   :  { %3305 = vmatpush1.bf16.msra.mxu0 %v2881_v24  ;;  %3427 = vmatpush1.bf16.msra.mxu1 %v2883_v41  ;;  %v2985_v24 = vld [vmem:[#allocation6 + $0x7a0] sm:$0xff]  ;;  %v2987_v41 = vld [vmem:[#allocation6 + $0x7b0] sm:$0xff] }
 0x557   :  { %3306 = vmatprep.subr.bf16.mxu0 %v2890_v40  ;;  %3428 = vmatprep.subr.bf16.mxu1 %v2892_v15  ;;  %v2994_v40 = vld [vmem:[#allocation6 + $0x7e8] sm:$0xff]  ;;  %v2996_v15 = vld [vmem:[#allocation6 + $0x7f8] sm:$0xff] }
 0x559   :  { %3282 = vmatmul.mubr.bf16.gmra.mrb[48].mxu0 %v5595_v28  ;;  %3404 = vmatmul.mubr.bf16.gmra.mrb[48].mxu1 %v5595_v28  ;;  %v2916_v28 = vld [vmem:[#allocation6 + $0x578] sm:$0xff] }
 0x55a   :  { %3307 = vmatpush1.bf16.msra.mxu0 %v2889_v3  ;;  %3429 = vmatpush1.bf16.msra.mxu1 %v2891_v60  ;;  %v2993_v3 = vld [vmem:[#allocation6 + $0x7e0] sm:$0xff]  ;;  %v2995_v60 = vld [vmem:[#allocation6 + $0x7f0] sm:$0xff] }
 0x55b   :  { %3308 = vmatprep.subr.bf16.mxu0 %v2898_v27  ;;  %3430 = vmatprep.subr.bf16.mxu1 %v2900_v31 }
 0x55c   :  { %3291 = vmatprep.mubr.bf16.mxu0 %v5599_v26  ;;  %3413 = vmatprep.mubr.bf16.mxu1 %v5599_v26  ;;  %v2924_v26 = vld [vmem:[#allocation6 + $0x5b8] sm:$0xff] }
 0x55e   :  { %3309 = vmatpush1.bf16.msra.mxu0 %v2897_v50  ;;  %3431 = vmatpush1.bf16.msra.mxu1 %v2899_v58 }
 0x55f   :  { %3310 = vmatprep.subr.bf16.mxu0 %v2906_v46  ;;  %3432 = vmatprep.subr.bf16.mxu1 %v2908_v12 }
 0x561   :  { %3292 = vmatmul.mubr.bf16.gmra.mrb[52].mxu0 %v5607_v9  ;;  %3414 = vmatmul.mubr.bf16.gmra.mrb[52].mxu1 %v5607_v9  ;;  %v2932_v9 = vld [vmem:[#allocation6 + $0x5f8] sm:$0xff] }
 0x562   :  { %3311 = vmatpush1.bf16.msra.mxu0 %v2905_v2  ;;  %3433 = vmatpush1.bf16.msra.mxu1 %v2907_v20 }
 0x563   :  { %3312 = vmatprep.subr.bf16.mxu0 %v2914_v42  ;;  %3434 = vmatprep.subr.bf16.mxu1 %v2916_v28 }
 0x564   :  { %3334 = vmatprep.mubr.bf16.mxu0 %v5611_v61  ;;  %3456 = vmatprep.mubr.bf16.mxu1 %v5611_v61  ;;  %v2937_v61 = vld [vmem:[#allocation6 + $0x620] sm:$0xff] }
 0x566   :  { %3313 = vmatpush1.bf16.msra.mxu0 %v2913_v37  ;;  %3435 = vmatpush1.bf16.msra.mxu1 %v2915_v53 }
 0x567   :  { %3314 = vmatprep.subr.bf16.mxu0 %v2922_v25  ;;  %3436 = vmatprep.subr.bf16.mxu1 %v2924_v26 }
 0x56a   :  { %3315 = vmatpush1.bf16.msra.mxu0 %v2921_v39  ;;  %3437 = vmatpush1.bf16.msra.mxu1 %v2923_v10 }
 0x56b   :  { %3316 = vmatprep.subr.bf16.mxu0 %v2930_v36  ;;  %3438 = vmatprep.subr.bf16.mxu1 %v2932_v9 }
 0x56e   :  { %3317 = vmatpush1.bf16.msra.mxu0 %v2929_v51  ;;  %3439 = vmatpush1.bf16.msra.mxu1 %v2931_v16 }
 0x56f   :  { %3318 = vmatprep.subr.bf16.mxu0 %v2938_v21  ;;  %3440 = vmatprep.subr.bf16.mxu1 %v2940_v7 }
 0x572   :  { %3319 = vmatpush1.bf16.msra.mxu0 %v2937_v61  ;;  %3441 = vmatpush1.bf16.msra.mxu1 %v2939_v44 }
 0x573   :  { %3320 = vmatprep.subr.bf16.mxu0 %v2946_v47  ;;  %3442 = vmatprep.subr.bf16.mxu1 %v2948_v8 }
 0x576   :  { %3321 = vmatpush1.bf16.msra.mxu0 %v2945_v30  ;;  %3443 = vmatpush1.bf16.msra.mxu1 %v2947_v22 }
 0x577   :  { %3322 = vmatprep.subr.bf16.mxu0 %v2954_v63  ;;  %3444 = vmatprep.subr.bf16.mxu1 %v2956_v18 }
 0x57a   :  { %3323 = vmatpush1.bf16.msra.mxu0 %v2953_v48  ;;  %3445 = vmatpush1.bf16.msra.mxu1 %v2955_v4 }
 0x57b   :  { %3324 = vmatprep.subr.bf16.mxu0 %v2962_v1  ;;  %3446 = vmatprep.subr.bf16.mxu1 %v2964_v14 }
 0x57e   :  { %3325 = vmatpush1.bf16.msra.mxu0 %v2961_v49  ;;  %3447 = vmatpush1.bf16.msra.mxu1 %v2963_v6 }
 0x57f   :  { %3326 = vmatprep.subr.bf16.mxu0 %v2970_v29  ;;  %3448 = vmatprep.subr.bf16.mxu1 %v2972_v17 }
 0x582   :  { %3327 = vmatpush1.bf16.msra.mxu0 %v2969_v13  ;;  %3449 = vmatpush1.bf16.msra.mxu1 %v2971_v35 }
 0x583   :  { %3328 = vmatprep.subr.bf16.mxu0 %v2978_v33  ;;  %3450 = vmatprep.subr.bf16.mxu1 %v2980_v19 }
 0x586   :  { %3329 = vmatpush1.bf16.msra.mxu0 %v2977_v11  ;;  %3451 = vmatpush1.bf16.msra.mxu1 %v2979_v32 }
 0x587   :  { %3330 = vmatprep.subr.bf16.mxu0 %v2986_v34  ;;  %3452 = vmatprep.subr.bf16.mxu1 %v2988_v5 }
 0x58a   :  { %3331 = vmatpush1.bf16.msra.mxu0 %v2985_v24  ;;  %3453 = vmatpush1.bf16.msra.mxu1 %v2987_v41 }
 0x58b   :  { %3332 = vmatprep.subr.bf16.mxu0 %v2994_v40  ;;  %3454 = vmatprep.subr.bf16.mxu1 %v2996_v15 }
 0x58e   :  { %3333 = vmatpush1.bf16.msra.mxu0 %v2993_v3  ;;  %3455 = vmatpush1.bf16.msra.mxu1 %v2995_v60 }
 0x591   :  { %3335 = vmatmul.mubr.bf16.vlgmr.msra.gmra.mrb[44].mxu0 %v5619_v23  ;;  %3457 = vmatmul.mubr.bf16.vlgmr.msra.gmra.mrb[44].mxu1 %v5619_v23 }
 0x592   :  { %3342 = vmatprep.mubr.bf16.mxu0 %v5623_v43  ;;  %3464 = vmatprep.mubr.bf16.mxu1 %v5623_v43 }
 0x599   :  { %3343 = vmatmul.mubr.bf16.gmra.mrb[48].mxu0 %v5631_v59  ;;  %3465 = vmatmul.mubr.bf16.gmra.mrb[48].mxu1 %v5631_v59 }
 0x59a   :  { %3352 = vmatprep.mubr.bf16.mxu0 %v5635_v0  ;;  %3474 = vmatprep.mubr.bf16.mxu1 %v5635_v0 }
 0x5a1   :  { %3353 = vmatmul.mubr.bf16.gmra.mrb[52].mxu0 %v5643_v38  ;;  %3475 = vmatmul.mubr.bf16.gmra.mrb[52].mxu1 %v5643_v38 }
 0x5e4   :  { %v5671_v27 = vpop.f32.mrb[32].mxu0  ;;  %v5673_v31 = vpop.f32.mrb[32].mxu1 }
 0x5e5   :  { %v5675_v23 = vpop.f32.mrb[33].mxu0  ;;  %v5677_v50 = vpop.f32.mrb[33].mxu1  ;;  %v3533_v16 = vmul.f32 %v5671_v27, %v5671_v27  ;;  %v3535_v21 = vmul.f32 %v5673_v31, %v5673_v31 }
 0x5e6   :  { %v5679_v43 = vpop.f32.mrb[34].mxu0  ;;  %v5681_v58 = vpop.f32.mrb[34].mxu1  ;;  %v3534_v7 = vmul.f32 %v5675_v23, %v5675_v23  ;;  %v3536_v61 = vmul.f32 %v5677_v50, %v5677_v50 }
 0x5e7   :  { %6374 = vst [vmem:[#allocation24_spill] sm:$0xff] %v5681_v58  ;;  %v5683_v59 = vpop.f32.mrb[35].mxu0  ;;  %v5685_v46 = vpop.f32.mrb[35].mxu1  ;;  %v3565_v44 = vmul.f32 %v5679_v43, %v5679_v43  ;;  %v3567_v47 = vmul.f32 %v5681_v58, %v5681_v58 }
 0x5e8   :  { %6375 = vst [vmem:[#allocation25_spill] sm:$0xff] %v5683_v59  ;;  %6376 = vst [vmem:[#allocation26_spill] sm:$0xff] %v5685_v46  ;;  %v3566_v8 = vmul.f32 %v5683_v59, %v5683_v59  ;;  %v3568_v30 = vmul.f32 %v5685_v46, %v5685_v46 }
 0x5ec   :  { %v5687_v0 = vpop.f32.mrb[36].mxu0  ;;  %v5689_v12 = vpop.f32.mrb[36].mxu1 }
 0x5ed   :  { %v5691_v38 = vpop.f32.mrb[37].mxu0  ;;  %v5693_v2 = vpop.f32.mrb[37].mxu1  ;;  %v3597_v18 = vmul.f32 %v5687_v0, %v5687_v0  ;;  %v5731_v48 = vmul.f32 %v5689_v12, %v5689_v12 }
 0x5ee   :  { %v5695_v20 = vpop.f32.mrb[38].mxu0  ;;  %v5697_v42 = vpop.f32.mrb[38].mxu1  ;;  %v5735_v4 = vmul.f32 %v5691_v38, %v5691_v38  ;;  %v5739_v1 = vmul.f32 %v5693_v2, %v5693_v2 }
 0x5ef   :  { %v5699_v28 = vpop.f32.mrb[39].mxu0  ;;  %v5701_v37 = vpop.f32.mrb[39].mxu1  ;;  %v5743_v6 = vmul.f32 %v5695_v20, %v5695_v20  ;;  %v5747_v29 = vmul.f32 %v5697_v42, %v5697_v42 }
 0x5f0   :  { %v5751_v17 = vmul.f32 %v5699_v28, %v5699_v28  ;;  %v5755_v13 = vmul.f32 %v5701_v37, %v5701_v37 }
 0x5f4   :  { %v5703_v53 = vpop.f32.mrb[40].mxu0  ;;  %v5705_v25 = vpop.f32.mrb[40].mxu1 }
 0x5f5   :  { %v5707_v26 = vpop.f32.mrb[41].mxu0  ;;  %v5709_v39 = vpop.f32.mrb[41].mxu1 }
 0x5f6   :  { %6377 = vst [vmem:[#allocation27_spill] sm:$0xff] %v5707_v26  ;;  %v3116_v10 = vpop.f32.mrb[42].mxu0  ;;  %v3238_v36 = vpop.f32.mrb[42].mxu1 }
 0x5f7   :  { %v3117_v9 = vpop.f32.mrb[43].mxu0  ;;  %v3239_v51 = vpop.f32.mrb[43].mxu1 }
 0x664   :  { %v3336_v22 = vpop.f32.mrb[44].mxu0  ;;  %v3458_v63 = vpop.f32.mrb[44].mxu1 }
 0x665   :  { %v3337_v14 = vpop.f32.mrb[45].mxu0  ;;  %v3459_v49 = vpop.f32.mrb[45].mxu1 }
 0x666   :  { %v5757_v35 = vpop.f32.mrb[46].mxu0  ;;  %v5759_v33 = vpop.f32.mrb[46].mxu1  ;;  %v5787_v49 = vmul.f32 %v5703_v53, %v5703_v53 }
 0x667   :  { %6378 = vst [vmem:[#allocation28_spill] sm:$0xff] %v5759_v33  ;;  %v3545_v19 = vadd.f32 %v5757_v35, %v5671_v27  ;;  %v3549_v11 = vmul.f32 %v5757_v35, %v5757_v35  ;;  %v3547_v32 = vadd.f32 %v5759_v33, %v5673_v31  ;;  %v3551_v34 = vmul.f32 %v5759_v33, %v5759_v33  ;;  %v5769_v5 = vpop.f32.mrb[47].mxu0  ;;  %v5771_v24 = vpop.f32.mrb[47].mxu1 }
 0x668   :  { %v3546_v41 = vadd.f32 %v5769_v5, %v5675_v23  ;;  %v3550_v40 = vmul.f32 %v5769_v5, %v5769_v5  ;;  %v3548_v15 = vadd.f32 %v5771_v24, %v5677_v50  ;;  %v3552_v3 = vmul.f32 %v5771_v24, %v5771_v24 }
 0x669   :  { %v3553_v60 = vadd.f32 %v3549_v11, %v3533_v16  ;;  %v3555_v10 = vadd.f32 %v3551_v34, %v3535_v21  ;;  %v3561_v36 = vadd.f32 %v3545_v19, %v5679_v43  ;;  %v3563_v9 = vadd.f32 %v3547_v32, %v5681_v58 }
 0x66a   :  { %v3554_v51 = vadd.f32 %v3550_v40, %v3534_v7  ;;  %v3556_v22 = vadd.f32 %v3552_v3, %v3536_v61  ;;  %v3562_v63 = vadd.f32 %v3546_v41, %v5683_v59  ;;  %v3564_v14 = vadd.f32 %v3548_v15, %v5685_v46 }
 0x66b   :  { %v5791_v33 = vmul.f32 %v5705_v25, %v5705_v25  ;;  %v3569_v16 = vadd.f32 %v3565_v44, %v3553_v60  ;;  %v3571_v21 = vadd.f32 %v3567_v47, %v3555_v10  ;;  %v5795_v19 = vmul.f32 %v5707_v26, %v5707_v26 }
 0x66c   :  { %v5799_v7 = vmul.f32 %v5709_v39, %v5709_v39  ;;  %v5801_v61 = vpop.f32.mrb[48].mxu0  ;;  %v5803_v11 = vpop.f32.mrb[48].mxu1  ;;  %v3570_v32 = vadd.f32 %v3566_v8, %v3554_v51  ;;  %v3572_v34 = vadd.f32 %v3568_v30, %v3556_v22 }
 0x66d   :  { %6379 = vst [vmem:[#allocation29_spill] sm:$0xff] %v5801_v61  ;;  %6380 = vst [vmem:[#allocation30_spill] sm:$0xff] %v5803_v11  ;;  %v3577_v41 = vadd.f32 %v3561_v36, %v5801_v61  ;;  %v3581_v44 = vmul.f32 %v5801_v61, %v5801_v61  ;;  %v3579_v47 = vadd.f32 %v3563_v9, %v5803_v11  ;;  %v5811_v15 = vpop.f32.mrb[49].mxu0  ;;  %v5813_v3 = vpop.f32.mrb[49].mxu1 }
 0x66e   :  { %v3583_v40 = vmul.f32 %v5803_v11, %v5803_v11  ;;  %6381 = vst [vmem:[#allocation31_spill] sm:$0xff] %v5811_v15  ;;  %6382 = vst [vmem:[#allocation32_spill] sm:$0xff] %v5813_v3  ;;  %v3578_v60 = vadd.f32 %v3562_v63, %v5811_v15  ;;  %v3582_v8 = vmul.f32 %v5811_v15, %v5811_v15  ;;  %v5821_v36 = vpop.f32.mrb[50].mxu0  ;;  %v5823_v9 = vpop.f32.mrb[50].mxu1 }
 0x66f   :  { %v3580_v30 = vadd.f32 %v3564_v14, %v5813_v3  ;;  %v3584_v10 = vmul.f32 %v5813_v3, %v5813_v3  ;;  %v3585_v51 = vadd.f32 %v3581_v44, %v3569_v16  ;;  %v3593_v11 = vadd.f32 %v3577_v41, %v5687_v0  ;;  %v5828_v63 = vpop.f32.mrb[51].mxu0  ;;  %v5830_v46 = vpop.f32.mrb[51].mxu1 }
 0x670   :  { %v3587_v22 = vadd.f32 %v3583_v40, %v3571_v21  ;;  %v3613_v61 = vmul.f32 %v5821_v36, %v5821_v36  ;;  %v3586_v15 = vadd.f32 %v3582_v8, %v3570_v32  ;;  %v3595_v58 = vadd.f32 %v3579_v47, %v5689_v12 }
 0x671   :  { %v3588_v14 = vadd.f32 %v3584_v10, %v3572_v34  ;;  %v3615_v3 = vmul.f32 %v5823_v9, %v5823_v9  ;;  %v3601_v59 = vadd.f32 %v3597_v18, %v3585_v51  ;;  %v3609_v16 = vadd.f32 %v3593_v11, %v5821_v36 }
 0x672   :  { %v3603_v21 = vadd.f32 %v5731_v48, %v3587_v22  ;;  %v3594_v41 = vadd.f32 %v3578_v60, %v5691_v38  ;;  %v3611_v44 = vadd.f32 %v3595_v58, %v5823_v9  ;;  %v3602_v40 = vadd.f32 %v5735_v4, %v3586_v15 }
 0x673   :  { %v3614_v32 = vmul.f32 %v5828_v63, %v5828_v63  ;;  %v3596_v34 = vadd.f32 %v3580_v30, %v5693_v2  ;;  %v3617_v47 = vadd.f32 %v3613_v61, %v3601_v59  ;;  %v3604_v18 = vadd.f32 %v5739_v1, %v3588_v14 }
 0x674   :  { %v3619_v8 = vadd.f32 %v3615_v3, %v3603_v21  ;;  %v3610_v10 = vadd.f32 %v3594_v41, %v5828_v63  ;;  %v3616_v60 = vmul.f32 %v5830_v46, %v5830_v46  ;;  %v5848_v58 = vpop.f32.mrb[52].mxu0  ;;  %v3625_v4 = vadd.f32 %v3609_v16, %v5695_v20  ;;  %v5851_v15 = vpop.f32.mrb[52].mxu1 }
 0x675   :  { %v3618_v11 = vadd.f32 %v3614_v32, %v3602_v40  ;;  %v3612_v48 = vadd.f32 %v3596_v34, %v5830_v46  ;;  %6383 = vst [vmem:[#allocation33_spill] sm:$0xff] %v5851_v15  ;;  %v3633_v30 = vadd.f32 %v5743_v6, %v3617_v47  ;;  %v3645_v59 = vmul.f32 %v5848_v58, %v5848_v58  ;;  %v5858_v3 = vpop.f32.mrb[53].mxu0  ;;  %v5860_v51 = vpop.f32.mrb[53].mxu1 }
 0x676   :  { %v3627_v61 = vadd.f32 %v3611_v44, %v5697_v42  ;;  %v3635_v1 = vadd.f32 %v5747_v29, %v3619_v8  ;;  %6384 = vst [vmem:[#allocation34_spill] sm:$0xff] %v5860_v51  ;;  %v3620_v22 = vadd.f32 %v3616_v60, %v3604_v18  ;;  %v3641_v14 = vadd.f32 %v3625_v4, %v5848_v58  ;;  %v5866_v6 = vpop.f32.mrb[54].mxu0  ;;  %v5868_v41 = vpop.f32.mrb[54].mxu1 }
 0x677   :  { %v3647_v16 = vmul.f32 %v5851_v15, %v5851_v15  ;;  %v3626_v21 = vadd.f32 %v3610_v10, %v5699_v28  ;;  %6385 = vst [vmem:[#allocation35_spill] sm:$0xff] %v5868_v41  ;;  %v3649_v40 = vadd.f32 %v3645_v59, %v3633_v30  ;;  %v3634_v29 = vadd.f32 %v5751_v17, %v3618_v11  ;;  %v5874_v34 = vpop.f32.mrb[55].mxu0  ;;  %v5876_v47 = vpop.f32.mrb[55].mxu1 }
 0x678   :  { %v3643_v44 = vadd.f32 %v3627_v61, %v5851_v15  ;;  %v3646_v32 = vmul.f32 %v5858_v3, %v5858_v3  ;;  %6386 = vst [vmem:[#allocation36_spill] sm:$0xff] %v5876_v47  ;;  %v3628_v10 = vadd.f32 %v3612_v48, %v5701_v37  ;;  %v3636_v60 = vadd.f32 %v5755_v13, %v3620_v22 }
 0x679   :  { %v3651_v8 = vadd.f32 %v3647_v16, %v3635_v1  ;;  %v3642_v18 = vadd.f32 %v3626_v21, %v5858_v3  ;;  %v3648_v30 = vmul.f32 %v5860_v51, %v5860_v51  ;;  %v3677_v17 = vmul.f32 %v5866_v6, %v5866_v6 }
 0x67a   :  { %v3650_v4 = vadd.f32 %v3646_v32, %v3634_v29  ;;  %v3679_v11 = vmul.f32 %v5868_v41, %v5868_v41  ;;  %v3644_v59 = vadd.f32 %v3628_v10, %v5860_v51  ;;  %v3678_v1 = vmul.f32 %v5874_v34, %v5874_v34 }
 0x67b   :  { %v3658_v61 = vadd.f32 %v3642_v18, %v5707_v26  ;;  %v3680_v13 = vmul.f32 %v5876_v47, %v5876_v47  ;;  %v3652_v48 = vadd.f32 %v3648_v30, %v3636_v60  ;;  %v3659_v16 = vadd.f32 %v3643_v44, %v5705_v25 }
 0x67c   :  { %v3666_v22 = vadd.f32 %v5795_v19, %v3650_v4  ;;  %v3657_v21 = vadd.f32 %v3641_v14, %v5703_v53  ;;  %v3660_v32 = vadd.f32 %v3644_v59, %v5709_v39  ;;  %v3665_v10 = vadd.f32 %v5787_v49, %v3649_v40 }
 0x67d   :  { %v3674_v29 = vadd.f32 %v3658_v61, %v5874_v34  ;;  %v3667_v18 = vadd.f32 %v5791_v33, %v3651_v8  ;;  %v3668_v51 = vadd.f32 %v5799_v7, %v3652_v48  ;;  %v3675_v15 = vadd.f32 %v3659_v16, %v5868_v41 }
 0x67e   :  { %v3682_v26 = vadd.f32 %v3678_v1, %v3666_v22  ;;  %v3673_v60 = vadd.f32 %v3657_v21, %v5866_v6  ;;  %v3676_v19 = vadd.f32 %v3660_v32, %v5876_v47  ;;  %v3681_v44 = vadd.f32 %v3677_v17, %v3665_v10 }
 0x67f   :  { %v3683_v4 = vadd.f32 %v3679_v11, %v3667_v18  ;;  %v3684_v14 = vadd.f32 %v3680_v13, %v3668_v51  ;;  %v3687_v30 = vmul.f32 %v5124_v62, %v3675_v15  ;;  %v3686_v33 = vmul.f32 %v5124_v62, %v3674_v29 }
 0x680   :  { %v3685_v59 = vmul.f32 %v5124_v62, %v3673_v60  ;;  %v3688_v49 = vmul.f32 %v5124_v62, %v3676_v19  ;;  %v3729_v7 = vmul.f32 %v5124_v62, %v3682_v26  ;;  %v3728_v40 = vmul.f32 %v5124_v62, %v3681_v44 }
 0x681   :  { %3693 = vrot.lane.b32.xlu1 %v3687_v30, %s4937_s8  ;;  %v3731_v51 = vmul.f32 %v5124_v62, %v3684_v14  ;;  %v3730_v15 = vmul.f32 %v5124_v62, %v3683_v4 }
 0x682   :  { %3689 = vrot.lane.b32.xlu0 %v3685_v59, %s4937_s8 }
 0x685   :  { %3695 = vrot.lane.b32.xlu1 %v3688_v49, %s4937_s8 }
 0x686   :  { %3691 = vrot.lane.b32.xlu0 %v3686_v33, %s4937_s8 }
 0x689   :  { %3734 = vrot.lane.b32.xlu1 %v3729_v7, %s4937_s8 }
 0x68a   :  { %3732 = vrot.lane.b32.xlu0 %v3728_v40, %s4937_s8 }
 0x68d   :  { %3738 = vrot.lane.b32.xlu1 %v3731_v51, %s4937_s8 }
 0x68e   :  { %3736 = vrot.lane.b32.xlu0 %v3730_v15, %s4937_s8 }
 0x6f3   :  { %v3694_v8 = vpop.permute.xlu1 %3693 }
 0x6f4   :  { %v3690_v17 = vpop.permute.xlu0 %3689 }
 0x6f7   :  { %v3696_v11 = vpop.permute.xlu1 %3695 }
 0x6f8   :  { %v3692_v61 = vpop.permute.xlu0 %3691  ;;  %v3701_v1 = vsel %vm3697_vm2, %v3696_v11, %v3690_v17  ;;  %v3698_v22 = vsel %vm3697_vm2, %v3694_v8, %v3696_v11 }
 0x6f9   :  { %v3700_v26 = vsel %vm3697_vm2, %v3690_v17, %v3692_v61  ;;  %v3702_v13 = vadd.f32 %v3701_v1, %v3685_v59  ;;  %v3699_v16 = vsel %vm3697_vm2, %v3692_v61, %v3694_v8  ;;  %v3705_v32 = vadd.f32 %v3698_v22, %v3688_v49 }
 0x6fa   :  { %v3703_v48 = vadd.f32 %v3700_v26, %v3686_v33  ;;  %v3704_v10 = vadd.f32 %v3699_v16, %v3687_v30 }
 0x6fb   :  { %v3735_v21 = vpop.permute.xlu1 %3734  ;;  %3706 = vrot.lane.b32.xlu0 %v3702_v13, %s4921_s28 }
 0x6fc   :  { %3708 = vrot.lane.b32.xlu1 %v3703_v48, %s4921_s28  ;;  %v3733_v29 = vpop.permute.xlu0 %3732 }
 0x6fd   :  { %v3742_v18 = vsel %vm3697_vm2, %v3733_v29, %v3735_v21 }
 0x6fe   :  { %v3745_v14 = vadd.f32 %v3742_v18, %v3729_v7 }
 0x6ff   :  { %v3739_v60 = vpop.permute.xlu1 %3738  ;;  %3710 = vrot.lane.b32.xlu0 %v3704_v10, %s4921_s28 }
 0x700   :  { %3712 = vrot.lane.b32.xlu1 %v3705_v32, %s4921_s28  ;;  %v3737_v19 = vpop.permute.xlu0 %3736  ;;  %v3743_v44 = vsel %vm3697_vm2, %v3739_v60, %v3733_v29 }
 0x701   :  { %v3744_v4 = vadd.f32 %v3743_v44, %v3728_v40  ;;  %v3740_v59 = vsel %vm3697_vm2, %v3737_v19, %v3739_v60  ;;  %v3741_v30 = vsel %vm3697_vm2, %v3735_v21, %v3737_v19 }
 0x702   :  { %v3746_v33 = vadd.f32 %v3741_v30, %v3730_v15  ;;  %v3747_v49 = vadd.f32 %v3740_v59, %v3731_v51 }
 0x703   :  { %3748 = vrot.lane.b32.xlu0 %v3744_v4, %s4921_s28 }
 0x704   :  { %3750 = vrot.lane.b32.xlu1 %v3745_v14, %s4921_s28 }
 0x707   :  { %3752 = vrot.lane.b32.xlu0 %v3746_v33, %s4921_s28 }
 0x708   :  { %3754 = vrot.lane.b32.xlu1 %v3747_v49, %s4921_s28 }
 0x76d   :  { %v3707_v17 = vpop.permute.xlu0 %3706 }
 0x76e   :  { %v3709_v8 = vpop.permute.xlu1 %3708 }
 0x76f   :  { %v3716_v7 = vsel %vm2386_vm1, %v3707_v17, %v3709_v8 }
 0x770   :  { %v3719_v15 = vadd.f32 %v3716_v7, %v3703_v48 }
 0x771   :  { %v3711_v11 = vpop.permute.xlu0 %3710 }
 0x772   :  { %v3713_v40 = vpop.permute.xlu1 %3712  ;;  %v3715_v51 = vsel %vm2386_vm1, %v3709_v8, %v3711_v11 }
 0x773   :  { %v3717_v61 = vsel %vm2386_vm1, %v3713_v40, %v3707_v17  ;;  %v3714_v1 = vsel %vm2386_vm1, %v3711_v11, %v3713_v40  ;;  %v3720_v22 = vadd.f32 %v3715_v51, %v3704_v10 }
 0x774   :  { %v3718_v26 = vadd.f32 %v3717_v61, %v3702_v13  ;;  %v3721_v16 = vadd.f32 %v3714_v1, %v3705_v32 }
 0x775   :  { %v3724_v18 = vadd.f32 %v3720_v22, %v3719_v15  ;;  %v3749_v44 = vpop.permute.xlu0 %3748 }
 0x776   :  { %v3723_v21 = vadd.f32 %v3719_v15, %v3718_v26  ;;  %v3722_v29 = vadd.f32 %v3721_v16, %v3718_v26  ;;  %v3725_v60 = vadd.f32 %v3721_v16, %v3720_v22  ;;  %v3751_v19 = vpop.permute.xlu1 %3750 }
 0x777   :  { %v3758_v17 = vsel %vm2386_vm1, %v3749_v44, %v3751_v19 }
 0x778   :  { %v3726_v59 = vadd.f32 %v3724_v18, %v3722_v29  ;;  %v3727_v30 = vadd.f32 %v3725_v60, %v3723_v21  ;;  %v3761_v8 = vadd.f32 %v3758_v17, %v3745_v14 }
 0x779   :  { %v3753_v41 = vpop.permute.xlu0 %3752 }
 0x77a   :  { %v3770_v62 = vrot.slane %v3726_v59, 4  ;;  %v3776_v40 = vrot.slane %v3727_v30, 4  ;;  %v3755_v47 = vpop.permute.xlu1 %3754  ;;  %v3757_v32 = vsel %vm2386_vm1, %v3751_v19, %v3753_v41 }
 0x77b   :  { %v3759_v13 = vsel %vm2386_vm1, %v3755_v47, %v3749_v44  ;;  %v3756_v48 = vsel %vm2386_vm1, %v3753_v41, %v3755_v47  ;;  %v3762_v61 = vadd.f32 %v3757_v32, %v3746_v33 }
 0x77c   :  { %v3771_v10 = vadd.f32 %v3770_v62, %v3726_v59  ;;  %v3777_v7 = vadd.f32 %v3776_v40, %v3727_v30  ;;  %v3760_v11 = vadd.f32 %v3759_v13, %v3744_v4  ;;  %v3763_v1 = vadd.f32 %v3756_v48, %v3747_v49 }
 0x77d   :  { %v3766_v22 = vadd.f32 %v3762_v61, %v3761_v8 }
 0x77e   :  { %v3772_v51 = vrot.slane %v3771_v10, 2  ;;  %v3778_v15 = vrot.slane %v3777_v7, 2  ;;  %v3765_v26 = vadd.f32 %v3761_v8, %v3760_v11  ;;  %v3764_v16 = vadd.f32 %v3763_v1, %v3760_v11 }
 0x77f   :  { %v3767_v14 = vadd.f32 %v3763_v1, %v3762_v61 }
 0x780   :  { %v3773_v21 = vadd.f32 %v3772_v51, %v3771_v10  ;;  %v3779_v29 = vadd.f32 %v3778_v15, %v3777_v7  ;;  %v3768_v18 = vadd.f32 %v3766_v22, %v3764_v16 }
 0x781   :  { %v3769_v60 = vadd.f32 %v3767_v14, %v3765_v26 }
 0x782   :  { %v3774_v44 = vrot.slane %v3773_v21, 1  ;;  %v3780_v47 = vrot.slane %v3779_v29, 1  ;;  %v3782_v17 = vrot.slane %v3768_v18, 4 }
 0x783   :  { %v3788_v57 = vrot.slane %v3769_v60, 4 }
 0x784   :  { %v3783_v41 = vadd.f32 %v3782_v17, %v3768_v18  ;;  %v3775_v19 = vadd.f32 %v3774_v44, %v3773_v21  ;;  %v3781_v4 = vadd.f32 %v3780_v47, %v3779_v29  ;;  %v3804_v47 = vld [vmem:[%s6355_s9] sm:$0xf] }
 0x785   :  { %v3789_v62 = vadd.f32 %v3788_v57, %v3769_v60 }
 0x786   :  { %v3784_v33 = vrot.slane %v3783_v41, 2  ;;  %v3794_v40 = vmul.f32 0.003125, %v3775_v19  ;;  %v3795_v8 = vmul.f32 0.003125, %v3781_v4 }
 0x787   :  { %v3790_v49 = vrot.slane %v3789_v62, 2 }
 0x788   :  { %v3785_v59 = vadd.f32 %v3784_v33, %v3783_v41  ;;  %v3798_v7 = vmul.f32 %v3794_v40, %v3794_v40  ;;  %v3799_v11 = vmul.f32 %v3795_v8, %v3795_v8 }
 0x789   :  { %v3791_v30 = vadd.f32 %v3790_v49, %v3789_v62 }
 0x78a   :  { %v3786_v13 = vrot.slane %v3785_v59, 1 }
 0x78b   :  { %v3792_v48 = vrot.slane %v3791_v30, 1 }
 0x78c   :  { %v3787_v32 = vadd.f32 %v3786_v13, %v3785_v59 }
 0x78d   :  { %v3793_v10 = vadd.f32 %v3792_v48, %v3791_v30 }
 0x78e   :  { %v3796_v61 = vmul.f32 0.003125, %v3787_v32 }
 0x78f   :  { %v3797_v1 = vmul.f32 0.003125, %v3793_v10 }
 0x790   :  { %v3800_v51 = vsub.f32 %v3796_v61, %v3798_v7 }
 0x791   :  { %v3801_v15 = vsub.f32 %v3797_v1, %v3799_v11 }
 0x792   :  { %v3802_v26 = vmax.f32 %v3800_v51, 0.0  ;;  %v6387_v51 = vld [vmem:[#allocation28_spill] sm:$0xff] }
 0x793   :  { %v3803_v22 = vmax.f32 %v3801_v15, 0.0 }
 0x794   :  { %v3805_v16 = vadd.f32 1e-05, %v3802_v26 }
 0x795   :  { %v3806_v14 = vadd.f32 1e-05, %v3803_v22  ;;  %v6389_v22 = vld [vmem:[#allocation24_spill] sm:$0xff] }
 0x796   :  { %4823 = vrsqrt.f32 %v3805_v16 }
 0x797   :  { %4825 = vrsqrt.f32 %v3806_v14 }
 0x7a0   :  { %v4824_v21 = vpop.eup %4823 }
 0x7a1   :  { %v4826_v29 = vpop.eup %4825 }
 0x7a2   :  { %v3811_v18 = vcombine.low %v4824_v21, %v4826_v29 }
 0x7a4   :  { %v3818_v60 = vrot.slane %v3811_v18, %v5155_v45 }
 0x7a6   :  { %v3819_v44 = vcombine.low %v3818_v60, %v3818_v60  ;;  %v6394_v60 = vld [vmem:[#allocation32_spill] sm:$0xff] }
 0x7a8   :  { %v3826_v17 = vrot.slane %v3819_v44, %v5155_v45 }
 0x7aa   :  { %v3828_v57 = vmul.f32 %v3826_v17, %v3804_v47 }
 0x7ac   :  { %v3834_v41 = vrot.slane %v3828_v57, %v5162_v52  ;;  %v3838_v62 = vrot.slane %v3828_v57, %v5166_v54  ;;  %v3842_v19 = vrot.slane %v3828_v57, %v5169_v55  ;;  %v3846_v4 = vrot.slane %v3828_v57, %v5172_v56  ;;  %v3829_v57 = vld [vmem:[%s6356_s10] sm:$0xf] }
 0x7ae   :  { %v3851_v33 = vmul.f32 %v3834_v41, %v3794_v40  ;;  %v3852_v49 = vmul.f32 %v3838_v62, %v3795_v8  ;;  %v3853_v59 = vmul.f32 %v3842_v19, %v3794_v40  ;;  %v3854_v30 = vmul.f32 %v3846_v4, %v3795_v8 }
 0x7af   :  { %v3885_v13 = vmul.f32 %v3834_v41, %v5671_v27  ;;  %v3886_v48 = vmul.f32 %v3838_v62, %v5675_v23  ;;  %v3887_v32 = vmul.f32 %v3842_v19, %v5673_v31  ;;  %v3888_v11 = vmul.f32 %v3846_v4, %v5677_v50  ;;  %v6388_v31 = vld [vmem:[#allocation25_spill] sm:$0xff] }
 0x7b0   :  { %v3859_v10 = vcombine.low %v3851_v33, %v3852_v49  ;;  %v3860_v7 = vcombine.low %v3853_v59, %v3854_v30  ;;  %v3930_v61 = vmul.f32 %v3834_v41, %v5757_v35  ;;  %v3931_v1 = vmul.f32 %v3838_v62, %v5769_v5  ;;  %v6390_v35 = vld [vmem:[#allocation26_spill] sm:$0xff]  ;;  %v6391_v5 = vld [vmem:[#allocation29_spill] sm:$0xff] }
 0x7b1   :  { %v3932_v15 = vmul.f32 %v3842_v19, %v6387_v51  ;;  %v3933_v26 = vmul.f32 %v3846_v4, %v5771_v24  ;;  %v5971_v40 = vmul.f32 %v3834_v41, %v5679_v43  ;;  %v5976_v8 = vmul.f32 %v3838_v62, %v6388_v31  ;;  %v6392_v24 = vld [vmem:[#allocation31_spill] sm:$0xff]  ;;  %v6393_v43 = vld [vmem:[#allocation30_spill] sm:$0xff] }
 0x7b2   :  { %v3867_v27 = vrot.slane %v3859_v10, %v5155_v45  ;;  %v3874_v23 = vrot.slane %v3860_v7, %v5155_v45  ;;  %v5979_v50 = vmul.f32 %v3842_v19, %v6389_v22  ;;  %v5982_v16 = vmul.f32 %v3846_v4, %v6390_v35 }
 0x7b3   :  { %v5985_v14 = vmul.f32 %v3834_v41, %v6391_v5  ;;  %v5988_v21 = vmul.f32 %v3838_v62, %v6392_v24  ;;  %v5991_v29 = vmul.f32 %v3842_v19, %v6393_v43  ;;  %v5994_v44 = vmul.f32 %v3846_v4, %v6394_v60 }
 0x7b4   :  { %v3875_v18 = vcombine.low %v3867_v27, %v3874_v23  ;;  %v5997_v47 = vmul.f32 %v3834_v41, %v5687_v0  ;;  %v6000_v17 = vmul.f32 %v3838_v62, %v5691_v38  ;;  %v6006_v33 = vmul.f32 %v3842_v19, %v5689_v12 }
 0x7b5   :  { %v6009_v49 = vmul.f32 %v3846_v4, %v5693_v2  ;;  %v6012_v59 = vmul.f32 %v3834_v41, %v5821_v36  ;;  %v6015_v30 = vmul.f32 %v3838_v62, %v5828_v63  ;;  %v6019_v38 = vmul.f32 %v3842_v19, %v5823_v9 }
 0x7b6   :  { %v3882_v0 = vrot.slane %v3875_v18, %v5155_v45  ;;  %v6022_v10 = vmul.f32 %v3846_v4, %v5830_v46  ;;  %v6025_v12 = vmul.f32 %v3834_v41, %v5695_v20  ;;  %v6028_v2 = vmul.f32 %v3838_v62, %v5699_v28  ;;  %v6395_v46 = vld [vmem:[#allocation33_spill] sm:$0xff]  ;;  %v6396_v20 = vld [vmem:[#allocation34_spill] sm:$0xff] }
 0x7b7   :  { %v6031_v36 = vmul.f32 %v3842_v19, %v5697_v42  ;;  %v6034_v63 = vmul.f32 %v3846_v4, %v5701_v37  ;;  %v6037_v45 = vmul.f32 %v3834_v41, %v5848_v58  ;;  %v6040_v7 = vmul.f32 %v3838_v62, %v5858_v3  ;;  %v6397_v42 = vld [vmem:[#allocation27_spill] sm:$0xff] }
 0x7b8   :  { %v3884_v9 = vsub.f32 %v3829_v57, %v3882_v0  ;;  %v6043_v51 = vmul.f32 %v3842_v19, %v6395_v46  ;;  %v6046_v27 = vmul.f32 %v3846_v4, %v6396_v20  ;;  %v6049_v28 = vmul.f32 %v3834_v41, %v5703_v53 }
 0x7b9   :  { %v6052_v23 = vmul.f32 %v3838_v62, %v6397_v42  ;;  %v6055_v37 = vmul.f32 %v3842_v19, %v5705_v25  ;;  %v6058_v58 = vmul.f32 %v3846_v4, %v5709_v39  ;;  %v6073_v35 = vmul.f32 %v3834_v41, %v5866_v6  ;;  %v6398_v39 = vld [vmem:[#allocation35_spill] sm:$0xff] }
 0x7ba   :  { %v6061_v3 = vrot.slane %v3884_v9, %v5162_v52  ;;  %v6064_v31 = vrot.slane %v3884_v9, %v5166_v54  ;;  %v6067_v22 = vrot.slane %v3884_v9, %v5169_v55  ;;  %v6070_v53 = vrot.slane %v3884_v9, %v5172_v56  ;;  %v6399_v52 = vld [vmem:[#allocation36_spill] sm:$0xff]  ;;  %v6400_v9 = vld [vmem:[#allocation23_spill] sm:$0xff] }
 0x7bb   :  { %v6076_v25 = vmul.f32 %v3838_v62, %v5874_v34  ;;  %v6079_v5 = vmul.f32 %v3842_v19, %v6398_v39  ;;  %v6082_v24 = vmul.f32 %v3846_v4, %v6399_v52 }
 0x7bc   :  { %v3910_v54 = vadd.f32 %v6061_v3, %v3885_v13  ;;  %v3911_v55 = vadd.f32 %v6064_v31, %v3886_v48  ;;  %v3912_v43 = vadd.f32 %v6067_v22, %v3887_v32  ;;  %v3913_v56 = vadd.f32 %v6070_v53, %v3888_v11 }
 0x7bd   :  { %v3934_v6 = vadd.f32 %v3930_v61, %v6061_v3  ;;  %v3935_v41 = vadd.f32 %v3931_v1, %v6064_v31  ;;  %v3936_v34 = vadd.f32 %v3932_v15, %v6067_v22  ;;  %v3937_v62 = vadd.f32 %v3933_v26, %v6070_v53 }
 0x7be   :  { %v3914_v19 = vmax.f32 %v3910_v54, 0.0  ;;  %v3915_v18 = vmax.f32 %v3911_v55, 0.0  ;;  %v3916_v4 = vmax.f32 %v3912_v43, 0.0  ;;  %v3917_v60 = vmax.f32 %v3913_v56, 0.0 }
 0x7bf   :  { %v3938_v57 = vmax.f32 %v3934_v6, 0.0  ;;  %v3939_v13 = vmax.f32 %v3935_v41, 0.0  ;;  %v3940_v0 = vmax.f32 %v3936_v34, 0.0  ;;  %v3941_v48 = vmax.f32 %v3937_v62, 0.0 }
 0x7c0   :  { %v6093_v32 = vmul.f32 %v6400_v9, %v3914_v19  ;;  %v6096_v11 = vmul.f32 %v6400_v9, %v3915_v18  ;;  %v6099_v61 = vmul.f32 %v6400_v9, %v3916_v4  ;;  %v6102_v1 = vmul.f32 %v6400_v9, %v3917_v60 }
 0x7c1   :  { %v6105_v15 = vmul.f32 %v6400_v9, %v3938_v57  ;;  %v6108_v26 = vmul.f32 %v6400_v9, %v3939_v13  ;;  %v6111_v46 = vmul.f32 %v6400_v9, %v3940_v0  ;;  %v6114_v20 = vmul.f32 %v6400_v9, %v3941_v48 }
 0x7c2   :  { %v3958_v42 = vadd.f32 %v5971_v40, %v6061_v3  ;;  %v3959_v39 = vadd.f32 %v5976_v8, %v6064_v31  ;;  %v3960_v52 = vadd.f32 %v5979_v50, %v6067_v22  ;;  %v3961_v54 = vadd.f32 %v5982_v16, %v6070_v53 }
 0x7c3   :  { %v3982_v55 = vadd.f32 %v5985_v14, %v6061_v3  ;;  %v3983_v43 = vadd.f32 %v5988_v21, %v6064_v31  ;;  %v3984_v56 = vadd.f32 %v5991_v29, %v6067_v22  ;;  %v3985_v40 = vadd.f32 %v5994_v44, %v6070_v53 }
 0x7c4   :  { %v3962_v6 = vmax.f32 %v3958_v42, 0.0  ;;  %v3963_v8 = vmax.f32 %v3959_v39, 0.0  ;;  %v3964_v41 = vmax.f32 %v3960_v52, 0.0  ;;  %v3965_v34 = vmax.f32 %v3961_v54, 0.0 }
 0x7c5   :  { %v3986_v50 = vmax.f32 %v3982_v55, 0.0  ;;  %v3987_v62 = vmax.f32 %v3983_v43, 0.0  ;;  %v3988_v19 = vmax.f32 %v3984_v56, 0.0  ;;  %v3989_v16 = vmax.f32 %v3985_v40, 0.0 }
 0x7c6   :  { %v6133_v18 = vmul.f32 %v6400_v9, %v3962_v6  ;;  %v6136_v14 = vmul.f32 %v6400_v9, %v3963_v8  ;;  %v6139_v21 = vmul.f32 %v6400_v9, %v3964_v41  ;;  %v6142_v29 = vmul.f32 %v6400_v9, %v3965_v34 }
 0x7c7   :  { %v6145_v44 = vmul.f32 %v6400_v9, %v3986_v50  ;;  %v6148_v4 = vmul.f32 %v6400_v9, %v3987_v62  ;;  %v6151_v60 = vmul.f32 %v6400_v9, %v3988_v19  ;;  %v6154_v57 = vmul.f32 %v6400_v9, %v3989_v16 }
 0x7c8   :  { %v4006_v13 = vadd.f32 %v5997_v47, %v6061_v3  ;;  %v4007_v0 = vadd.f32 %v6000_v17, %v6064_v31  ;;  %v4008_v48 = vadd.f32 %v6006_v33, %v6067_v22  ;;  %v4009_v42 = vadd.f32 %v6009_v49, %v6070_v53 }
 0x7c9   :  { %v4030_v39 = vadd.f32 %v6012_v59, %v6061_v3  ;;  %v4031_v52 = vadd.f32 %v6015_v30, %v6064_v31  ;;  %v4032_v54 = vadd.f32 %v6019_v38, %v6067_v22  ;;  %v4033_v47 = vadd.f32 %v6022_v10, %v6070_v53 }
 0x7ca   :  { %v4010_v55 = vmax.f32 %v4006_v13, 0.0  ;;  %v4011_v17 = vmax.f32 %v4007_v0, 0.0  ;;  %v4012_v43 = vmax.f32 %v4008_v48, 0.0  ;;  %v4013_v56 = vmax.f32 %v4009_v42, 0.0 }
 0x7cb   :  { %v4034_v33 = vmax.f32 %v4030_v39, 0.0  ;;  %v4035_v40 = vmax.f32 %v4031_v52, 0.0  ;;  %v4036_v6 = vmax.f32 %v4032_v54, 0.0  ;;  %v4037_v49 = vmax.f32 %v4033_v47, 0.0 }
 0x7cc   :  { %v6173_v8 = vmul.f32 %v6400_v9, %v4010_v55  ;;  %v6176_v59 = vmul.f32 %v6400_v9, %v4011_v17  ;;  %v6179_v30 = vmul.f32 %v6400_v9, %v4012_v43  ;;  %v6182_v38 = vmul.f32 %v6400_v9, %v4013_v56 }
 0x7cd   :  { %v6185_v10 = vmul.f32 %v6400_v9, %v4034_v33  ;;  %v6188_v41 = vmul.f32 %v6400_v9, %v4035_v40  ;;  %v6191_v34 = vmul.f32 %v6400_v9, %v4036_v6  ;;  %v6194_v50 = vmul.f32 %v6400_v9, %v4037_v49 }
 0x7ce   :  { %v4054_v62 = vadd.f32 %v6025_v12, %v6061_v3  ;;  %v4055_v19 = vadd.f32 %v6028_v2, %v6064_v31  ;;  %v4056_v16 = vadd.f32 %v6031_v36, %v6067_v22  ;;  %v4057_v13 = vadd.f32 %v6034_v63, %v6070_v53 }
 0x7cf   :  { %v4078_v0 = vadd.f32 %v6037_v45, %v6061_v3  ;;  %v4079_v48 = vadd.f32 %v6040_v7, %v6064_v31  ;;  %v4080_v42 = vadd.f32 %v6043_v51, %v6067_v22  ;;  %v4081_v12 = vadd.f32 %v6046_v27, %v6070_v53 }
 0x7d0   :  { %v4058_v39 = vmax.f32 %v4054_v62, 0.0  ;;  %v4059_v2 = vmax.f32 %v4055_v19, 0.0  ;;  %v4060_v52 = vmax.f32 %v4056_v16, 0.0  ;;  %v4061_v54 = vmax.f32 %v4057_v13, 0.0 }
 0x7d1   :  { %v4082_v36 = vmax.f32 %v4078_v0, 0.0  ;;  %v4083_v47 = vmax.f32 %v4079_v48, 0.0  ;;  %v4084_v55 = vmax.f32 %v4080_v42, 0.0  ;;  %v4085_v63 = vmax.f32 %v4081_v12, 0.0 }
 0x7d2   :  { %v6213_v17 = vmul.f32 %v6400_v9, %v4058_v39  ;;  %v6216_v45 = vmul.f32 %v6400_v9, %v4059_v2  ;;  %v6219_v7 = vmul.f32 %v6400_v9, %v4060_v52  ;;  %v6222_v51 = vmul.f32 %v6400_v9, %v4061_v54 }
 0x7d3   :  { %v6225_v27 = vmul.f32 %v6400_v9, %v4082_v36  ;;  %v6228_v43 = vmul.f32 %v6400_v9, %v4083_v47  ;;  %v6231_v56 = vmul.f32 %v6400_v9, %v4084_v55  ;;  %v6234_v33 = vmul.f32 %v6400_v9, %v4085_v63 }
 0x7d4   :  { %v4102_v40 = vadd.f32 %v6049_v28, %v6061_v3  ;;  %v4103_v6 = vadd.f32 %v6052_v23, %v6064_v31  ;;  %v4104_v49 = vadd.f32 %v6055_v37, %v6067_v22  ;;  %v4105_v62 = vadd.f32 %v6058_v58, %v6070_v53 }
 0x7d5   :  { %v4126_v19 = vadd.f32 %v6073_v35, %v6061_v3  ;;  %v4127_v16 = vadd.f32 %v6076_v25, %v6064_v31  ;;  %v4128_v13 = vadd.f32 %v6079_v5, %v6067_v22  ;;  %v4129_v28 = vadd.f32 %v6082_v24, %v6070_v53 }
 0x7d6   :  { %v4106_v0 = vmax.f32 %v4102_v40, 0.0  ;;  %v4107_v23 = vmax.f32 %v4103_v6, 0.0  ;;  %v4108_v48 = vmax.f32 %v4104_v49, 0.0  ;;  %v4109_v42 = vmax.f32 %v4105_v62, 0.0 }
 0x7d7   :  { %v4130_v37 = vmax.f32 %v4126_v19, 0.0  ;;  %v4131_v12 = vmax.f32 %v4127_v16, 0.0  ;;  %v4132_v39 = vmax.f32 %v4128_v13, 0.0  ;;  %v4133_v58 = vmax.f32 %v4129_v28, 0.0 }
 0x7d8   :  { %v6253_v2 = vmul.f32 %v6400_v9, %v4106_v0  ;;  %v6256_v3 = vmul.f32 %v6400_v9, %v4107_v23  ;;  %v6259_v31 = vmul.f32 %v6400_v9, %v4108_v48  ;;  %v6262_v22 = vmul.f32 %v6400_v9, %v4109_v42 }
 0x7d9   :  { %v6265_v53 = vmul.f32 %v6400_v9, %v4130_v37  ;;  %v6268_v35 = vmul.f32 %v6400_v9, %v4131_v12  ;;  %v6271_v25 = vmul.f32 %v6400_v9, %v4132_v39  ;;  %v6274_v5 = vmul.f32 %v6400_v9, %v4133_v58 }
 0x7da   :  { %4917 = dma.done.wait [#allocation8 + $0x2], 4096 }
 0x7db   :  { %4918 = vsyncadd [#allocation8 + $0x2], 4294963200  ;;  %v4186_v24 = vpack.c.bf16 %v6108_v26, %v6096_v11  ;;  %v4188_v52 = vpack.c.bf16 %v6114_v20, %v6102_v1  ;;  %v4213_v54 = vld [vmem:[#allocation7 + $0x40] sm:$0xff]  ;;  %v4214_v63 = vld [vmem:[#allocation7 + $0x48] sm:$0xff] }
 0x7dc   :  { %v4229_v36 = vld [vmem:[#allocation7 + $0xc0] sm:$0xff]  ;;  %4624 = vmatprep.subr.bf16.mxu0 %v4213_v54  ;;  %v4230_v40 = vld [vmem:[#allocation7 + $0xc8] sm:$0xff]  ;;  %v4215_v11 = vld [vmem:[#allocation7 + $0x50] sm:$0xff] }
 0x7dd   :  { %4269 = vmatprep.mubr.bf16.mxu0 %v4186_v24  ;;  %4342 = vmatprep.mubr.bf16.mxu1 %v4188_v52  ;;  %v4205_v47 = vld [vmem:[#allocation7] sm:$0xff]  ;;  %v4206_v9 = vld [vmem:[#allocation7 + $0x8] sm:$0xff]  ;;  %v4231_v26 = vld [vmem:[#allocation7 + $0xd0] sm:$0xff] }
 0x7de   :  { %4670 = vmatprep.subr.bf16.mxu1 %v4229_v36  ;;  %v4221_v55 = vld [vmem:[#allocation7 + $0x80] sm:$0xff]  ;;  %4625 = vmatpush3.bf16.msra.mxu0 %v4205_v47  ;;  %v4222_v6 = vld [vmem:[#allocation7 + $0x88] sm:$0xff]  ;;  %v4207_v1 = vld [vmem:[#allocation7 + $0x10] sm:$0xff] }
 0x7df   :  { %4671 = vmatpush3.bf16.msra.mxu1 %v4221_v55  ;;  %4626 = vmatprep.subr.bf16.mxu0 %v4214_v63  ;;  %v4223_v20 = vld [vmem:[#allocation7 + $0x90] sm:$0xff]  ;;  %v4216_v49 = vld [vmem:[#allocation7 + $0x58] sm:$0xff]  ;;  %v4217_v13 = vld [vmem:[#allocation7 + $0x60] sm:$0xff]  ;;  %v4185_v63 = vpack.c.bf16 %v6105_v15, %v6093_v32  ;;  %v4191_v32 = vpack.c.bf16 %v6151_v60, %v6139_v21  ;;  %v4196_v15 = vpack.c.bf16 %v6194_v50, %v6182_v38 }
 0x7e0   :  { %4672 = vmatprep.subr.bf16.mxu1 %v4230_v40  ;;  %v4232_v62 = vld [vmem:[#allocation7 + $0xd8] sm:$0xff]  ;;  %v4233_v28 = vld [vmem:[#allocation7 + $0xe0] sm:$0xff]  ;;  %v4218_v48 = vld [vmem:[#allocation7 + $0x68] sm:$0xff]  ;;  %v4187_v40 = vpack.c.bf16 %v6111_v46, %v6099_v61  ;;  %v4194_v61 = vpack.c.bf16 %v6188_v41, %v6176_v59  ;;  %v4193_v46 = vpack.c.bf16 %v6185_v10, %v6173_v8  ;;  %v4200_v21 = vpack.c.bf16 %v6234_v33, %v6222_v51 }
 0x7e1   :  { %v4208_v19 = vld [vmem:[#allocation7 + $0x18] sm:$0xff]  ;;  %v4209_v0 = vld [vmem:[#allocation7 + $0x20] sm:$0xff]  ;;  %v4234_v42 = vld [vmem:[#allocation7 + $0xe8] sm:$0xff]  ;;  %v4204_v60 = vpack.c.bf16 %v6274_v5, %v6262_v22  ;;  %v4203_v8 = vpack.c.bf16 %v6271_v25, %v6259_v31 }
 0x7e2   :  { %4627 = vmatpush3.bf16.msra.mxu0 %v4206_v9  ;;  %v4224_v16 = vld [vmem:[#allocation7 + $0x98] sm:$0xff]  ;;  %v4225_v23 = vld [vmem:[#allocation7 + $0xa0] sm:$0xff]  ;;  %v4210_v37 = vld [vmem:[#allocation7 + $0x28] sm:$0xff]  ;;  %v4190_v9 = vpack.c.bf16 %v6148_v4, %v6136_v14  ;;  %v4195_v14 = vpack.c.bf16 %v6191_v34, %v6179_v30  ;;  %v4202_v4 = vpack.c.bf16 %v6268_v35, %v6256_v3 }
 0x7e3   :  { %4673 = vmatpush3.bf16.msra.mxu1 %v4222_v6  ;;  %4628 = vmatprep.subr.bf16.mxu0 %v4215_v11  ;;  %v4226_v12 = vld [vmem:[#allocation7 + $0xa8] sm:$0xff]  ;;  %v4219_v39 = vld [vmem:[#allocation7 + $0x70] sm:$0xff]  ;;  %v4220_v54 = vld [vmem:[#allocation7 + $0x78] sm:$0xff]  ;;  %v4192_v6 = vpack.c.bf16 %v6154_v57, %v6142_v29  ;;  %v4189_v11 = vpack.c.bf16 %v6145_v44, %v6133_v18  ;;  %v4198_v18 = vpack.c.bf16 %v6228_v43, %v6216_v45 }
 0x7e4   :  { %4674 = vmatprep.subr.bf16.mxu1 %v4231_v26  ;;  %v4235_v58 = vld [vmem:[#allocation7 + $0xf0] sm:$0xff]  ;;  %v4236_v36 = vld [vmem:[#allocation7 + $0xf8] sm:$0xff]  ;;  %v4197_v29 = vpack.c.bf16 %v6225_v27, %v6213_v17  ;;  %v4199_v44 = vpack.c.bf16 %v6231_v56, %v6219_v7  ;;  %v4201_v57 = vpack.c.bf16 %v6265_v53, %v6253_v2 }
 0x7e5   :  { %v4211_v24 = vld [vmem:[#allocation7 + $0x30] sm:$0xff]  ;;  %v4212_v47 = vld [vmem:[#allocation7 + $0x38] sm:$0xff] }
 0x7e6   :  { %4629 = vmatpush3.bf16.msra.mxu0 %v4207_v1  ;;  %v4227_v52 = vld [vmem:[#allocation7 + $0xb0] sm:$0xff]  ;;  %v4228_v55 = vld [vmem:[#allocation7 + $0xb8] sm:$0xff] }
 0x7e7   :  { %4675 = vmatpush3.bf16.msra.mxu1 %v4223_v20  ;;  %4630 = vmatprep.subr.bf16.mxu0 %v4216_v49 }
 0x7e8   :  { %4676 = vmatprep.subr.bf16.mxu1 %v4232_v62 }
 0x7ea   :  { %4631 = vmatpush3.bf16.msra.mxu0 %v4208_v19 }
 0x7eb   :  { %4677 = vmatpush3.bf16.msra.mxu1 %v4224_v16  ;;  %4632 = vmatprep.subr.bf16.mxu0 %v4217_v13 }
 0x7ec   :  { %4678 = vmatprep.subr.bf16.mxu1 %v4233_v28 }
 0x7ee   :  { %4633 = vmatpush3.bf16.msra.mxu0 %v4209_v0 }
 0x7ef   :  { %4679 = vmatpush3.bf16.msra.mxu1 %v4225_v23  ;;  %4634 = vmatprep.subr.bf16.mxu0 %v4218_v48 }
 0x7f0   :  { %4680 = vmatprep.subr.bf16.mxu1 %v4234_v42 }
 0x7f2   :  { %4635 = vmatpush3.bf16.msra.mxu0 %v4210_v37 }
 0x7f3   :  { %4681 = vmatpush3.bf16.msra.mxu1 %v4226_v12  ;;  %4636 = vmatprep.subr.bf16.mxu0 %v4219_v39 }
 0x7f4   :  { %4682 = vmatprep.subr.bf16.mxu1 %v4235_v58 }
 0x7f6   :  { %4637 = vmatpush3.bf16.msra.mxu0 %v4211_v24 }
 0x7f7   :  { %4683 = vmatpush3.bf16.msra.mxu1 %v4227_v52  ;;  %4638 = vmatprep.subr.bf16.mxu0 %v4220_v54 }
 0x7f8   :  { %4684 = vmatprep.subr.bf16.mxu1 %v4236_v36 }
 0x7fa   :  { %4639 = vmatpush3.bf16.msra.mxu0 %v4212_v47 }
 0x7fb   :  { %4685 = vmatpush3.bf16.msra.mxu1 %v4228_v55 }
 0x7fd   :  { %4270 = vmatmul.mubr.bf16.vlgmr.msra.gmra.mrb[56].mxu0 %v4185_v63 }
 0x7fe   :  { %4343 = vmatmul.mubr.bf16.vlgmr.msra.gmra.mrb[56].mxu1 %v4187_v40  ;;  %4277 = vmatprep.mubr.bf16.mxu0 %v4190_v9 }
 0x7ff   :  { %4350 = vmatprep.mubr.bf16.mxu1 %v4192_v6 }
 0x805   :  { %4278 = vmatmul.mubr.bf16.gmra.mrb[60].mxu0 %v4189_v11 }
 0x806   :  { %4351 = vmatmul.mubr.bf16.gmra.mrb[60].mxu1 %v4191_v32  ;;  %4285 = vmatprep.mubr.bf16.mxu0 %v4194_v61 }
 0x807   :  { %4358 = vmatprep.mubr.bf16.mxu1 %v4196_v15 }
 0x80d   :  { %4286 = vmatmul.mubr.bf16.gmra.mrb[64].mxu0 %v4193_v46 }
 0x80e   :  { %4359 = vmatmul.mubr.bf16.gmra.mrb[64].mxu1 %v4195_v14  ;;  %4293 = vmatprep.mubr.bf16.mxu0 %v4198_v18 }
 0x80f   :  { %4366 = vmatprep.mubr.bf16.mxu1 %v4200_v21 }
 0x815   :  { %4294 = vmatmul.mubr.bf16.gmra.mrb[68].mxu0 %v4197_v29 }
 0x816   :  { %4367 = vmatmul.mubr.bf16.gmra.mrb[68].mxu1 %v4199_v44  ;;  %4301 = vmatprep.mubr.bf16.mxu0 %v4202_v4 }
 0x817   :  { %4374 = vmatprep.mubr.bf16.mxu1 %v4204_v60 }
 0x81d   :  { %4302 = vmatmul.mubr.bf16.gmra.mrb[72].mxu0 %v4201_v57 }
 0x81e   :  { %4375 = vmatmul.mubr.bf16.gmra.mrb[72].mxu1 %v4203_v8 }
 0x8d0   :  { %v4640_v59 = vpop.f32.mrb[56].mxu0 }
 0x8d1   :  { %v4686_v30 = vpop.f32.mrb[56].mxu1  ;;  %v4641_v38 = vpop.f32.mrb[57].mxu0 }
 0x8d2   :  { %v4687_v10 = vpop.f32.mrb[57].mxu1  ;;  %v4642_v41 = vadd.f32 %v4641_v38, %v4640_v59  ;;  %v4643_v50 = vpop.f32.mrb[58].mxu0 }
 0x8d3   :  { %v4688_v34 = vadd.f32 %v4687_v10, %v4686_v30  ;;  %v4689_v17 = vpop.f32.mrb[58].mxu1  ;;  %v4644_v45 = vpop.f32.mrb[59].mxu0 }
 0x8d4   :  { %v4690_v7 = vpop.f32.mrb[59].mxu1  ;;  %v4645_v27 = vadd.f32 %v4644_v45, %v4643_v50 }
 0x8d5   :  { %v4345_v51 = vadd.f32 %v4688_v34, %v4642_v41  ;;  %v4691_v43 = vadd.f32 %v4690_v7, %v4689_v17 }
 0x8d7   :  { %v4383_v56 = vsub.f32 0.0, %v4345_v51  ;;  %v4348_v33 = vadd.f32 %v4691_v43, %v4645_v27 }
 0x8d8   :  { %v4646_v31 = vpop.f32.mrb[60].mxu0 }
 0x8d9   :  { %v4393_v2 = vmul.f32 1.442695, %v4383_v56  ;;  %v4384_v3 = vsub.f32 0.0, %v4348_v33  ;;  %v4692_v22 = vpop.f32.mrb[60].mxu1  ;;  %v4647_v53 = vpop.f32.mrb[61].mxu0 }
 0x8da   :  { %v4693_v35 = vpop.f32.mrb[61].mxu1  ;;  %v4648_v5 = vadd.f32 %v4647_v53, %v4646_v31  ;;  %v4649_v1 = vpop.f32.mrb[62].mxu0 }
 0x8db   :  { %4827 = vpow2.f32 %v4393_v2  ;;  %v4395_v25 = vmul.f32 1.442695, %v4384_v3  ;;  %v4694_v26 = vadd.f32 %v4693_v35, %v4692_v22  ;;  %v4695_v20 = vpop.f32.mrb[62].mxu1  ;;  %v4650_v49 = vpop.f32.mrb[63].mxu0 }
 0x8dc   :  { %v4696_v62 = vpop.f32.mrb[63].mxu1  ;;  %v4651_v16 = vadd.f32 %v4650_v49, %v4649_v1 }
 0x8dd   :  { %4829 = vpow2.f32 %v4395_v25  ;;  %v4353_v19 = vadd.f32 %v4694_v26, %v4648_v5  ;;  %v4697_v13 = vadd.f32 %v4696_v62, %v4695_v20 }
 0x8df   :  { %v4385_v28 = vsub.f32 0.0, %v4353_v19  ;;  %v4356_v0 = vadd.f32 %v4697_v13, %v4651_v16 }
 0x8e0   :  { %v4652_v42 = vpop.f32.mrb[64].mxu0 }
 0x8e1   :  { %v4397_v23 = vmul.f32 1.442695, %v4385_v28  ;;  %v4386_v48 = vsub.f32 0.0, %v4356_v0  ;;  %v4698_v37 = vpop.f32.mrb[64].mxu1  ;;  %v4653_v12 = vpop.f32.mrb[65].mxu0 }
 0x8e2   :  { %v4699_v39 = vpop.f32.mrb[65].mxu1  ;;  %v4654_v24 = vadd.f32 %v4653_v12, %v4652_v42  ;;  %v4655_v54 = vpop.f32.mrb[66].mxu0 }
 0x8e3   :  { %4831 = vpow2.f32 %v4397_v23  ;;  %v4399_v58 = vmul.f32 1.442695, %v4386_v48  ;;  %v4700_v52 = vadd.f32 %v4699_v39, %v4698_v37  ;;  %v4701_v36 = vpop.f32.mrb[66].mxu1  ;;  %v4656_v47 = vpop.f32.mrb[67].mxu0 }
 0x8e4   :  { %v4702_v55 = vpop.f32.mrb[67].mxu1  ;;  %v4657_v9 = vadd.f32 %v4656_v47, %v4655_v54 }
 0x8e5   :  { %v4828_v63 = vpop.eup %4827  ;;  %4833 = vpow2.f32 %v4399_v58  ;;  %v4361_v40 = vadd.f32 %v4700_v52, %v4654_v24  ;;  %v4703_v6 = vadd.f32 %v4702_v55, %v4701_v36 }
 0x8e6   :  { %v4413_v11 = vadd.f32 1.0, %v4828_v63 }
 0x8e7   :  { %v4830_v32 = vpop.eup %4829  ;;  %v4387_v61 = vsub.f32 0.0, %v4361_v40  ;;  %v4364_v15 = vadd.f32 %v4703_v6, %v4657_v9 }
 0x8e8   :  { %4835 = vrcp.f32 %v4413_v11  ;;  %v4414_v46 = vadd.f32 1.0, %v4830_v32  ;;  %v4658_v21 = vpop.f32.mrb[68].mxu0 }
 0x8e9   :  { %v4401_v14 = vmul.f32 1.442695, %v4387_v61  ;;  %v4388_v18 = vsub.f32 0.0, %v4364_v15  ;;  %v4704_v29 = vpop.f32.mrb[68].mxu1  ;;  %v4659_v44 = vpop.f32.mrb[69].mxu0 }
 0x8ea   :  { %4837 = vrcp.f32 %v4414_v46  ;;  %v4705_v4 = vpop.f32.mrb[69].mxu1  ;;  %v4660_v57 = vadd.f32 %v4659_v44, %v4658_v21  ;;  %v4661_v59 = vpop.f32.mrb[70].mxu0 }
 0x8eb   :  { %4839 = vpow2.f32 %v4401_v14  ;;  %v4403_v60 = vmul.f32 1.442695, %v4388_v18  ;;  %v4706_v8 = vadd.f32 %v4705_v4, %v4704_v29  ;;  %v4707_v30 = vpop.f32.mrb[70].mxu1  ;;  %v4662_v38 = vpop.f32.mrb[71].mxu0 }
 0x8ec   :  { %v4708_v10 = vpop.f32.mrb[71].mxu1  ;;  %v4663_v50 = vadd.f32 %v4662_v38, %v4661_v59 }
 0x8ed   :  { %v4832_v41 = vpop.eup %4831  ;;  %4841 = vpow2.f32 %v4403_v60  ;;  %v4369_v34 = vadd.f32 %v4706_v8, %v4660_v57  ;;  %v4709_v17 = vadd.f32 %v4708_v10, %v4707_v30 }
 0x8ee   :  { %v4415_v45 = vadd.f32 1.0, %v4832_v41 }
 0x8ef   :  { %v4834_v7 = vpop.eup %4833  ;;  %v4389_v51 = vsub.f32 0.0, %v4369_v34  ;;  %v4372_v27 = vadd.f32 %v4709_v17, %v4663_v50 }
 0x8f0   :  { %4843 = vrcp.f32 %v4415_v45  ;;  %v4416_v43 = vadd.f32 1.0, %v4834_v7  ;;  %v4664_v2 = vpop.f32.mrb[72].mxu0 }
 0x8f1   :  { %v4405_v56 = vmul.f32 1.442695, %v4389_v51  ;;  %v4390_v33 = vsub.f32 0.0, %v4372_v27  ;;  %v4710_v3 = vpop.f32.mrb[72].mxu1  ;;  %v4665_v22 = vpop.f32.mrb[73].mxu0 }
 0x8f2   :  { %v4836_v31 = vpop.eup %4835  ;;  %4845 = vrcp.f32 %v4416_v43  ;;  %v4711_v53 = vpop.f32.mrb[73].mxu1  ;;  %v4666_v5 = vadd.f32 %v4665_v22, %v4664_v2 }
 0x8f3   :  { %v4433_v35 = vmax.f32 %v4836_v31, 0.0  ;;  %4847 = vpow2.f32 %v4405_v56  ;;  %v4407_v25 = vmul.f32 1.442695, %v4390_v33  ;;  %v4667_v26 = vpop.f32.mrb[74].mxu0  ;;  %v4713_v1 = vpop.f32.mrb[74].mxu1  ;;  %v4712_v49 = vadd.f32 %v4711_v53, %v4710_v3 }
 0x8f4   :  { %v4838_v20 = vpop.eup %4837  ;;  %v4668_v62 = vpop.f32.mrb[75].mxu0 }
 0x8f5   :  { %v4714_v19 = vpop.f32.mrb[75].mxu1  ;;  %v4840_v16 = vpop.eup %4839  ;;  %v4443_v13 = vmin.f32 %v4433_v35, 1.0  ;;  %v4434_v28 = vmax.f32 %v4838_v20, 0.0  ;;  %4849 = vpow2.f32 %v4407_v25  ;;  %v4669_v0 = vadd.f32 %v4668_v62, %v4667_v26 }
 0x8f6   :  { %v4417_v23 = vadd.f32 1.0, %v4840_v16  ;;  %v4377_v48 = vadd.f32 %v4712_v49, %v4666_v5  ;;  %v4715_v42 = vadd.f32 %v4714_v19, %v4713_v1 }
 0x8f7   :  { %v4842_v37 = vpop.eup %4841  ;;  %4453 = vst [vmem:[%s6357_s11] sm:$0xff] %v4443_v13  ;;  %v4444_v12 = vmin.f32 %v4434_v28, 1.0 }
 0x8f8   :  { %4851 = vrcp.f32 %v4417_v23  ;;  %v4418_v39 = vadd.f32 1.0, %v4842_v37  ;;  %v4391_v58 = vsub.f32 0.0, %v4377_v48  ;;  %v4380_v24 = vadd.f32 %v4715_v42, %v4669_v0 }
 0x8f9   :  { %4454 = vst [vmem:[%s6357_s11 + $0x8] sm:$0xff] %v4444_v12 }
 0x8fa   :  { %v4844_v52 = vpop.eup %4843  ;;  %4853 = vrcp.f32 %v4418_v39  ;;  %v4409_v54 = vmul.f32 1.442695, %v4391_v58  ;;  %v4392_v36 = vsub.f32 0.0, %v4380_v24 }
 0x8fb   :  { %v4435_v47 = vmax.f32 %v4844_v52, 0.0 }
 0x8fc   :  { %v4846_v55 = vpop.eup %4845  ;;  %4855 = vpow2.f32 %v4409_v54  ;;  %v4411_v63 = vmul.f32 1.442695, %v4392_v36 }
 0x8fd   :  { %v4848_v40 = vpop.eup %4847  ;;  %v4445_v9 = vmin.f32 %v4435_v47, 1.0  ;;  %v4436_v6 = vmax.f32 %v4846_v55, 0.0 }
 0x8fe   :  { %v4419_v11 = vadd.f32 1.0, %v4848_v40  ;;  %4857 = vpow2.f32 %v4411_v63 }
 0x8ff   :  { %v4850_v32 = vpop.eup %4849  ;;  %4455 = vst [vmem:[%s6357_s11 + $0x10] sm:$0xff] %v4445_v9  ;;  %v4446_v61 = vmin.f32 %v4436_v6, 1.0 }
 0x900   :  { %4859 = vrcp.f32 %v4419_v11  ;;  %v4420_v15 = vadd.f32 1.0, %v4850_v32 }
 0x901   :  { %4456 = vst [vmem:[%s6357_s11 + $0x18] sm:$0xff] %v4446_v61 }
 0x902   :  { %v4852_v46 = vpop.eup %4851  ;;  %4861 = vrcp.f32 %v4420_v15 }
 0x903   :  { %v4437_v14 = vmax.f32 %v4852_v46, 0.0 }
 0x904   :  { %v4854_v18 = vpop.eup %4853 }
 0x905   :  { %v4447_v21 = vmin.f32 %v4437_v14, 1.0  ;;  %v4438_v29 = vmax.f32 %v4854_v18, 0.0 }
 0x906   :  { %v4856_v44 = vpop.eup %4855 }
 0x907   :  { %4457 = vst [vmem:[%s6357_s11 + $0x20] sm:$0xff] %v4447_v21  ;;  %v4448_v4 = vmin.f32 %v4438_v29, 1.0  ;;  %v4421_v60 = vadd.f32 1.0, %v4856_v44 }
 0x908   :  { %v4858_v57 = vpop.eup %4857 }
 0x909   :  { %4458 = vst [vmem:[%s6357_s11 + $0x28] sm:$0xff] %v4448_v4  ;;  %4863 = vrcp.f32 %v4421_v60  ;;  %v4422_v8 = vadd.f32 1.0, %v4858_v57 }
 0x90a   :  { %v4860_v59 = vpop.eup %4859 }
 0x90b   :  { %v4439_v30 = vmax.f32 %v4860_v59, 0.0  ;;  %4865 = vrcp.f32 %v4422_v8 }
 0x90c   :  { %v4862_v38 = vpop.eup %4861 }
 0x90d   :  { %v4449_v10 = vmin.f32 %v4439_v30, 1.0  ;;  %v4440_v41 = vmax.f32 %v4862_v38, 0.0 }
 0x90f   :  { %4459 = vst [vmem:[%s6357_s11 + $0x30] sm:$0xff] %v4449_v10  ;;  %v4450_v34 = vmin.f32 %v4440_v41, 1.0 }
 0x911   :  { %4460 = vst [vmem:[%s6357_s11 + $0x38] sm:$0xff] %v4450_v34 }
 0x913   :  { %v4864_v50 = vpop.eup %4863 }
 0x914   :  { %v4441_v17 = vmax.f32 %v4864_v50, 0.0 }
 0x915   :  { %v4866_v45 = vpop.eup %4865 }
 0x916   :  { %v4451_v7 = vmin.f32 %v4441_v17, 1.0  ;;  %v4442_v51 = vmax.f32 %v4866_v45, 0.0 }
 0x918   :  { %4461 = vst [vmem:[%s6357_s11 + $0x40] sm:$0xff] %v4451_v7  ;;  %v4452_v27 = vmin.f32 %v4442_v51, 1.0 }
 0x91a   :  { %4462 = vst [vmem:[%s6357_s11 + $0x48] sm:$0xff] %v4452_v27 }
 0x91b   :  { %4467 = vsyncpa [#allocation10], 1 }
 0x91c   :  { %4468 = vsyncmov [#allocation8] }
 0x91f   :  { %s4469_s24 = vpop.sfrf %4468 }
 0x920   :  { %p4621_p2 = scmp.ne.s32.totalorder %s4469_s24, 0 }
 0x922   :  { %4473 = shalt.err (%p4621_p2)  }
 0x923   :  { %4475 = vsyncmov [#allocation8 + $0x1] }
 0x926   :  { %s4476_s6 = vpop.sfrf %4475 }
 0x927   :  { %p4622_p3 = scmp.ne.s32.totalorder %s4476_s6, 0 }
 0x929   :  { %4480 = shalt.err (%p4622_p3)  }
 0x92a   :  { %4482 = vsyncmov [#allocation8 + $0x2] }
 0x92d   :  { %s4483_s25 = vpop.sfrf %4482 }
 0x92e   :  { %p4623_p4 = scmp.ne.s32.totalorder %s4483_s25, 0 }
 0x930   :  { %4487 = shalt.err (%p4623_p4)  }

</bundles_post_ra>
